<compile_context>
chip_gen: v7x
topology: tpu7x:2x2x1
jax: 0.10.0
libtpu: 0.0.40
codegen_flags: <defaults>
</compile_context>

<pallas_src>
import functools

import jax
import jax.numpy as jnp
from jax.experimental import pallas as pl
from jax.experimental.pallas import tpu as pltpu

DIM = 3          # state dimension == number of RK4 sub-models
HIDDEN = 100     # logical hidden size (LayerNorm divisor)
HP = 128         # lane-padded hidden size used inside the kernel
SUMCOL = HIDDEN  # padded lane carrying the MXU-computed row sum
XW = 8           # padded state width fed to the linear_in matmul
HEADS = 2
LAYERS = 2
DELTA = 0.1
LN_EPS = 1e-5    # torch.nn.LayerNorm default


def _rk4_kernel(x_ref, w_in_ref, w_h0_ref, w_h1_ref, b_h_ref, g_ref, bt_ref,
                w_out_ref, b_out_ref, out_ref, park_ref, *, delta):
    half = delta * 0.5
    inv_h = 1.0 / float(HIDDEN)
    mm = w_h0_ref.dtype                       # bf16 (default) or f32 (verify)
    m = pl.program_id(0)                      # which sub-model this step runs

    def ln_sigmoid(y, z_prev, hd, l):
        # Lane SUMCOL of y holds sum(100 real lanes) courtesy of the MXU sum
        # column; lanes > SUMCOL are exactly 0.  Gamma/beta pad lanes are 0,
        # so the normalized pad lanes are zeroed before the residual add.
        s = y[:, SUMCOL:SUMCOL + 1]                         # free from MXU
        s2 = jnp.sum(y * y, axis=-1, keepdims=True)         # includes s^2 once
        mu = s * inv_h
        var = (s2 - s * s) * inv_h - mu * mu                # remove lane-100 term
        yn = (y - mu) * jax.lax.rsqrt(var + LN_EPS)
        yn = yn * g_ref[hd, l] + bt_ref[hd, l]
        return 0.5 * jnp.tanh(0.5 * (yn + z_prev)) + 0.5    # sigmoid, one EUP op

    def model_fwd(h):
        # Both heads' layer-0 matmuls merged into one [tb,HP] @ [HP,2*HP];
        # head 1's half is parked in VMEM so it doesn't stay live in vregs.
        y_full = jnp.dot(h.astype(mm), w_h0_ref[...],
                         preferred_element_type=jnp.float32)
        park_ref[...] = y_full[:, HP:]
        out_acc = b_out_ref[...]                            # [1, 1]
        for hd in range(HEADS):                             # heads sequential
            y0 = (y_full[:, :HP] if hd == 0 else park_ref[...]) + b_h_ref[hd, 0]
            z = ln_sigmoid(y0, h, hd, 0)
            y1 = jnp.dot(z.astype(mm), w_h1_ref[hd],
                         preferred_element_type=jnp.float32) + b_h_ref[hd, 1]
            z = ln_sigmoid(y1, z, hd, 1)
            # linear_out on the MXU: column 0 of an [HP, HP] column matrix.
            out_acc = out_acc + jnp.dot(z.astype(mm), w_out_ref[hd],
                                        preferred_element_type=jnp.float32)[:, 0:1]
        return out_acc                                      # [tb, 1]

    # linear_in on the MXU.  x_ref columns: (d0, d1, d2, 1, 0...); w_in_ref
    # rows: (W[0], W[1], W[2], b, 0...), so h = x @ w_in already has the bias.
    w_in = w_in_ref[...]                                    # [XW, HP] f32
    h = jnp.dot(x_ref[...], w_in, preferred_element_type=jnp.float32)
    row0 = w_in[0:1, :]
    row2 = w_in[2:3, :]
    c12 = half * (w_in[0:1, :] + w_in[1:2, :])              # delta/2*(W0+W1)
    c34 = half * (w_in[1:2, :] + w_in[2:3, :])              # delta/2*(W1+W2)

    # RK4: h is linear in the state, so each stage updates h incrementally
    # instead of re-running linear_in (matches `data += ...` in the reference).
    k1 = model_fwd(h)
    h = h + c12 + (half * k1) * row2              # data += delta/2 * [1, 1, k1]
    k2 = model_fwd(h)
    h = h + (half * (k2 - k1)) * row0             # data += [delta/2*(k2-k1),0,0]
    ksum = k1 + 2.0 * k2
    k3 = model_fwd(h)
    h = h + (half * k3) * row0 + c34              # data += delta/2 * [k3, 1, 1]
    ksum = ksum + 2.0 * k3
    k4 = model_fwd(h)
    ksum = ksum + k4

    # x_m = original input column m, kept f32-exact via a one-hot lane mask.
    lane = jax.lax.broadcasted_iota(jnp.int32, (1, XW), 1)
    x_m = jnp.sum(jnp.where(lane == m, x_ref[...], 0.0), axis=-1, keepdims=True)
    out_ref[...] = x_m + (delta / 6.0) * ksum


def _round_up(n, mult):
    return ((n + mult - 1) // mult) * mult


def _pack_params(params, matmul_dtype):
    """Pad HIDDEN->HP, fold bias / row-sum harvest lanes, merge head layer-0."""
    w_in, b_in, w_h, b_h, g, bt, w_out, b_out = params
    f32 = jnp.float32
    p = HP - HIDDEN

    # linear_in (+ bias) as one [XW, HP] f32 matmul weight per model.
    w_in_all = jnp.zeros((DIM, XW, HP), f32)
    w_in_all = w_in_all.at[:, 0:DIM, :HIDDEN].set(w_in.astype(f32))
    w_in_all = w_in_all.at[:, DIM, :HIDDEN].set(b_in[:, 0, :].astype(f32))

    # Hidden weights: pad to HP and write each row's real-column sum into the
    # padded output lane SUMCOL so the MXU hands us the LayerNorm row sum.
    w_h = w_h.astype(f32)                                   # [D,HD,L,H,H]
    row_sums = jnp.sum(w_h, axis=-1)                        # [D,HD,L,H]
    w_h_p = jnp.pad(w_h, ((0, 0),) * 3 + ((0, p), (0, p)))
    w_h_p = w_h_p.at[..., :HIDDEN, SUMCOL].set(row_sums)    # pad rows stay 0
    # Layer 0 of both heads merged along the output dim: [DIM, HP, 2*HP].
    w_h0 = jnp.concatenate([w_h_p[:, 0, 0], w_h_p[:, 1, 0]], axis=-1)
    w_h1 = w_h_p[:, :, 1]                                   # [DIM, HEADS, HP, HP]

    b_h = b_h.astype(f32)                                   # [D,HD,L,1,H]
    bias_sums = jnp.sum(b_h, axis=-1, keepdims=True)
    b_h_p = jnp.pad(b_h, ((0, 0),) * 4 + ((0, p),))
    b_h_p = b_h_p.at[..., SUMCOL:SUMCOL + 1].set(bias_sums)

    g_p = jnp.pad(g.astype(f32), ((0, 0),) * 4 + ((0, p),))   # pad gamma -> 0
    bt_p = jnp.pad(bt.astype(f32), ((0, 0),) * 4 + ((0, p),))

    # linear_out as a column matrix so its reduction runs on the MXU.
    w_out_col = jnp.zeros((DIM, HEADS, HP, HP), f32)
    w_out_col = w_out_col.at[:, :, :HIDDEN, 0].set(w_out[:, :, 0, :].astype(f32))

    return (w_in_all, w_h0.astype(matmul_dtype), w_h1.astype(matmul_dtype),
            b_h_p, g_p, bt_p, w_out_col.astype(matmul_dtype),
            b_out.astype(f32))


def rk4_pallas(inputs, params, *, delta=DELTA, tb=128,
               matmul_dtype=jnp.bfloat16):
    """inputs: [B, 1, DIM] float32 -> [B, DIM] float32."""
    B = inputs.shape[0]
    assert inputs.shape[1] == 1 and inputs.shape[2] == DIM
    packed = _pack_params(params, matmul_dtype)

    # Batch tile: multiple of 8, never larger than the rounded-up batch.  The
    # DIM grid axis already guarantees >= 3 parallel steps, so both v7x
    # TensorCores stay busy even for small batches.
    tb = _round_up(max(8, min(tb, _round_up(B, 8))), 8)
    B_pad = _round_up(B, tb)

    x = inputs[:, 0, :].astype(jnp.float32)
    x_pad = jnp.zeros((B_pad, XW), jnp.float32)
    x_pad = x_pad.at[:B, :DIM].set(x)
    x_pad = x_pad.at[:B, DIM].set(1.0)        # ones column -> folded bias row

    def wspec(shape):   # per-model weight block; leading DIM axis squeezed
        rest = len(shape) - 1
        return pl.BlockSpec((None,) + shape[1:],
                            lambda m, i, _r=rest: (m,) + (0,) * _r)

    out = pl.pallas_call(
        functools.partial(_rk4_kernel, delta=delta),
        out_shape=jax.ShapeDtypeStruct((DIM, B_pad, 1), jnp.float32),
        grid=(DIM, B_pad // tb),
        in_specs=[pl.BlockSpec((tb, XW), lambda m, i: (i, 0))]
                 + [wspec(a.shape) for a in packed],
        out_specs=pl.BlockSpec((None, tb, 1), lambda m, i: (m, i, 0)),
        scratch_shapes=[pltpu.VMEM((tb, HP), jnp.float32)],
        compiler_params=pltpu.CompilerParams(
            dimension_semantics=("parallel", "parallel")),
    )(x_pad, *packed)
    return out[:, :B, 0].T


def init_params(key):
    """Deterministic synthetic init mimicking PyTorch defaults (H=100 layout)."""
    ks = jax.random.split(key, 6)

    def u(k, shape, fan_in):
        lim = 1.0 / (fan_in ** 0.5)
        return jax.random.uniform(k, shape, jnp.float32, -lim, lim)

    w_in = u(ks[0], (DIM, DIM, HIDDEN), DIM)
    b_in = u(ks[1], (DIM, 1, HIDDEN), DIM)
    w_h = u(ks[2], (DIM, HEADS, LAYERS, HIDDEN, HIDDEN), HIDDEN)
    b_h = u(ks[3], (DIM, HEADS, LAYERS, 1, HIDDEN), HIDDEN)
    g = jnp.ones((DIM, HEADS, LAYERS, 1, HIDDEN), jnp.float32)    # LN weight
    bt = jnp.zeros((DIM, HEADS, LAYERS, 1, HIDDEN), jnp.float32)  # LN bias
    w_out = u(ks[4], (DIM, HEADS, 1, HIDDEN), HIDDEN * HEADS)
    b_out = u(ks[5], (DIM, 1, 1), HIDDEN * HEADS)
    return (w_in, b_in, w_h, b_h, g, bt, w_out, b_out)


def rk4_ref(inputs, params, *, delta=DELTA):
    """Pure-JAX reference matching the PyTorch semantics."""
    w_in, b_in, w_h, b_h, g, bt, w_out, b_out = params
    data0 = inputs[:, 0, :].astype(jnp.float32)
    B = data0.shape[0]
    half = delta * 0.5

    def model(m, d):
        h = d @ w_in[m] + b_in[m, 0]
        heads = []
        for hd in range(HEADS):
            z = h
            for l in range(LAYERS):
                y = z @ w_h[m, hd, l] + b_h[m, hd, l, 0]
                mu = y.mean(-1, keepdims=True)
                var = ((y - mu) ** 2).mean(-1, keepdims=True)
                yn = (y - mu) / jnp.sqrt(var + LN_EPS)
                yn = yn * g[m, hd, l, 0] + bt[m, hd, l, 0]
                z = jax.nn.sigmoid(yn + z)
            heads.append(z)
        out = b_out[m, 0]
        for hd in range(HEADS):
            out = out + jnp.sum(heads[hd] * w_out[m, hd, 0], axis=-1,
                                keepdims=True)
        return out

    res = []
    for m in range(DIM):
        d = data0
        k1 = model(m, d)
        d = d + jnp.concatenate([jnp.full((B, 2), half), half * k1], axis=1)
        k2 = model(m, d)
        d = d + jnp.concatenate([half * (k2 - k1), jnp.zeros((B, 2))], axis=1)
        k3 = model(m, d)
        d = d + jnp.concatenate([half * k3, jnp.full((B, 2), half)], axis=1)
        k4 = model(m, d)
        res.append(data0[:, m:m + 1]
                   + (delta / 6.0) * (k1 + 2.0 * k2 + 2.0 * k3 + k4))
    return jnp.concatenate(res, axis=1)


if __name__ == "__main__":
    key = jax.random.PRNGKey(0)
    pkey, xkey = jax.random.split(key)
    params = init_params(pkey)

    # Small shape consistent with the module: [batch, 1, dim].  f32 MXU path
    # is a bit-tight verification mode.
    x_small = jax.random.normal(xkey, (8, 1, DIM), jnp.float32)
    ref_small = rk4_ref(x_small, params)
    out_f32 = jax.block_until_ready(
        rk4_pallas(x_small, params, matmul_dtype=jnp.float32))
    assert out_f32.shape == (8, DIM), out_f32.shape
    assert jnp.allclose(out_f32, ref_small, atol=5e-4, rtol=5e-4), (
        float(jnp.max(jnp.abs(out_f32 - ref_small))))

    # Default bf16-MXU production path on a batch exercising tb=128 and a
    # (3, 2) parallel grid (both v7x TensorCores get work).
    x_big = jax.random.normal(xkey, (256, 1, DIM), jnp.float32)
    ref_big = rk4_ref(x_big, params)
    out_bf16 = jax.block_until_ready(rk4_pallas(x_big, params))
    assert out_bf16.shape == (256, DIM), out_bf16.shape
    assert jnp.allclose(out_bf16, ref_big, atol=2e-2, rtol=2e-2), (
        float(jnp.max(jnp.abs(out_bf16 - ref_big))))

    print("KERNEL_OK")
</pallas_src>

<mosaic_0001>
module attributes {stable_mosaic.version = 11 : i64} {
  func.func @_rk4_kernel(%arg0: i32, %arg1: i32, %arg2: memref<8x8xf32, #tpu.memory_space<vmem>>, %arg3: memref<1x8x128xf32, #tpu.memory_space<vmem>>, %arg4: memref<1x128x256xf32, #tpu.memory_space<vmem>>, %arg5: memref<1x2x128x128xf32, #tpu.memory_space<vmem>>, %arg6: memref<1x2x2x1x128xf32, #tpu.memory_space<vmem>>, %arg7: memref<1x2x2x1x128xf32, #tpu.memory_space<vmem>>, %arg8: memref<1x2x2x1x128xf32, #tpu.memory_space<vmem>>, %arg9: memref<1x2x128x128xf32, #tpu.memory_space<vmem>>, %arg10: memref<1x1x1xf32, #tpu.memory_space<vmem>>, %arg11: memref<1x8x1xf32, #tpu.memory_space<vmem>>, %arg12: memref<8x128xf32, #tpu.memory_space<vmem>>) attributes {dimension_semantics = [#tpu.dimension_semantics<parallel>, #tpu.dimension_semantics<parallel>], iteration_bounds = array<i64: 3, 1>, scalar_prefetch = 0 : i64, scratch_operands = 1 : i64, tpu.core_type = #tpu.core_type<tc>, window_params = [{transform_indices = @transform_0, window_bounds = array<i64: 8, 8>}, {transform_indices = @transform_1, window_bounds = array<i64: 1, 8, 128>}, {transform_indices = @transform_2, window_bounds = array<i64: 1, 128, 256>}, {transform_indices = @transform_3, window_bounds = array<i64: 1, 2, 128, 128>}, {transform_indices = @transform_4, window_bounds = array<i64: 1, 2, 2, 1, 128>}, {transform_indices = @transform_5, window_bounds = array<i64: 1, 2, 2, 1, 128>}, {transform_indices = @transform_6, window_bounds = array<i64: 1, 2, 2, 1, 128>}, {transform_indices = @transform_7, window_bounds = array<i64: 1, 2, 128, 128>}, {transform_indices = @transform_8, window_bounds = array<i64: 1, 1, 1>}, {transform_indices = @transform_9, window_bounds = array<i64: 1, 8, 1>}]} {
    %c0 = arith.constant 0 : index
    %c0_0 = arith.constant 0 : index
    %c0_1 = arith.constant 0 : index
    %0 = vector.load %arg3[%c0, %c0_0, %c0_1] : memref<1x8x128xf32, #tpu.memory_space<vmem>>, vector<1x8x128xf32>
    %1 = vector.shape_cast %0 : vector<1x8x128xf32> to vector<8x128xf32>
    %c0_2 = arith.constant 0 : index
    %c0_3 = arith.constant 0 : index
    %2 = vector.load %arg2[%c0_2, %c0_3] : memref<8x8xf32, #tpu.memory_space<vmem>>, vector<8x8xf32>
    %cst = arith.constant dense<0.000000e+00> : vector<8x128xf32>
    %3 = tpu.matmul %2, %1, %cst {dimension_numbers = #tpu.dot_dimension_numbers<[1], [0], [0], [1], [0, 0, 1, 1], [], []>} : vector<8x8xf32>, vector<8x128xf32>, vector<8x128xf32> -> vector<8x128xf32>
    %4 = vector.extract_strided_slice %1 {offsets = [0, 0], sizes = [1, 128], strides = [1, 1]} : vector<8x128xf32> to vector<1x128xf32>
    %5 = vector.extract_strided_slice %1 {offsets = [2, 0], sizes = [1, 128], strides = [1, 1]} : vector<8x128xf32> to vector<1x128xf32>
    %6 = vector.extract_strided_slice %1 {offsets = [0, 0], sizes = [1, 128], strides = [1, 1]} : vector<8x128xf32> to vector<1x128xf32>
    %7 = vector.extract_strided_slice %1 {offsets = [1, 0], sizes = [1, 128], strides = [1, 1]} : vector<8x128xf32> to vector<1x128xf32>
    %8 = arith.addf %6, %7 : vector<1x128xf32>
    %cst_4 = arith.constant 5.000000e-02 : f32
    %9 = vector.broadcast %cst_4 : f32 to vector<1x128xf32>
    %10 = arith.mulf %9, %8 : vector<1x128xf32>
    %11 = vector.extract_strided_slice %1 {offsets = [1, 0], sizes = [1, 128], strides = [1, 1]} : vector<8x128xf32> to vector<1x128xf32>
    %12 = vector.extract_strided_slice %1 {offsets = [2, 0], sizes = [1, 128], strides = [1, 1]} : vector<8x128xf32> to vector<1x128xf32>
    %13 = arith.addf %11, %12 : vector<1x128xf32>
    %cst_5 = arith.constant 5.000000e-02 : f32
    %14 = vector.broadcast %cst_5 : f32 to vector<1x128xf32>
    %15 = arith.mulf %14, %13 : vector<1x128xf32>
    %c0_6 = arith.constant 0 : index
    %c0_7 = arith.constant 0 : index
    %c0_8 = arith.constant 0 : index
    %16 = vector.load %arg4[%c0_6, %c0_7, %c0_8] : memref<1x128x256xf32, #tpu.memory_space<vmem>>, vector<1x128x256xf32>
    %17 = vector.shape_cast %16 : vector<1x128x256xf32> to vector<128x256xf32>
    %cst_9 = arith.constant dense<0.000000e+00> : vector<8x256xf32>
    %18 = tpu.matmul %3, %17, %cst_9 {dimension_numbers = #tpu.dot_dimension_numbers<[1], [0], [0], [1], [0, 0, 1, 1], [], []>} : vector<8x128xf32>, vector<128x256xf32>, vector<8x256xf32> -> vector<8x256xf32>
    %19 = vector.extract_strided_slice %18 {offsets = [0, 128], sizes = [8, 128], strides = [1, 1]} : vector<8x256xf32> to vector<8x128xf32>
    %c0_10 = arith.constant 0 : index
    %c0_11 = arith.constant 0 : index
    %20 = vector.load %arg12[%c0_10, %c0_11] : memref<8x128xf32, #tpu.memory_space<vmem>>, vector<8x128xf32>
    tpu.vector_store %arg12[%c0_10, %c0_11], %19 {strides = array<i32>} : memref<8x128xf32, #tpu.memory_space<vmem>>, vector<8x128xf32>,
    %c0_12 = arith.constant 0 : index
    %c0_13 = arith.constant 0 : index
    %c0_14 = arith.constant 0 : index
    %21 = vector.load %arg10[%c0_12, %c0_13, %c0_14] : memref<1x1x1xf32, #tpu.memory_space<vmem>>, vector<1x1x1xf32>
    %22 = vector.shape_cast %21 : vector<1x1x1xf32> to vector<1x1xf32>
    %23 = vector.extract_strided_slice %18 {offsets = [0, 0], sizes = [8, 128], strides = [1, 1]} : vector<8x256xf32> to vector<8x128xf32>
    %c0_15 = arith.constant 0 : index
    %c0_16 = arith.constant 0 : index
    %c0_17 = arith.constant 0 : index
    %c0_18 = arith.constant 0 : index
    %c0_19 = arith.constant 0 : index
    %24 = vector.load %arg6[%c0_15, %c0_16, %c0_17, %c0_18, %c0_19] : memref<1x2x2x1x128xf32, #tpu.memory_space<vmem>>, vector<1x1x1x1x128xf32>
    %25 = vector.shape_cast %24 : vector<1x1x1x1x128xf32> to vector<1x128xf32>
    %26 = vector.broadcast %25 : vector<1x128xf32> to vector<8x128xf32>
    %27 = arith.addf %23, %26 : vector<8x128xf32>
    %28 = vector.extract_strided_slice %27 {offsets = [0, 100], sizes = [8, 1], strides = [1, 1]} : vector<8x128xf32> to vector<8x1xf32>
    %29 = arith.mulf %27, %27 : vector<8x128xf32>
    %cst_20 = arith.constant dense<0.000000e+00> : vector<8xf32>
    %30 = vector.multi_reduction <add>, %29, %cst_20 [1] : vector<8x128xf32> to vector<8xf32>
    %31 = vector.shape_cast %30 : vector<8xf32> to vector<8x1xf32>
    %cst_21 = arith.constant 0.00999999977 : f32
    %32 = vector.broadcast %cst_21 : f32 to vector<8x1xf32>
    %33 = arith.mulf %28, %32 : vector<8x1xf32>
    %34 = arith.mulf %28, %28 : vector<8x1xf32>
    %35 = arith.subf %31, %34 : vector<8x1xf32>
    %cst_22 = arith.constant 0.00999999977 : f32
    %36 = vector.broadcast %cst_22 : f32 to vector<8x1xf32>
    %37 = arith.mulf %35, %36 : vector<8x1xf32>
    %38 = arith.mulf %33, %33 : vector<8x1xf32>
    %39 = arith.subf %37, %38 : vector<8x1xf32>
    %40 = vector.broadcast %33 : vector<8x1xf32> to vector<8x128xf32>
    %41 = arith.subf %27, %40 : vector<8x128xf32>
    %cst_23 = arith.constant 9.99999974E-6 : f32
    %42 = vector.broadcast %cst_23 : f32 to vector<8x1xf32>
    %43 = arith.addf %39, %42 : vector<8x1xf32>
    %44 = math.rsqrt %43 : vector<8x1xf32>
    %45 = vector.broadcast %44 : vector<8x1xf32> to vector<8x128xf32>
    %46 = arith.mulf %41, %45 : vector<8x128xf32>
    %c0_24 = arith.constant 0 : index
    %c0_25 = arith.constant 0 : index
    %c0_26 = arith.constant 0 : index
    %c0_27 = arith.constant 0 : index
    %c0_28 = arith.constant 0 : index
    %47 = vector.load %arg7[%c0_24, %c0_25, %c0_26, %c0_27, %c0_28] : memref<1x2x2x1x128xf32, #tpu.memory_space<vmem>>, vector<1x1x1x1x128xf32>
    %48 = vector.shape_cast %47 : vector<1x1x1x1x128xf32> to vector<1x128xf32>
    %49 = vector.broadcast %48 : vector<1x128xf32> to vector<8x128xf32>
    %50 = arith.mulf %46, %49 : vector<8x128xf32>
    %c0_29 = arith.constant 0 : index
    %c0_30 = arith.constant 0 : index
    %c0_31 = arith.constant 0 : index
    %c0_32 = arith.constant 0 : index
    %c0_33 = arith.constant 0 : index
    %51 = vector.load %arg8[%c0_29, %c0_30, %c0_31, %c0_32, %c0_33] : memref<1x2x2x1x128xf32, #tpu.memory_space<vmem>>, vector<1x1x1x1x128xf32>
    %52 = vector.shape_cast %51 : vector<1x1x1x1x128xf32> to vector<1x128xf32>
    %53 = vector.broadcast %52 : vector<1x128xf32> to vector<8x128xf32>
    %54 = arith.addf %50, %53 : vector<8x128xf32>
    %55 = arith.addf %54, %3 : vector<8x128xf32>
    %cst_34 = arith.constant 5.000000e-01 : f32
    %56 = vector.broadcast %cst_34 : f32 to vector<8x128xf32>
    %57 = arith.mulf %56, %55 : vector<8x128xf32>
    %58 = math.tanh %57 : vector<8x128xf32>
    %cst_35 = arith.constant 5.000000e-01 : f32
    %59 = vector.broadcast %cst_35 : f32 to vector<8x128xf32>
    %60 = arith.mulf %59, %58 : vector<8x128xf32>
    %cst_36 = arith.constant 5.000000e-01 : f32
    %61 = vector.broadcast %cst_36 : f32 to vector<8x128xf32>
    %62 = arith.addf %60, %61 : vector<8x128xf32>
    %c0_37 = arith.constant 0 : index
    %c0_38 = arith.constant 0 : index
    %c0_39 = arith.constant 0 : index
    %c0_40 = arith.constant 0 : index
    %63 = vector.load %arg5[%c0_37, %c0_38, %c0_39, %c0_40] : memref<1x2x128x128xf32, #tpu.memory_space<vmem>>, vector<1x1x128x128xf32>
    %64 = vector.shape_cast %63 : vector<1x1x128x128xf32> to vector<128x128xf32>
    %cst_41 = arith.constant dense<0.000000e+00> : vector<8x128xf32>
    %65 = tpu.matmul %62, %64, %cst_41 {dimension_numbers = #tpu.dot_dimension_numbers<[1], [0], [0], [1], [0, 0, 1, 1], [], []>} : vector<8x128xf32>, vector<128x128xf32>, vector<8x128xf32> -> vector<8x128xf32>
    %c0_42 = arith.constant 0 : index
    %c0_43 = arith.constant 0 : index
    %c1 = arith.constant 1 : index
    %c0_44 = arith.constant 0 : index
    %c0_45 = arith.constant 0 : index
    %66 = vector.load %arg6[%c0_42, %c0_43, %c1, %c0_44, %c0_45] : memref<1x2x2x1x128xf32, #tpu.memory_space<vmem>>, vector<1x1x1x1x128xf32>
    %67 = vector.shape_cast %66 : vector<1x1x1x1x128xf32> to vector<1x128xf32>
    %68 = vector.broadcast %67 : vector<1x128xf32> to vector<8x128xf32>
    %69 = arith.addf %65, %68 : vector<8x128xf32>
    %70 = vector.extract_strided_slice %69 {offsets = [0, 100], sizes = [8, 1], strides = [1, 1]} : vector<8x128xf32> to vector<8x1xf32>
    %71 = arith.mulf %69, %69 : vector<8x128xf32>
    %cst_46 = arith.constant dense<0.000000e+00> : vector<8xf32>
    %72 = vector.multi_reduction <add>, %71, %cst_46 [1] : vector<8x128xf32> to vector<8xf32>
    %73 = vector.shape_cast %72 : vector<8xf32> to vector<8x1xf32>
    %cst_47 = arith.constant 0.00999999977 : f32
    %74 = vector.broadcast %cst_47 : f32 to vector<8x1xf32>
    %75 = arith.mulf %70, %74 : vector<8x1xf32>
    %76 = arith.mulf %70, %70 : vector<8x1xf32>
    %77 = arith.subf %73, %76 : vector<8x1xf32>
    %cst_48 = arith.constant 0.00999999977 : f32
    %78 = vector.broadcast %cst_48 : f32 to vector<8x1xf32>
    %79 = arith.mulf %77, %78 : vector<8x1xf32>
    %80 = arith.mulf %75, %75 : vector<8x1xf32>
    %81 = arith.subf %79, %80 : vector<8x1xf32>
    %82 = vector.broadcast %75 : vector<8x1xf32> to vector<8x128xf32>
    %83 = arith.subf %69, %82 : vector<8x128xf32>
    %cst_49 = arith.constant 9.99999974E-6 : f32
    %84 = vector.broadcast %cst_49 : f32 to vector<8x1xf32>
    %85 = arith.addf %81, %84 : vector<8x1xf32>
    %86 = math.rsqrt %85 : vector<8x1xf32>
    %87 = vector.broadcast %86 : vector<8x1xf32> to vector<8x128xf32>
    %88 = arith.mulf %83, %87 : vector<8x128xf32>
    %c0_50 = arith.constant 0 : index
    %c0_51 = arith.constant 0 : index
    %c1_52 = arith.constant 1 : index
    %c0_53 = arith.constant 0 : index
    %c0_54 = arith.constant 0 : index
    %89 = vector.load %arg7[%c0_50, %c0_51, %c1_52, %c0_53, %c0_54] : memref<1x2x2x1x128xf32, #tpu.memory_space<vmem>>, vector<1x1x1x1x128xf32>
    %90 = vector.shape_cast %89 : vector<1x1x1x1x128xf32> to vector<1x128xf32>
    %91 = vector.broadcast %90 : vector<1x128xf32> to vector<8x128xf32>
    %92 = arith.mulf %88, %91 : vector<8x128xf32>
    %c0_55 = arith.constant 0 : index
    %c0_56 = arith.constant 0 : index
    %c1_57 = arith.constant 1 : index
    %c0_58 = arith.constant 0 : index
    %c0_59 = arith.constant 0 : index
    %93 = vector.load %arg8[%c0_55, %c0_56, %c1_57, %c0_58, %c0_59] : memref<1x2x2x1x128xf32, #tpu.memory_space<vmem>>, vector<1x1x1x1x128xf32>
    %94 = vector.shape_cast %93 : vector<1x1x1x1x128xf32> to vector<1x128xf32>
    %95 = vector.broadcast %94 : vector<1x128xf32> to vector<8x128xf32>
    %96 = arith.addf %92, %95 : vector<8x128xf32>
    %97 = arith.addf %96, %62 : vector<8x128xf32>
    %cst_60 = arith.constant 5.000000e-01 : f32
    %98 = vector.broadcast %cst_60 : f32 to vector<8x128xf32>
    %99 = arith.mulf %98, %97 : vector<8x128xf32>
    %100 = math.tanh %99 : vector<8x128xf32>
    %cst_61 = arith.constant 5.000000e-01 : f32
    %101 = vector.broadcast %cst_61 : f32 to vector<8x128xf32>
    %102 = arith.mulf %101, %100 : vector<8x128xf32>
    %cst_62 = arith.constant 5.000000e-01 : f32
    %103 = vector.broadcast %cst_62 : f32 to vector<8x128xf32>
    %104 = arith.addf %102, %103 : vector<8x128xf32>
    %c0_63 = arith.constant 0 : index
    %c0_64 = arith.constant 0 : index
    %c0_65 = arith.constant 0 : index
    %c0_66 = arith.constant 0 : index
    %105 = vector.load %arg9[%c0_63, %c0_64, %c0_65, %c0_66] : memref<1x2x128x128xf32, #tpu.memory_space<vmem>>, vector<1x1x128x128xf32>
    %106 = vector.shape_cast %105 : vector<1x1x128x128xf32> to vector<128x128xf32>
    %cst_67 = arith.constant dense<0.000000e+00> : vector<8x128xf32>
    %107 = tpu.matmul %104, %106, %cst_67 {dimension_numbers = #tpu.dot_dimension_numbers<[1], [0], [0], [1], [0, 0, 1, 1], [], []>} : vector<8x128xf32>, vector<128x128xf32>, vector<8x128xf32> -> vector<8x128xf32>
    %108 = vector.extract_strided_slice %107 {offsets = [0, 0], sizes = [8, 1], strides = [1, 1]} : vector<8x128xf32> to vector<8x1xf32>
    %109 = vector.broadcast %22 : vector<1x1xf32> to vector<8x1xf32>
    %110 = arith.addf %109, %108 : vector<8x1xf32>
    %c0_68 = arith.constant 0 : index
    %c0_69 = arith.constant 0 : index
    %111 = vector.load %arg12[%c0_68, %c0_69] : memref<8x128xf32, #tpu.memory_space<vmem>>, vector<8x128xf32>
    %c0_70 = arith.constant 0 : index
    %c1_71 = arith.constant 1 : index
    %c0_72 = arith.constant 0 : index
    %c0_73 = arith.constant 0 : index
    %c0_74 = arith.constant 0 : index
    %112 = vector.load %arg6[%c0_70, %c1_71, %c0_72, %c0_73, %c0_74] : memref<1x2x2x1x128xf32, #tpu.memory_space<vmem>>, vector<1x1x1x1x128xf32>
    %113 = vector.shape_cast %112 : vector<1x1x1x1x128xf32> to vector<1x128xf32>
    %114 = vector.broadcast %113 : vector<1x128xf32> to vector<8x128xf32>
    %115 = arith.addf %111, %114 : vector<8x128xf32>
    %116 = vector.extract_strided_slice %115 {offsets = [0, 100], sizes = [8, 1], strides = [1, 1]} : vector<8x128xf32> to vector<8x1xf32>
    %117 = arith.mulf %115, %115 : vector<8x128xf32>
    %cst_75 = arith.constant dense<0.000000e+00> : vector<8xf32>
    %118 = vector.multi_reduction <add>, %117, %cst_75 [1] : vector<8x128xf32> to vector<8xf32>
    %119 = vector.shape_cast %118 : vector<8xf32> to vector<8x1xf32>
    %cst_76 = arith.constant 0.00999999977 : f32
    %120 = vector.broadcast %cst_76 : f32 to vector<8x1xf32>
    %121 = arith.mulf %116, %120 : vector<8x1xf32>
    %122 = arith.mulf %116, %116 : vector<8x1xf32>
    %123 = arith.subf %119, %122 : vector<8x1xf32>
    %cst_77 = arith.constant 0.00999999977 : f32
    %124 = vector.broadcast %cst_77 : f32 to vector<8x1xf32>
    %125 = arith.mulf %123, %124 : vector<8x1xf32>
    %126 = arith.mulf %121, %121 : vector<8x1xf32>
    %127 = arith.subf %125, %126 : vector<8x1xf32>
    %128 = vector.broadcast %121 : vector<8x1xf32> to vector<8x128xf32>
    %129 = arith.subf %115, %128 : vector<8x128xf32>
    %cst_78 = arith.constant 9.99999974E-6 : f32
    %130 = vector.broadcast %cst_78 : f32 to vector<8x1xf32>
    %131 = arith.addf %127, %130 : vector<8x1xf32>
    %132 = math.rsqrt %131 : vector<8x1xf32>
    %133 = vector.broadcast %132 : vector<8x1xf32> to vector<8x128xf32>
    %134 = arith.mulf %129, %133 : vector<8x128xf32>
    %c0_79 = arith.constant 0 : index
    %c1_80 = arith.constant 1 : index
    %c0_81 = arith.constant 0 : index
    %c0_82 = arith.constant 0 : index
    %c0_83 = arith.constant 0 : index
    %135 = vector.load %arg7[%c0_79, %c1_80, %c0_81, %c0_82, %c0_83] : memref<1x2x2x1x128xf32, #tpu.memory_space<vmem>>, vector<1x1x1x1x128xf32>
    %136 = vector.shape_cast %135 : vector<1x1x1x1x128xf32> to vector<1x128xf32>
    %137 = vector.broadcast %136 : vector<1x128xf32> to vector<8x128xf32>
    %138 = arith.mulf %134, %137 : vector<8x128xf32>
    %c0_84 = arith.constant 0 : index
    %c1_85 = arith.constant 1 : index
    %c0_86 = arith.constant 0 : index
    %c0_87 = arith.constant 0 : index
    %c0_88 = arith.constant 0 : index
    %139 = vector.load %arg8[%c0_84, %c1_85, %c0_86, %c0_87, %c0_88] : memref<1x2x2x1x128xf32, #tpu.memory_space<vmem>>, vector<1x1x1x1x128xf32>
    %140 = vector.shape_cast %139 : vector<1x1x1x1x128xf32> to vector<1x128xf32>
    %141 = vector.broadcast %140 : vector<1x128xf32> to vector<8x128xf32>
    %142 = arith.addf %138, %141 : vector<8x128xf32>
    %143 = arith.addf %142, %3 : vector<8x128xf32>
    %cst_89 = arith.constant 5.000000e-01 : f32
    %144 = vector.broadcast %cst_89 : f32 to vector<8x128xf32>
    %145 = arith.mulf %144, %143 : vector<8x128xf32>
    %146 = math.tanh %145 : vector<8x128xf32>
    %cst_90 = arith.constant 5.000000e-01 : f32
    %147 = vector.broadcast %cst_90 : f32 to vector<8x128xf32>
    %148 = arith.mulf %147, %146 : vector<8x128xf32>
    %cst_91 = arith.constant 5.000000e-01 : f32
    %149 = vector.broadcast %cst_91 : f32 to vector<8x128xf32>
    %150 = arith.addf %148, %149 : vector<8x128xf32>
    %c0_92 = arith.constant 0 : index
    %c1_93 = arith.constant 1 : index
    %c0_94 = arith.constant 0 : index
    %c0_95 = arith.constant 0 : index
    %151 = vector.load %arg5[%c0_92, %c1_93, %c0_94, %c0_95] : memref<1x2x128x128xf32, #tpu.memory_space<vmem>>, vector<1x1x128x128xf32>
    %152 = vector.shape_cast %151 : vector<1x1x128x128xf32> to vector<128x128xf32>
    %cst_96 = arith.constant dense<0.000000e+00> : vector<8x128xf32>
    %153 = tpu.matmul %150, %152, %cst_96 {dimension_numbers = #tpu.dot_dimension_numbers<[1], [0], [0], [1], [0, 0, 1, 1], [], []>} : vector<8x128xf32>, vector<128x128xf32>, vector<8x128xf32> -> vector<8x128xf32>
    %c0_97 = arith.constant 0 : index
    %c1_98 = arith.constant 1 : index
    %c1_99 = arith.constant 1 : index
    %c0_100 = arith.constant 0 : index
    %c0_101 = arith.constant 0 : index
    %154 = vector.load %arg6[%c0_97, %c1_98, %c1_99, %c0_100, %c0_101] : memref<1x2x2x1x128xf32, #tpu.memory_space<vmem>>, vector<1x1x1x1x128xf32>
    %155 = vector.shape_cast %154 : vector<1x1x1x1x128xf32> to vector<1x128xf32>
    %156 = vector.broadcast %155 : vector<1x128xf32> to vector<8x128xf32>
    %157 = arith.addf %153, %156 : vector<8x128xf32>
    %158 = vector.extract_strided_slice %157 {offsets = [0, 100], sizes = [8, 1], strides = [1, 1]} : vector<8x128xf32> to vector<8x1xf32>
    %159 = arith.mulf %157, %157 : vector<8x128xf32>
    %cst_102 = arith.constant dense<0.000000e+00> : vector<8xf32>
    %160 = vector.multi_reduction <add>, %159, %cst_102 [1] : vector<8x128xf32> to vector<8xf32>
    %161 = vector.shape_cast %160 : vector<8xf32> to vector<8x1xf32>
    %cst_103 = arith.constant 0.00999999977 : f32
    %162 = vector.broadcast %cst_103 : f32 to vector<8x1xf32>
    %163 = arith.mulf %158, %162 : vector<8x1xf32>
    %164 = arith.mulf %158, %158 : vector<8x1xf32>
    %165 = arith.subf %161, %164 : vector<8x1xf32>
    %cst_104 = arith.constant 0.00999999977 : f32
    %166 = vector.broadcast %cst_104 : f32 to vector<8x1xf32>
    %167 = arith.mulf %165, %166 : vector<8x1xf32>
    %168 = arith.mulf %163, %163 : vector<8x1xf32>
    %169 = arith.subf %167, %168 : vector<8x1xf32>
    %170 = vector.broadcast %163 : vector<8x1xf32> to vector<8x128xf32>
    %171 = arith.subf %157, %170 : vector<8x128xf32>
    %cst_105 = arith.constant 9.99999974E-6 : f32
    %172 = vector.broadcast %cst_105 : f32 to vector<8x1xf32>
    %173 = arith.addf %169, %172 : vector<8x1xf32>
    %174 = math.rsqrt %173 : vector<8x1xf32>
    %175 = vector.broadcast %174 : vector<8x1xf32> to vector<8x128xf32>
    %176 = arith.mulf %171, %175 : vector<8x128xf32>
    %c0_106 = arith.constant 0 : index
    %c1_107 = arith.constant 1 : index
    %c1_108 = arith.constant 1 : index
    %c0_109 = arith.constant 0 : index
    %c0_110 = arith.constant 0 : index
    %177 = vector.load %arg7[%c0_106, %c1_107, %c1_108, %c0_109, %c0_110] : memref<1x2x2x1x128xf32, #tpu.memory_space<vmem>>, vector<1x1x1x1x128xf32>
    %178 = vector.shape_cast %177 : vector<1x1x1x1x128xf32> to vector<1x128xf32>
    %179 = vector.broadcast %178 : vector<1x128xf32> to vector<8x128xf32>
    %180 = arith.mulf %176, %179 : vector<8x128xf32>
    %c0_111 = arith.constant 0 : index
    %c1_112 = arith.constant 1 : index
    %c1_113 = arith.constant 1 : index
    %c0_114 = arith.constant 0 : index
    %c0_115 = arith.constant 0 : index
    %181 = vector.load %arg8[%c0_111, %c1_112, %c1_113, %c0_114, %c0_115] : memref<1x2x2x1x128xf32, #tpu.memory_space<vmem>>, vector<1x1x1x1x128xf32>
    %182 = vector.shape_cast %181 : vector<1x1x1x1x128xf32> to vector<1x128xf32>
    %183 = vector.broadcast %182 : vector<1x128xf32> to vector<8x128xf32>
    %184 = arith.addf %180, %183 : vector<8x128xf32>
    %185 = arith.addf %184, %150 : vector<8x128xf32>
    %cst_116 = arith.constant 5.000000e-01 : f32
    %186 = vector.broadcast %cst_116 : f32 to vector<8x128xf32>
    %187 = arith.mulf %186, %185 : vector<8x128xf32>
    %188 = math.tanh %187 : vector<8x128xf32>
    %cst_117 = arith.constant 5.000000e-01 : f32
    %189 = vector.broadcast %cst_117 : f32 to vector<8x128xf32>
    %190 = arith.mulf %189, %188 : vector<8x128xf32>
    %cst_118 = arith.constant 5.000000e-01 : f32
    %191 = vector.broadcast %cst_118 : f32 to vector<8x128xf32>
    %192 = arith.addf %190, %191 : vector<8x128xf32>
    %c0_119 = arith.constant 0 : index
    %c1_120 = arith.constant 1 : index
    %c0_121 = arith.constant 0 : index
    %c0_122 = arith.constant 0 : index
    %193 = vector.load %arg9[%c0_119, %c1_120, %c0_121, %c0_122] : memref<1x2x128x128xf32, #tpu.memory_space<vmem>>, vector<1x1x128x128xf32>
    %194 = vector.shape_cast %193 : vector<1x1x128x128xf32> to vector<128x128xf32>
    %cst_123 = arith.constant dense<0.000000e+00> : vector<8x128xf32>
    %195 = tpu.matmul %192, %194, %cst_123 {dimension_numbers = #tpu.dot_dimension_numbers<[1], [0], [0], [1], [0, 0, 1, 1], [], []>} : vector<8x128xf32>, vector<128x128xf32>, vector<8x128xf32> -> vector<8x128xf32>
    %196 = vector.extract_strided_slice %195 {offsets = [0, 0], sizes = [8, 1], strides = [1, 1]} : vector<8x128xf32> to vector<8x1xf32>
    %197 = arith.addf %110, %196 : vector<8x1xf32>
    %198 = vector.broadcast %10 : vector<1x128xf32> to vector<8x128xf32>
    %199 = arith.addf %3, %198 : vector<8x128xf32>
    %cst_124 = arith.constant 5.000000e-02 : f32
    %200 = vector.broadcast %cst_124 : f32 to vector<8x1xf32>
    %201 = arith.mulf %200, %197 : vector<8x1xf32>
    %202 = vector.broadcast %201 : vector<8x1xf32> to vector<8x128xf32>
    %203 = vector.broadcast %5 : vector<1x128xf32> to vector<8x128xf32>
    %204 = arith.mulf %202, %203 : vector<8x128xf32>
    %205 = arith.addf %199, %204 : vector<8x128xf32>
    %c0_125 = arith.constant 0 : index
    %c0_126 = arith.constant 0 : index
    %c0_127 = arith.constant 0 : index
    %206 = vector.load %arg4[%c0_125, %c0_126, %c0_127] : memref<1x128x256xf32, #tpu.memory_space<vmem>>, vector<1x128x256xf32>
    %207 = vector.shape_cast %206 : vector<1x128x256xf32> to vector<128x256xf32>
    %cst_128 = arith.constant dense<0.000000e+00> : vector<8x256xf32>
    %208 = tpu.matmul %205, %207, %cst_128 {dimension_numbers = #tpu.dot_dimension_numbers<[1], [0], [0], [1], [0, 0, 1, 1], [], []>} : vector<8x128xf32>, vector<128x256xf32>, vector<8x256xf32> -> vector<8x256xf32>
    %209 = vector.extract_strided_slice %208 {offsets = [0, 128], sizes = [8, 128], strides = [1, 1]} : vector<8x256xf32> to vector<8x128xf32>
    %c0_129 = arith.constant 0 : index
    %c0_130 = arith.constant 0 : index
    %210 = vector.load %arg12[%c0_129, %c0_130] : memref<8x128xf32, #tpu.memory_space<vmem>>, vector<8x128xf32>
    tpu.vector_store %arg12[%c0_129, %c0_130], %209 {strides = array<i32>} : memref<8x128xf32, #tpu.memory_space<vmem>>, vector<8x128xf32>,
    %c0_131 = arith.constant 0 : index
    %c0_132 = arith.constant 0 : index
    %c0_133 = arith.constant 0 : index
    %211 = vector.load %arg10[%c0_131, %c0_132, %c0_133] : memref<1x1x1xf32, #tpu.memory_space<vmem>>, vector<1x1x1xf32>
    %212 = vector.shape_cast %211 : vector<1x1x1xf32> to vector<1x1xf32>
    %213 = vector.extract_strided_slice %208 {offsets = [0, 0], sizes = [8, 128], strides = [1, 1]} : vector<8x256xf32> to vector<8x128xf32>
    %c0_134 = arith.constant 0 : index
    %c0_135 = arith.constant 0 : index
    %c0_136 = arith.constant 0 : index
    %c0_137 = arith.constant 0 : index
    %c0_138 = arith.constant 0 : index
    %214 = vector.load %arg6[%c0_134, %c0_135, %c0_136, %c0_137, %c0_138] : memref<1x2x2x1x128xf32, #tpu.memory_space<vmem>>, vector<1x1x1x1x128xf32>
    %215 = vector.shape_cast %214 : vector<1x1x1x1x128xf32> to vector<1x128xf32>
    %216 = vector.broadcast %215 : vector<1x128xf32> to vector<8x128xf32>
    %217 = arith.addf %213, %216 : vector<8x128xf32>
    %218 = vector.extract_strided_slice %217 {offsets = [0, 100], sizes = [8, 1], strides = [1, 1]} : vector<8x128xf32> to vector<8x1xf32>
    %219 = arith.mulf %217, %217 : vector<8x128xf32>
    %cst_139 = arith.constant dense<0.000000e+00> : vector<8xf32>
    %220 = vector.multi_reduction <add>, %219, %cst_139 [1] : vector<8x128xf32> to vector<8xf32>
    %221 = vector.shape_cast %220 : vector<8xf32> to vector<8x1xf32>
    %cst_140 = arith.constant 0.00999999977 : f32
    %222 = vector.broadcast %cst_140 : f32 to vector<8x1xf32>
    %223 = arith.mulf %218, %222 : vector<8x1xf32>
    %224 = arith.mulf %218, %218 : vector<8x1xf32>
    %225 = arith.subf %221, %224 : vector<8x1xf32>
    %cst_141 = arith.constant 0.00999999977 : f32
    %226 = vector.broadcast %cst_141 : f32 to vector<8x1xf32>
    %227 = arith.mulf %225, %226 : vector<8x1xf32>
    %228 = arith.mulf %223, %223 : vector<8x1xf32>
    %229 = arith.subf %227, %228 : vector<8x1xf32>
    %230 = vector.broadcast %223 : vector<8x1xf32> to vector<8x128xf32>
    %231 = arith.subf %217, %230 : vector<8x128xf32>
    %cst_142 = arith.constant 9.99999974E-6 : f32
    %232 = vector.broadcast %cst_142 : f32 to vector<8x1xf32>
    %233 = arith.addf %229, %232 : vector<8x1xf32>
    %234 = math.rsqrt %233 : vector<8x1xf32>
    %235 = vector.broadcast %234 : vector<8x1xf32> to vector<8x128xf32>
    %236 = arith.mulf %231, %235 : vector<8x128xf32>
    %c0_143 = arith.constant 0 : index
    %c0_144 = arith.constant 0 : index
    %c0_145 = arith.constant 0 : index
    %c0_146 = arith.constant 0 : index
    %c0_147 = arith.constant 0 : index
    %237 = vector.load %arg7[%c0_143, %c0_144, %c0_145, %c0_146, %c0_147] : memref<1x2x2x1x128xf32, #tpu.memory_space<vmem>>, vector<1x1x1x1x128xf32>
    %238 = vector.shape_cast %237 : vector<1x1x1x1x128xf32> to vector<1x128xf32>
    %239 = vector.broadcast %238 : vector<1x128xf32> to vector<8x128xf32>
    %240 = arith.mulf %236, %239 : vector<8x128xf32>
    %c0_148 = arith.constant 0 : index
    %c0_149 = arith.constant 0 : index
    %c0_150 = arith.constant 0 : index
    %c0_151 = arith.constant 0 : index
    %c0_152 = arith.constant 0 : index
    %241 = vector.load %arg8[%c0_148, %c0_149, %c0_150, %c0_151, %c0_152] : memref<1x2x2x1x128xf32, #tpu.memory_space<vmem>>, vector<1x1x1x1x128xf32>
    %242 = vector.shape_cast %241 : vector<1x1x1x1x128xf32> to vector<1x128xf32>
    %243 = vector.broadcast %242 : vector<1x128xf32> to vector<8x128xf32>
    %244 = arith.addf %240, %243 : vector<8x128xf32>
    %245 = arith.addf %244, %205 : vector<8x128xf32>
    %cst_153 = arith.constant 5.000000e-01 : f32
    %246 = vector.broadcast %cst_153 : f32 to vector<8x128xf32>
    %247 = arith.mulf %246, %245 : vector<8x128xf32>
    %248 = math.tanh %247 : vector<8x128xf32>
    %cst_154 = arith.constant 5.000000e-01 : f32
    %249 = vector.broadcast %cst_154 : f32 to vector<8x128xf32>
    %250 = arith.mulf %249, %248 : vector<8x128xf32>
    %cst_155 = arith.constant 5.000000e-01 : f32
    %251 = vector.broadcast %cst_155 : f32 to vector<8x128xf32>
    %252 = arith.addf %250, %251 : vector<8x128xf32>
    %c0_156 = arith.constant 0 : index
    %c0_157 = arith.constant 0 : index
    %c0_158 = arith.constant 0 : index
    %c0_159 = arith.constant 0 : index
    %253 = vector.load %arg5[%c0_156, %c0_157, %c0_158, %c0_159] : memref<1x2x128x128xf32, #tpu.memory_space<vmem>>, vector<1x1x128x128xf32>
    %254 = vector.shape_cast %253 : vector<1x1x128x128xf32> to vector<128x128xf32>
    %cst_160 = arith.constant dense<0.000000e+00> : vector<8x128xf32>
    %255 = tpu.matmul %252, %254, %cst_160 {dimension_numbers = #tpu.dot_dimension_numbers<[1], [0], [0], [1], [0, 0, 1, 1], [], []>} : vector<8x128xf32>, vector<128x128xf32>, vector<8x128xf32> -> vector<8x128xf32>
    %c0_161 = arith.constant 0 : index
    %c0_162 = arith.constant 0 : index
    %c1_163 = arith.constant 1 : index
    %c0_164 = arith.constant 0 : index
    %c0_165 = arith.constant 0 : index
    %256 = vector.load %arg6[%c0_161, %c0_162, %c1_163, %c0_164, %c0_165] : memref<1x2x2x1x128xf32, #tpu.memory_space<vmem>>, vector<1x1x1x1x128xf32>
    %257 = vector.shape_cast %256 : vector<1x1x1x1x128xf32> to vector<1x128xf32>
    %258 = vector.broadcast %257 : vector<1x128xf32> to vector<8x128xf32>
    %259 = arith.addf %255, %258 : vector<8x128xf32>
    %260 = vector.extract_strided_slice %259 {offsets = [0, 100], sizes = [8, 1], strides = [1, 1]} : vector<8x128xf32> to vector<8x1xf32>
    %261 = arith.mulf %259, %259 : vector<8x128xf32>
    %cst_166 = arith.constant dense<0.000000e+00> : vector<8xf32>
    %262 = vector.multi_reduction <add>, %261, %cst_166 [1] : vector<8x128xf32> to vector<8xf32>
    %263 = vector.shape_cast %262 : vector<8xf32> to vector<8x1xf32>
    %cst_167 = arith.constant 0.00999999977 : f32
    %264 = vector.broadcast %cst_167 : f32 to vector<8x1xf32>
    %265 = arith.mulf %260, %264 : vector<8x1xf32>
    %266 = arith.mulf %260, %260 : vector<8x1xf32>
    %267 = arith.subf %263, %266 : vector<8x1xf32>
    %cst_168 = arith.constant 0.00999999977 : f32
    %268 = vector.broadcast %cst_168 : f32 to vector<8x1xf32>
    %269 = arith.mulf %267, %268 : vector<8x1xf32>
    %270 = arith.mulf %265, %265 : vector<8x1xf32>
    %271 = arith.subf %269, %270 : vector<8x1xf32>
    %272 = vector.broadcast %265 : vector<8x1xf32> to vector<8x128xf32>
    %273 = arith.subf %259, %272 : vector<8x128xf32>
    %cst_169 = arith.constant 9.99999974E-6 : f32
    %274 = vector.broadcast %cst_169 : f32 to vector<8x1xf32>
    %275 = arith.addf %271, %274 : vector<8x1xf32>
    %276 = math.rsqrt %275 : vector<8x1xf32>
    %277 = vector.broadcast %276 : vector<8x1xf32> to vector<8x128xf32>
    %278 = arith.mulf %273, %277 : vector<8x128xf32>
    %c0_170 = arith.constant 0 : index
    %c0_171 = arith.constant 0 : index
    %c1_172 = arith.constant 1 : index
    %c0_173 = arith.constant 0 : index
    %c0_174 = arith.constant 0 : index
    %279 = vector.load %arg7[%c0_170, %c0_171, %c1_172, %c0_173, %c0_174] : memref<1x2x2x1x128xf32, #tpu.memory_space<vmem>>, vector<1x1x1x1x128xf32>
    %280 = vector.shape_cast %279 : vector<1x1x1x1x128xf32> to vector<1x128xf32>
    %281 = vector.broadcast %280 : vector<1x128xf32> to vector<8x128xf32>
    %282 = arith.mulf %278, %281 : vector<8x128xf32>
    %c0_175 = arith.constant 0 : index
    %c0_176 = arith.constant 0 : index
    %c1_177 = arith.constant 1 : index
    %c0_178 = arith.constant 0 : index
    %c0_179 = arith.constant 0 : index
    %283 = vector.load %arg8[%c0_175, %c0_176, %c1_177, %c0_178, %c0_179] : memref<1x2x2x1x128xf32, #tpu.memory_space<vmem>>, vector<1x1x1x1x128xf32>
    %284 = vector.shape_cast %283 : vector<1x1x1x1x128xf32> to vector<1x128xf32>
    %285 = vector.broadcast %284 : vector<1x128xf32> to vector<8x128xf32>
    %286 = arith.addf %282, %285 : vector<8x128xf32>
    %287 = arith.addf %286, %252 : vector<8x128xf32>
    %cst_180 = arith.constant 5.000000e-01 : f32
    %288 = vector.broadcast %cst_180 : f32 to vector<8x128xf32>
    %289 = arith.mulf %288, %287 : vector<8x128xf32>
    %290 = math.tanh %289 : vector<8x128xf32>
    %cst_181 = arith.constant 5.000000e-01 : f32
    %291 = vector.broadcast %cst_181 : f32 to vector<8x128xf32>
    %292 = arith.mulf %291, %290 : vector<8x128xf32>
    %cst_182 = arith.constant 5.000000e-01 : f32
    %293 = vector.broadcast %cst_182 : f32 to vector<8x128xf32>
    %294 = arith.addf %292, %293 : vector<8x128xf32>
    %c0_183 = arith.constant 0 : index
    %c0_184 = arith.constant 0 : index
    %c0_185 = arith.constant 0 : index
    %c0_186 = arith.constant 0 : index
    %295 = vector.load %arg9[%c0_183, %c0_184, %c0_185, %c0_186] : memref<1x2x128x128xf32, #tpu.memory_space<vmem>>, vector<1x1x128x128xf32>
    %296 = vector.shape_cast %295 : vector<1x1x128x128xf32> to vector<128x128xf32>
    %cst_187 = arith.constant dense<0.000000e+00> : vector<8x128xf32>
    %297 = tpu.matmul %294, %296, %cst_187 {dimension_numbers = #tpu.dot_dimension_numbers<[1], [0], [0], [1], [0, 0, 1, 1], [], []>} : vector<8x128xf32>, vector<128x128xf32>, vector<8x128xf32> -> vector<8x128xf32>
    %298 = vector.extract_strided_slice %297 {offsets = [0, 0], sizes = [8, 1], strides = [1, 1]} : vector<8x128xf32> to vector<8x1xf32>
    %299 = vector.broadcast %212 : vector<1x1xf32> to vector<8x1xf32>
    %300 = arith.addf %299, %298 : vector<8x1xf32>
    %c0_188 = arith.constant 0 : index
    %c0_189 = arith.constant 0 : index
    %301 = vector.load %arg12[%c0_188, %c0_189] : memref<8x128xf32, #tpu.memory_space<vmem>>, vector<8x128xf32>
    %c0_190 = arith.constant 0 : index
    %c1_191 = arith.constant 1 : index
    %c0_192 = arith.constant 0 : index
    %c0_193 = arith.constant 0 : index
    %c0_194 = arith.constant 0 : index
    %302 = vector.load %arg6[%c0_190, %c1_191, %c0_192, %c0_193, %c0_194] : memref<1x2x2x1x128xf32, #tpu.memory_space<vmem>>, vector<1x1x1x1x128xf32>
    %303 = vector.shape_cast %302 : vector<1x1x1x1x128xf32> to vector<1x128xf32>
    %304 = vector.broadcast %303 : vector<1x128xf32> to vector<8x128xf32>
    %305 = arith.addf %301, %304 : vector<8x128xf32>
    %306 = vector.extract_strided_slice %305 {offsets = [0, 100], sizes = [8, 1], strides = [1, 1]} : vector<8x128xf32> to vector<8x1xf32>
    %307 = arith.mulf %305, %305 : vector<8x128xf32>
    %cst_195 = arith.constant dense<0.000000e+00> : vector<8xf32>
    %308 = vector.multi_reduction <add>, %307, %cst_195 [1] : vector<8x128xf32> to vector<8xf32>
    %309 = vector.shape_cast %308 : vector<8xf32> to vector<8x1xf32>
    %cst_196 = arith.constant 0.00999999977 : f32
    %310 = vector.broadcast %cst_196 : f32 to vector<8x1xf32>
    %311 = arith.mulf %306, %310 : vector<8x1xf32>
    %312 = arith.mulf %306, %306 : vector<8x1xf32>
    %313 = arith.subf %309, %312 : vector<8x1xf32>
    %cst_197 = arith.constant 0.00999999977 : f32
    %314 = vector.broadcast %cst_197 : f32 to vector<8x1xf32>
    %315 = arith.mulf %313, %314 : vector<8x1xf32>
    %316 = arith.mulf %311, %311 : vector<8x1xf32>
    %317 = arith.subf %315, %316 : vector<8x1xf32>
    %318 = vector.broadcast %311 : vector<8x1xf32> to vector<8x128xf32>
    %319 = arith.subf %305, %318 : vector<8x128xf32>
    %cst_198 = arith.constant 9.99999974E-6 : f32
    %320 = vector.broadcast %cst_198 : f32 to vector<8x1xf32>
    %321 = arith.addf %317, %320 : vector<8x1xf32>
    %322 = math.rsqrt %321 : vector<8x1xf32>
    %323 = vector.broadcast %322 : vector<8x1xf32> to vector<8x128xf32>
    %324 = arith.mulf %319, %323 : vector<8x128xf32>
    %c0_199 = arith.constant 0 : index
    %c1_200 = arith.constant 1 : index
    %c0_201 = arith.constant 0 : index
    %c0_202 = arith.constant 0 : index
    %c0_203 = arith.constant 0 : index
    %325 = vector.load %arg7[%c0_199, %c1_200, %c0_201, %c0_202, %c0_203] : memref<1x2x2x1x128xf32, #tpu.memory_space<vmem>>, vector<1x1x1x1x128xf32>
    %326 = vector.shape_cast %325 : vector<1x1x1x1x128xf32> to vector<1x128xf32>
    %327 = vector.broadcast %326 : vector<1x128xf32> to vector<8x128xf32>
    %328 = arith.mulf %324, %327 : vector<8x128xf32>
    %c0_204 = arith.constant 0 : index
    %c1_205 = arith.constant 1 : index
    %c0_206 = arith.constant 0 : index
    %c0_207 = arith.constant 0 : index
    %c0_208 = arith.constant 0 : index
    %329 = vector.load %arg8[%c0_204, %c1_205, %c0_206, %c0_207, %c0_208] : memref<1x2x2x1x128xf32, #tpu.memory_space<vmem>>, vector<1x1x1x1x128xf32>
    %330 = vector.shape_cast %329 : vector<1x1x1x1x128xf32> to vector<1x128xf32>
    %331 = vector.broadcast %330 : vector<1x128xf32> to vector<8x128xf32>
    %332 = arith.addf %328, %331 : vector<8x128xf32>
    %333 = arith.addf %332, %205 : vector<8x128xf32>
    %cst_209 = arith.constant 5.000000e-01 : f32
    %334 = vector.broadcast %cst_209 : f32 to vector<8x128xf32>
    %335 = arith.mulf %334, %333 : vector<8x128xf32>
    %336 = math.tanh %335 : vector<8x128xf32>
    %cst_210 = arith.constant 5.000000e-01 : f32
    %337 = vector.broadcast %cst_210 : f32 to vector<8x128xf32>
    %338 = arith.mulf %337, %336 : vector<8x128xf32>
    %cst_211 = arith.constant 5.000000e-01 : f32
    %339 = vector.broadcast %cst_211 : f32 to vector<8x128xf32>
    %340 = arith.addf %338, %339 : vector<8x128xf32>
    %c0_212 = arith.constant 0 : index
    %c1_213 = arith.constant 1 : index
    %c0_214 = arith.constant 0 : index
    %c0_215 = arith.constant 0 : index
    %341 = vector.load %arg5[%c0_212, %c1_213, %c0_214, %c0_215] : memref<1x2x128x128xf32, #tpu.memory_space<vmem>>, vector<1x1x128x128xf32>
    %342 = vector.shape_cast %341 : vector<1x1x128x128xf32> to vector<128x128xf32>
    %cst_216 = arith.constant dense<0.000000e+00> : vector<8x128xf32>
    %343 = tpu.matmul %340, %342, %cst_216 {dimension_numbers = #tpu.dot_dimension_numbers<[1], [0], [0], [1], [0, 0, 1, 1], [], []>} : vector<8x128xf32>, vector<128x128xf32>, vector<8x128xf32> -> vector<8x128xf32>
    %c0_217 = arith.constant 0 : index
    %c1_218 = arith.constant 1 : index
    %c1_219 = arith.constant 1 : index
    %c0_220 = arith.constant 0 : index
    %c0_221 = arith.constant 0 : index
    %344 = vector.load %arg6[%c0_217, %c1_218, %c1_219, %c0_220, %c0_221] : memref<1x2x2x1x128xf32, #tpu.memory_space<vmem>>, vector<1x1x1x1x128xf32>
    %345 = vector.shape_cast %344 : vector<1x1x1x1x128xf32> to vector<1x128xf32>
    %346 = vector.broadcast %345 : vector<1x128xf32> to vector<8x128xf32>
    %347 = arith.addf %343, %346 : vector<8x128xf32>
    %348 = vector.extract_strided_slice %347 {offsets = [0, 100], sizes = [8, 1], strides = [1, 1]} : vector<8x128xf32> to vector<8x1xf32>
    %349 = arith.mulf %347, %347 : vector<8x128xf32>
    %cst_222 = arith.constant dense<0.000000e+00> : vector<8xf32>
    %350 = vector.multi_reduction <add>, %349, %cst_222 [1] : vector<8x128xf32> to vector<8xf32>
    %351 = vector.shape_cast %350 : vector<8xf32> to vector<8x1xf32>
    %cst_223 = arith.constant 0.00999999977 : f32
    %352 = vector.broadcast %cst_223 : f32 to vector<8x1xf32>
    %353 = arith.mulf %348, %352 : vector<8x1xf32>
    %354 = arith.mulf %348, %348 : vector<8x1xf32>
    %355 = arith.subf %351, %354 : vector<8x1xf32>
    %cst_224 = arith.constant 0.00999999977 : f32
    %356 = vector.broadcast %cst_224 : f32 to vector<8x1xf32>
    %357 = arith.mulf %355, %356 : vector<8x1xf32>
    %358 = arith.mulf %353, %353 : vector<8x1xf32>
    %359 = arith.subf %357, %358 : vector<8x1xf32>
    %360 = vector.broadcast %353 : vector<8x1xf32> to vector<8x128xf32>
    %361 = arith.subf %347, %360 : vector<8x128xf32>
    %cst_225 = arith.constant 9.99999974E-6 : f32
    %362 = vector.broadcast %cst_225 : f32 to vector<8x1xf32>
    %363 = arith.addf %359, %362 : vector<8x1xf32>
    %364 = math.rsqrt %363 : vector<8x1xf32>
    %365 = vector.broadcast %364 : vector<8x1xf32> to vector<8x128xf32>
    %366 = arith.mulf %361, %365 : vector<8x128xf32>
    %c0_226 = arith.constant 0 : index
    %c1_227 = arith.constant 1 : index
    %c1_228 = arith.constant 1 : index
    %c0_229 = arith.constant 0 : index
    %c0_230 = arith.constant 0 : index
    %367 = vector.load %arg7[%c0_226, %c1_227, %c1_228, %c0_229, %c0_230] : memref<1x2x2x1x128xf32, #tpu.memory_space<vmem>>, vector<1x1x1x1x128xf32>
    %368 = vector.shape_cast %367 : vector<1x1x1x1x128xf32> to vector<1x128xf32>
    %369 = vector.broadcast %368 : vector<1x128xf32> to vector<8x128xf32>
    %370 = arith.mulf %366, %369 : vector<8x128xf32>
    %c0_231 = arith.constant 0 : index
    %c1_232 = arith.constant 1 : index
    %c1_233 = arith.constant 1 : index
    %c0_234 = arith.constant 0 : index
    %c0_235 = arith.constant 0 : index
    %371 = vector.load %arg8[%c0_231, %c1_232, %c1_233, %c0_234, %c0_235] : memref<1x2x2x1x128xf32, #tpu.memory_space<vmem>>, vector<1x1x1x1x128xf32>
    %372 = vector.shape_cast %371 : vector<1x1x1x1x128xf32> to vector<1x128xf32>
    %373 = vector.broadcast %372 : vector<1x128xf32> to vector<8x128xf32>
    %374 = arith.addf %370, %373 : vector<8x128xf32>
    %375 = arith.addf %374, %340 : vector<8x128xf32>
    %cst_236 = arith.constant 5.000000e-01 : f32
    %376 = vector.broadcast %cst_236 : f32 to vector<8x128xf32>
    %377 = arith.mulf %376, %375 : vector<8x128xf32>
    %378 = math.tanh %377 : vector<8x128xf32>
    %cst_237 = arith.constant 5.000000e-01 : f32
    %379 = vector.broadcast %cst_237 : f32 to vector<8x128xf32>
    %380 = arith.mulf %379, %378 : vector<8x128xf32>
    %cst_238 = arith.constant 5.000000e-01 : f32
    %381 = vector.broadcast %cst_238 : f32 to vector<8x128xf32>
    %382 = arith.addf %380, %381 : vector<8x128xf32>
    %c0_239 = arith.constant 0 : index
    %c1_240 = arith.constant 1 : index
    %c0_241 = arith.constant 0 : index
    %c0_242 = arith.constant 0 : index
    %383 = vector.load %arg9[%c0_239, %c1_240, %c0_241, %c0_242] : memref<1x2x128x128xf32, #tpu.memory_space<vmem>>, vector<1x1x128x128xf32>
    %384 = vector.shape_cast %383 : vector<1x1x128x128xf32> to vector<128x128xf32>
    %cst_243 = arith.constant dense<0.000000e+00> : vector<8x128xf32>
    %385 = tpu.matmul %382, %384, %cst_243 {dimension_numbers = #tpu.dot_dimension_numbers<[1], [0], [0], [1], [0, 0, 1, 1], [], []>} : vector<8x128xf32>, vector<128x128xf32>, vector<8x128xf32> -> vector<8x128xf32>
    %386 = vector.extract_strided_slice %385 {offsets = [0, 0], sizes = [8, 1], strides = [1, 1]} : vector<8x128xf32> to vector<8x1xf32>
    %387 = arith.addf %300, %386 : vector<8x1xf32>
    %388 = arith.subf %387, %197 : vector<8x1xf32>
    %cst_244 = arith.constant 5.000000e-02 : f32
    %389 = vector.broadcast %cst_244 : f32 to vector<8x1xf32>
    %390 = arith.mulf %389, %388 : vector<8x1xf32>
    %391 = vector.broadcast %390 : vector<8x1xf32> to vector<8x128xf32>
    %392 = vector.broadcast %4 : vector<1x128xf32> to vector<8x128xf32>
    %393 = arith.mulf %391, %392 : vector<8x128xf32>
    %394 = arith.addf %205, %393 : vector<8x128xf32>
    %cst_245 = arith.constant 2.000000e+00 : f32
    %395 = vector.broadcast %cst_245 : f32 to vector<8x1xf32>
    %396 = arith.mulf %395, %387 : vector<8x1xf32>
    %397 = arith.addf %197, %396 : vector<8x1xf32>
    %c0_246 = arith.constant 0 : index
    %c0_247 = arith.constant 0 : index
    %c0_248 = arith.constant 0 : index
    %398 = vector.load %arg4[%c0_246, %c0_247, %c0_248] : memref<1x128x256xf32, #tpu.memory_space<vmem>>, vector<1x128x256xf32>
    %399 = vector.shape_cast %398 : vector<1x128x256xf32> to vector<128x256xf32>
    %cst_249 = arith.constant dense<0.000000e+00> : vector<8x256xf32>
    %400 = tpu.matmul %394, %399, %cst_249 {dimension_numbers = #tpu.dot_dimension_numbers<[1], [0], [0], [1], [0, 0, 1, 1], [], []>} : vector<8x128xf32>, vector<128x256xf32>, vector<8x256xf32> -> vector<8x256xf32>
    %401 = vector.extract_strided_slice %400 {offsets = [0, 128], sizes = [8, 128], strides = [1, 1]} : vector<8x256xf32> to vector<8x128xf32>
    %c0_250 = arith.constant 0 : index
    %c0_251 = arith.constant 0 : index
    %402 = vector.load %arg12[%c0_250, %c0_251] : memref<8x128xf32, #tpu.memory_space<vmem>>, vector<8x128xf32>
    tpu.vector_store %arg12[%c0_250, %c0_251], %401 {strides = array<i32>} : memref<8x128xf32, #tpu.memory_space<vmem>>, vector<8x128xf32>,
    %c0_252 = arith.constant 0 : index
    %c0_253 = arith.constant 0 : index
    %c0_254 = arith.constant 0 : index
    %403 = vector.load %arg10[%c0_252, %c0_253, %c0_254] : memref<1x1x1xf32, #tpu.memory_space<vmem>>, vector<1x1x1xf32>
    %404 = vector.shape_cast %403 : vector<1x1x1xf32> to vector<1x1xf32>
    %405 = vector.extract_strided_slice %400 {offsets = [0, 0], sizes = [8, 128], strides = [1, 1]} : vector<8x256xf32> to vector<8x128xf32>
    %c0_255 = arith.constant 0 : index
    %c0_256 = arith.constant 0 : index
    %c0_257 = arith.constant 0 : index
    %c0_258 = arith.constant 0 : index
    %c0_259 = arith.constant 0 : index
    %406 = vector.load %arg6[%c0_255, %c0_256, %c0_257, %c0_258, %c0_259] : memref<1x2x2x1x128xf32, #tpu.memory_space<vmem>>, vector<1x1x1x1x128xf32>
    %407 = vector.shape_cast %406 : vector<1x1x1x1x128xf32> to vector<1x128xf32>
    %408 = vector.broadcast %407 : vector<1x128xf32> to vector<8x128xf32>
    %409 = arith.addf %405, %408 : vector<8x128xf32>
    %410 = vector.extract_strided_slice %409 {offsets = [0, 100], sizes = [8, 1], strides = [1, 1]} : vector<8x128xf32> to vector<8x1xf32>
    %411 = arith.mulf %409, %409 : vector<8x128xf32>
    %cst_260 = arith.constant dense<0.000000e+00> : vector<8xf32>
    %412 = vector.multi_reduction <add>, %411, %cst_260 [1] : vector<8x128xf32> to vector<8xf32>
    %413 = vector.shape_cast %412 : vector<8xf32> to vector<8x1xf32>
    %cst_261 = arith.constant 0.00999999977 : f32
    %414 = vector.broadcast %cst_261 : f32 to vector<8x1xf32>
    %415 = arith.mulf %410, %414 : vector<8x1xf32>
    %416 = arith.mulf %410, %410 : vector<8x1xf32>
    %417 = arith.subf %413, %416 : vector<8x1xf32>
    %cst_262 = arith.constant 0.00999999977 : f32
    %418 = vector.broadcast %cst_262 : f32 to vector<8x1xf32>
    %419 = arith.mulf %417, %418 : vector<8x1xf32>
    %420 = arith.mulf %415, %415 : vector<8x1xf32>
    %421 = arith.subf %419, %420 : vector<8x1xf32>
    %422 = vector.broadcast %415 : vector<8x1xf32> to vector<8x128xf32>
    %423 = arith.subf %409, %422 : vector<8x128xf32>
    %cst_263 = arith.constant 9.99999974E-6 : f32
    %424 = vector.broadcast %cst_263 : f32 to vector<8x1xf32>
    %425 = arith.addf %421, %424 : vector<8x1xf32>
    %426 = math.rsqrt %425 : vector<8x1xf32>
    %427 = vector.broadcast %426 : vector<8x1xf32> to vector<8x128xf32>
    %428 = arith.mulf %423, %427 : vector<8x128xf32>
    %c0_264 = arith.constant 0 : index
    %c0_265 = arith.constant 0 : index
    %c0_266 = arith.constant 0 : index
    %c0_267 = arith.constant 0 : index
    %c0_268 = arith.constant 0 : index
    %429 = vector.load %arg7[%c0_264, %c0_265, %c0_266, %c0_267, %c0_268] : memref<1x2x2x1x128xf32, #tpu.memory_space<vmem>>, vector<1x1x1x1x128xf32>
    %430 = vector.shape_cast %429 : vector<1x1x1x1x128xf32> to vector<1x128xf32>
    %431 = vector.broadcast %430 : vector<1x128xf32> to vector<8x128xf32>
    %432 = arith.mulf %428, %431 : vector<8x128xf32>
    %c0_269 = arith.constant 0 : index
    %c0_270 = arith.constant 0 : index
    %c0_271 = arith.constant 0 : index
    %c0_272 = arith.constant 0 : index
    %c0_273 = arith.constant 0 : index
    %433 = vector.load %arg8[%c0_269, %c0_270, %c0_271, %c0_272, %c0_273] : memref<1x2x2x1x128xf32, #tpu.memory_space<vmem>>, vector<1x1x1x1x128xf32>
    %434 = vector.shape_cast %433 : vector<1x1x1x1x128xf32> to vector<1x128xf32>
    %435 = vector.broadcast %434 : vector<1x128xf32> to vector<8x128xf32>
    %436 = arith.addf %432, %435 : vector<8x128xf32>
    %437 = arith.addf %436, %394 : vector<8x128xf32>
    %cst_274 = arith.constant 5.000000e-01 : f32
    %438 = vector.broadcast %cst_274 : f32 to vector<8x128xf32>
    %439 = arith.mulf %438, %437 : vector<8x128xf32>
    %440 = math.tanh %439 : vector<8x128xf32>
    %cst_275 = arith.constant 5.000000e-01 : f32
    %441 = vector.broadcast %cst_275 : f32 to vector<8x128xf32>
    %442 = arith.mulf %441, %440 : vector<8x128xf32>
    %cst_276 = arith.constant 5.000000e-01 : f32
    %443 = vector.broadcast %cst_276 : f32 to vector<8x128xf32>
    %444 = arith.addf %442, %443 : vector<8x128xf32>
    %c0_277 = arith.constant 0 : index
    %c0_278 = arith.constant 0 : index
    %c0_279 = arith.constant 0 : index
    %c0_280 = arith.constant 0 : index
    %445 = vector.load %arg5[%c0_277, %c0_278, %c0_279, %c0_280] : memref<1x2x128x128xf32, #tpu.memory_space<vmem>>, vector<1x1x128x128xf32>
    %446 = vector.shape_cast %445 : vector<1x1x128x128xf32> to vector<128x128xf32>
    %cst_281 = arith.constant dense<0.000000e+00> : vector<8x128xf32>
    %447 = tpu.matmul %444, %446, %cst_281 {dimension_numbers = #tpu.dot_dimension_numbers<[1], [0], [0], [1], [0, 0, 1, 1], [], []>} : vector<8x128xf32>, vector<128x128xf32>, vector<8x128xf32> -> vector<8x128xf32>
    %c0_282 = arith.constant 0 : index
    %c0_283 = arith.constant 0 : index
    %c1_284 = arith.constant 1 : index
    %c0_285 = arith.constant 0 : index
    %c0_286 = arith.constant 0 : index
    %448 = vector.load %arg6[%c0_282, %c0_283, %c1_284, %c0_285, %c0_286] : memref<1x2x2x1x128xf32, #tpu.memory_space<vmem>>, vector<1x1x1x1x128xf32>
    %449 = vector.shape_cast %448 : vector<1x1x1x1x128xf32> to vector<1x128xf32>
    %450 = vector.broadcast %449 : vector<1x128xf32> to vector<8x128xf32>
    %451 = arith.addf %447, %450 : vector<8x128xf32>
    %452 = vector.extract_strided_slice %451 {offsets = [0, 100], sizes = [8, 1], strides = [1, 1]} : vector<8x128xf32> to vector<8x1xf32>
    %453 = arith.mulf %451, %451 : vector<8x128xf32>
    %cst_287 = arith.constant dense<0.000000e+00> : vector<8xf32>
    %454 = vector.multi_reduction <add>, %453, %cst_287 [1] : vector<8x128xf32> to vector<8xf32>
    %455 = vector.shape_cast %454 : vector<8xf32> to vector<8x1xf32>
    %cst_288 = arith.constant 0.00999999977 : f32
    %456 = vector.broadcast %cst_288 : f32 to vector<8x1xf32>
    %457 = arith.mulf %452, %456 : vector<8x1xf32>
    %458 = arith.mulf %452, %452 : vector<8x1xf32>
    %459 = arith.subf %455, %458 : vector<8x1xf32>
    %cst_289 = arith.constant 0.00999999977 : f32
    %460 = vector.broadcast %cst_289 : f32 to vector<8x1xf32>
    %461 = arith.mulf %459, %460 : vector<8x1xf32>
    %462 = arith.mulf %457, %457 : vector<8x1xf32>
    %463 = arith.subf %461, %462 : vector<8x1xf32>
    %464 = vector.broadcast %457 : vector<8x1xf32> to vector<8x128xf32>
    %465 = arith.subf %451, %464 : vector<8x128xf32>
    %cst_290 = arith.constant 9.99999974E-6 : f32
    %466 = vector.broadcast %cst_290 : f32 to vector<8x1xf32>
    %467 = arith.addf %463, %466 : vector<8x1xf32>
    %468 = math.rsqrt %467 : vector<8x1xf32>
    %469 = vector.broadcast %468 : vector<8x1xf32> to vector<8x128xf32>
    %470 = arith.mulf %465, %469 : vector<8x128xf32>
    %c0_291 = arith.constant 0 : index
    %c0_292 = arith.constant 0 : index
    %c1_293 = arith.constant 1 : index
    %c0_294 = arith.constant 0 : index
    %c0_295 = arith.constant 0 : index
    %471 = vector.load %arg7[%c0_291, %c0_292, %c1_293, %c0_294, %c0_295] : memref<1x2x2x1x128xf32, #tpu.memory_space<vmem>>, vector<1x1x1x1x128xf32>
    %472 = vector.shape_cast %471 : vector<1x1x1x1x128xf32> to vector<1x128xf32>
    %473 = vector.broadcast %472 : vector<1x128xf32> to vector<8x128xf32>
    %474 = arith.mulf %470, %473 : vector<8x128xf32>
    %c0_296 = arith.constant 0 : index
    %c0_297 = arith.constant 0 : index
    %c1_298 = arith.constant 1 : index
    %c0_299 = arith.constant 0 : index
    %c0_300 = arith.constant 0 : index
    %475 = vector.load %arg8[%c0_296, %c0_297, %c1_298, %c0_299, %c0_300] : memref<1x2x2x1x128xf32, #tpu.memory_space<vmem>>, vector<1x1x1x1x128xf32>
    %476 = vector.shape_cast %475 : vector<1x1x1x1x128xf32> to vector<1x128xf32>
    %477 = vector.broadcast %476 : vector<1x128xf32> to vector<8x128xf32>
    %478 = arith.addf %474, %477 : vector<8x128xf32>
    %479 = arith.addf %478, %444 : vector<8x128xf32>
    %cst_301 = arith.constant 5.000000e-01 : f32
    %480 = vector.broadcast %cst_301 : f32 to vector<8x128xf32>
    %481 = arith.mulf %480, %479 : vector<8x128xf32>
    %482 = math.tanh %481 : vector<8x128xf32>
    %cst_302 = arith.constant 5.000000e-01 : f32
    %483 = vector.broadcast %cst_302 : f32 to vector<8x128xf32>
    %484 = arith.mulf %483, %482 : vector<8x128xf32>
    %cst_303 = arith.constant 5.000000e-01 : f32
    %485 = vector.broadcast %cst_303 : f32 to vector<8x128xf32>
    %486 = arith.addf %484, %485 : vector<8x128xf32>
    %c0_304 = arith.constant 0 : index
    %c0_305 = arith.constant 0 : index
    %c0_306 = arith.constant 0 : index
    %c0_307 = arith.constant 0 : index
    %487 = vector.load %arg9[%c0_304, %c0_305, %c0_306, %c0_307] : memref<1x2x128x128xf32, #tpu.memory_space<vmem>>, vector<1x1x128x128xf32>
    %488 = vector.shape_cast %487 : vector<1x1x128x128xf32> to vector<128x128xf32>
    %cst_308 = arith.constant dense<0.000000e+00> : vector<8x128xf32>
    %489 = tpu.matmul %486, %488, %cst_308 {dimension_numbers = #tpu.dot_dimension_numbers<[1], [0], [0], [1], [0, 0, 1, 1], [], []>} : vector<8x128xf32>, vector<128x128xf32>, vector<8x128xf32> -> vector<8x128xf32>
    %490 = vector.extract_strided_slice %489 {offsets = [0, 0], sizes = [8, 1], strides = [1, 1]} : vector<8x128xf32> to vector<8x1xf32>
    %491 = vector.broadcast %404 : vector<1x1xf32> to vector<8x1xf32>
    %492 = arith.addf %491, %490 : vector<8x1xf32>
    %c0_309 = arith.constant 0 : index
    %c0_310 = arith.constant 0 : index
    %493 = vector.load %arg12[%c0_309, %c0_310] : memref<8x128xf32, #tpu.memory_space<vmem>>, vector<8x128xf32>
    %c0_311 = arith.constant 0 : index
    %c1_312 = arith.constant 1 : index
    %c0_313 = arith.constant 0 : index
    %c0_314 = arith.constant 0 : index
    %c0_315 = arith.constant 0 : index
    %494 = vector.load %arg6[%c0_311, %c1_312, %c0_313, %c0_314, %c0_315] : memref<1x2x2x1x128xf32, #tpu.memory_space<vmem>>, vector<1x1x1x1x128xf32>
    %495 = vector.shape_cast %494 : vector<1x1x1x1x128xf32> to vector<1x128xf32>
    %496 = vector.broadcast %495 : vector<1x128xf32> to vector<8x128xf32>
    %497 = arith.addf %493, %496 : vector<8x128xf32>
    %498 = vector.extract_strided_slice %497 {offsets = [0, 100], sizes = [8, 1], strides = [1, 1]} : vector<8x128xf32> to vector<8x1xf32>
    %499 = arith.mulf %497, %497 : vector<8x128xf32>
    %cst_316 = arith.constant dense<0.000000e+00> : vector<8xf32>
    %500 = vector.multi_reduction <add>, %499, %cst_316 [1] : vector<8x128xf32> to vector<8xf32>
    %501 = vector.shape_cast %500 : vector<8xf32> to vector<8x1xf32>
    %cst_317 = arith.constant 0.00999999977 : f32
    %502 = vector.broadcast %cst_317 : f32 to vector<8x1xf32>
    %503 = arith.mulf %498, %502 : vector<8x1xf32>
    %504 = arith.mulf %498, %498 : vector<8x1xf32>
    %505 = arith.subf %501, %504 : vector<8x1xf32>
    %cst_318 = arith.constant 0.00999999977 : f32
    %506 = vector.broadcast %cst_318 : f32 to vector<8x1xf32>
    %507 = arith.mulf %505, %506 : vector<8x1xf32>
    %508 = arith.mulf %503, %503 : vector<8x1xf32>
    %509 = arith.subf %507, %508 : vector<8x1xf32>
    %510 = vector.broadcast %503 : vector<8x1xf32> to vector<8x128xf32>
    %511 = arith.subf %497, %510 : vector<8x128xf32>
    %cst_319 = arith.constant 9.99999974E-6 : f32
    %512 = vector.broadcast %cst_319 : f32 to vector<8x1xf32>
    %513 = arith.addf %509, %512 : vector<8x1xf32>
    %514 = math.rsqrt %513 : vector<8x1xf32>
    %515 = vector.broadcast %514 : vector<8x1xf32> to vector<8x128xf32>
    %516 = arith.mulf %511, %515 : vector<8x128xf32>
    %c0_320 = arith.constant 0 : index
    %c1_321 = arith.constant 1 : index
    %c0_322 = arith.constant 0 : index
    %c0_323 = arith.constant 0 : index
    %c0_324 = arith.constant 0 : index
    %517 = vector.load %arg7[%c0_320, %c1_321, %c0_322, %c0_323, %c0_324] : memref<1x2x2x1x128xf32, #tpu.memory_space<vmem>>, vector<1x1x1x1x128xf32>
    %518 = vector.shape_cast %517 : vector<1x1x1x1x128xf32> to vector<1x128xf32>
    %519 = vector.broadcast %518 : vector<1x128xf32> to vector<8x128xf32>
    %520 = arith.mulf %516, %519 : vector<8x128xf32>
    %c0_325 = arith.constant 0 : index
    %c1_326 = arith.constant 1 : index
    %c0_327 = arith.constant 0 : index
    %c0_328 = arith.constant 0 : index
    %c0_329 = arith.constant 0 : index
    %521 = vector.load %arg8[%c0_325, %c1_326, %c0_327, %c0_328, %c0_329] : memref<1x2x2x1x128xf32, #tpu.memory_space<vmem>>, vector<1x1x1x1x128xf32>
    %522 = vector.shape_cast %521 : vector<1x1x1x1x128xf32> to vector<1x128xf32>
    %523 = vector.broadcast %522 : vector<1x128xf32> to vector<8x128xf32>
    %524 = arith.addf %520, %523 : vector<8x128xf32>
    %525 = arith.addf %524, %394 : vector<8x128xf32>
    %cst_330 = arith.constant 5.000000e-01 : f32
    %526 = vector.broadcast %cst_330 : f32 to vector<8x128xf32>
    %527 = arith.mulf %526, %525 : vector<8x128xf32>
    %528 = math.tanh %527 : vector<8x128xf32>
    %cst_331 = arith.constant 5.000000e-01 : f32
    %529 = vector.broadcast %cst_331 : f32 to vector<8x128xf32>
    %530 = arith.mulf %529, %528 : vector<8x128xf32>
    %cst_332 = arith.constant 5.000000e-01 : f32
    %531 = vector.broadcast %cst_332 : f32 to vector<8x128xf32>
    %532 = arith.addf %530, %531 : vector<8x128xf32>
    %c0_333 = arith.constant 0 : index
    %c1_334 = arith.constant 1 : index
    %c0_335 = arith.constant 0 : index
    %c0_336 = arith.constant 0 : index
    %533 = vector.load %arg5[%c0_333, %c1_334, %c0_335, %c0_336] : memref<1x2x128x128xf32, #tpu.memory_space<vmem>>, vector<1x1x128x128xf32>
    %534 = vector.shape_cast %533 : vector<1x1x128x128xf32> to vector<128x128xf32>
    %cst_337 = arith.constant dense<0.000000e+00> : vector<8x128xf32>
    %535 = tpu.matmul %532, %534, %cst_337 {dimension_numbers = #tpu.dot_dimension_numbers<[1], [0], [0], [1], [0, 0, 1, 1], [], []>} : vector<8x128xf32>, vector<128x128xf32>, vector<8x128xf32> -> vector<8x128xf32>
    %c0_338 = arith.constant 0 : index
    %c1_339 = arith.constant 1 : index
    %c1_340 = arith.constant 1 : index
    %c0_341 = arith.constant 0 : index
    %c0_342 = arith.constant 0 : index
    %536 = vector.load %arg6[%c0_338, %c1_339, %c1_340, %c0_341, %c0_342] : memref<1x2x2x1x128xf32, #tpu.memory_space<vmem>>, vector<1x1x1x1x128xf32>
    %537 = vector.shape_cast %536 : vector<1x1x1x1x128xf32> to vector<1x128xf32>
    %538 = vector.broadcast %537 : vector<1x128xf32> to vector<8x128xf32>
    %539 = arith.addf %535, %538 : vector<8x128xf32>
    %540 = vector.extract_strided_slice %539 {offsets = [0, 100], sizes = [8, 1], strides = [1, 1]} : vector<8x128xf32> to vector<8x1xf32>
    %541 = arith.mulf %539, %539 : vector<8x128xf32>
    %cst_343 = arith.constant dense<0.000000e+00> : vector<8xf32>
    %542 = vector.multi_reduction <add>, %541, %cst_343 [1] : vector<8x128xf32> to vector<8xf32>
    %543 = vector.shape_cast %542 : vector<8xf32> to vector<8x1xf32>
    %cst_344 = arith.constant 0.00999999977 : f32
    %544 = vector.broadcast %cst_344 : f32 to vector<8x1xf32>
    %545 = arith.mulf %540, %544 : vector<8x1xf32>
    %546 = arith.mulf %540, %540 : vector<8x1xf32>
    %547 = arith.subf %543, %546 : vector<8x1xf32>
    %cst_345 = arith.constant 0.00999999977 : f32
    %548 = vector.broadcast %cst_345 : f32 to vector<8x1xf32>
    %549 = arith.mulf %547, %548 : vector<8x1xf32>
    %550 = arith.mulf %545, %545 : vector<8x1xf32>
    %551 = arith.subf %549, %550 : vector<8x1xf32>
    %552 = vector.broadcast %545 : vector<8x1xf32> to vector<8x128xf32>
    %553 = arith.subf %539, %552 : vector<8x128xf32>
    %cst_346 = arith.constant 9.99999974E-6 : f32
    %554 = vector.broadcast %cst_346 : f32 to vector<8x1xf32>
    %555 = arith.addf %551, %554 : vector<8x1xf32>
    %556 = math.rsqrt %555 : vector<8x1xf32>
    %557 = vector.broadcast %556 : vector<8x1xf32> to vector<8x128xf32>
    %558 = arith.mulf %553, %557 : vector<8x128xf32>
    %c0_347 = arith.constant 0 : index
    %c1_348 = arith.constant 1 : index
    %c1_349 = arith.constant 1 : index
    %c0_350 = arith.constant 0 : index
    %c0_351 = arith.constant 0 : index
    %559 = vector.load %arg7[%c0_347, %c1_348, %c1_349, %c0_350, %c0_351] : memref<1x2x2x1x128xf32, #tpu.memory_space<vmem>>, vector<1x1x1x1x128xf32>
    %560 = vector.shape_cast %559 : vector<1x1x1x1x128xf32> to vector<1x128xf32>
    %561 = vector.broadcast %560 : vector<1x128xf32> to vector<8x128xf32>
    %562 = arith.mulf %558, %561 : vector<8x128xf32>
    %c0_352 = arith.constant 0 : index
    %c1_353 = arith.constant 1 : index
    %c1_354 = arith.constant 1 : index
    %c0_355 = arith.constant 0 : index
    %c0_356 = arith.constant 0 : index
    %563 = vector.load %arg8[%c0_352, %c1_353, %c1_354, %c0_355, %c0_356] : memref<1x2x2x1x128xf32, #tpu.memory_space<vmem>>, vector<1x1x1x1x128xf32>
    %564 = vector.shape_cast %563 : vector<1x1x1x1x128xf32> to vector<1x128xf32>
    %565 = vector.broadcast %564 : vector<1x128xf32> to vector<8x128xf32>
    %566 = arith.addf %562, %565 : vector<8x128xf32>
    %567 = arith.addf %566, %532 : vector<8x128xf32>
    %cst_357 = arith.constant 5.000000e-01 : f32
    %568 = vector.broadcast %cst_357 : f32 to vector<8x128xf32>
    %569 = arith.mulf %568, %567 : vector<8x128xf32>
    %570 = math.tanh %569 : vector<8x128xf32>
    %cst_358 = arith.constant 5.000000e-01 : f32
    %571 = vector.broadcast %cst_358 : f32 to vector<8x128xf32>
    %572 = arith.mulf %571, %570 : vector<8x128xf32>
    %cst_359 = arith.constant 5.000000e-01 : f32
    %573 = vector.broadcast %cst_359 : f32 to vector<8x128xf32>
    %574 = arith.addf %572, %573 : vector<8x128xf32>
    %c0_360 = arith.constant 0 : index
    %c1_361 = arith.constant 1 : index
    %c0_362 = arith.constant 0 : index
    %c0_363 = arith.constant 0 : index
    %575 = vector.load %arg9[%c0_360, %c1_361, %c0_362, %c0_363] : memref<1x2x128x128xf32, #tpu.memory_space<vmem>>, vector<1x1x128x128xf32>
    %576 = vector.shape_cast %575 : vector<1x1x128x128xf32> to vector<128x128xf32>
    %cst_364 = arith.constant dense<0.000000e+00> : vector<8x128xf32>
    %577 = tpu.matmul %574, %576, %cst_364 {dimension_numbers = #tpu.dot_dimension_numbers<[1], [0], [0], [1], [0, 0, 1, 1], [], []>} : vector<8x128xf32>, vector<128x128xf32>, vector<8x128xf32> -> vector<8x128xf32>
    %578 = vector.extract_strided_slice %577 {offsets = [0, 0], sizes = [8, 1], strides = [1, 1]} : vector<8x128xf32> to vector<8x1xf32>
    %579 = arith.addf %492, %578 : vector<8x1xf32>
    %cst_365 = arith.constant 5.000000e-02 : f32
    %580 = vector.broadcast %cst_365 : f32 to vector<8x1xf32>
    %581 = arith.mulf %580, %579 : vector<8x1xf32>
    %582 = vector.broadcast %581 : vector<8x1xf32> to vector<8x128xf32>
    %583 = vector.broadcast %4 : vector<1x128xf32> to vector<8x128xf32>
    %584 = arith.mulf %582, %583 : vector<8x128xf32>
    %585 = arith.addf %394, %584 : vector<8x128xf32>
    %586 = vector.broadcast %15 : vector<1x128xf32> to vector<8x128xf32>
    %587 = arith.addf %585, %586 : vector<8x128xf32>
    %cst_366 = arith.constant 2.000000e+00 : f32
    %588 = vector.broadcast %cst_366 : f32 to vector<8x1xf32>
    %589 = arith.mulf %588, %579 : vector<8x1xf32>
    %590 = arith.addf %397, %589 : vector<8x1xf32>
    %c0_367 = arith.constant 0 : index
    %c0_368 = arith.constant 0 : index
    %c0_369 = arith.constant 0 : index
    %591 = vector.load %arg4[%c0_367, %c0_368, %c0_369] : memref<1x128x256xf32, #tpu.memory_space<vmem>>, vector<1x128x256xf32>
    %592 = vector.shape_cast %591 : vector<1x128x256xf32> to vector<128x256xf32>
    %cst_370 = arith.constant dense<0.000000e+00> : vector<8x256xf32>
    %593 = tpu.matmul %587, %592, %cst_370 {dimension_numbers = #tpu.dot_dimension_numbers<[1], [0], [0], [1], [0, 0, 1, 1], [], []>} : vector<8x128xf32>, vector<128x256xf32>, vector<8x256xf32> -> vector<8x256xf32>
    %594 = vector.extract_strided_slice %593 {offsets = [0, 128], sizes = [8, 128], strides = [1, 1]} : vector<8x256xf32> to vector<8x128xf32>
    %c0_371 = arith.constant 0 : index
    %c0_372 = arith.constant 0 : index
    %595 = vector.load %arg12[%c0_371, %c0_372] : memref<8x128xf32, #tpu.memory_space<vmem>>, vector<8x128xf32>
    tpu.vector_store %arg12[%c0_371, %c0_372], %594 {strides = array<i32>} : memref<8x128xf32, #tpu.memory_space<vmem>>, vector<8x128xf32>,
    %c0_373 = arith.constant 0 : index
    %c0_374 = arith.constant 0 : index
    %c0_375 = arith.constant 0 : index
    %596 = vector.load %arg10[%c0_373, %c0_374, %c0_375] : memref<1x1x1xf32, #tpu.memory_space<vmem>>, vector<1x1x1xf32>
    %597 = vector.shape_cast %596 : vector<1x1x1xf32> to vector<1x1xf32>
    %598 = vector.extract_strided_slice %593 {offsets = [0, 0], sizes = [8, 128], strides = [1, 1]} : vector<8x256xf32> to vector<8x128xf32>
    %c0_376 = arith.constant 0 : index
    %c0_377 = arith.constant 0 : index
    %c0_378 = arith.constant 0 : index
    %c0_379 = arith.constant 0 : index
    %c0_380 = arith.constant 0 : index
    %599 = vector.load %arg6[%c0_376, %c0_377, %c0_378, %c0_379, %c0_380] : memref<1x2x2x1x128xf32, #tpu.memory_space<vmem>>, vector<1x1x1x1x128xf32>
    %600 = vector.shape_cast %599 : vector<1x1x1x1x128xf32> to vector<1x128xf32>
    %601 = vector.broadcast %600 : vector<1x128xf32> to vector<8x128xf32>
    %602 = arith.addf %598, %601 : vector<8x128xf32>
    %603 = vector.extract_strided_slice %602 {offsets = [0, 100], sizes = [8, 1], strides = [1, 1]} : vector<8x128xf32> to vector<8x1xf32>
    %604 = arith.mulf %602, %602 : vector<8x128xf32>
    %cst_381 = arith.constant dense<0.000000e+00> : vector<8xf32>
    %605 = vector.multi_reduction <add>, %604, %cst_381 [1] : vector<8x128xf32> to vector<8xf32>
    %606 = vector.shape_cast %605 : vector<8xf32> to vector<8x1xf32>
    %cst_382 = arith.constant 0.00999999977 : f32
    %607 = vector.broadcast %cst_382 : f32 to vector<8x1xf32>
    %608 = arith.mulf %603, %607 : vector<8x1xf32>
    %609 = arith.mulf %603, %603 : vector<8x1xf32>
    %610 = arith.subf %606, %609 : vector<8x1xf32>
    %cst_383 = arith.constant 0.00999999977 : f32
    %611 = vector.broadcast %cst_383 : f32 to vector<8x1xf32>
    %612 = arith.mulf %610, %611 : vector<8x1xf32>
    %613 = arith.mulf %608, %608 : vector<8x1xf32>
    %614 = arith.subf %612, %613 : vector<8x1xf32>
    %615 = vector.broadcast %608 : vector<8x1xf32> to vector<8x128xf32>
    %616 = arith.subf %602, %615 : vector<8x128xf32>
    %cst_384 = arith.constant 9.99999974E-6 : f32
    %617 = vector.broadcast %cst_384 : f32 to vector<8x1xf32>
    %618 = arith.addf %614, %617 : vector<8x1xf32>
    %619 = math.rsqrt %618 : vector<8x1xf32>
    %620 = vector.broadcast %619 : vector<8x1xf32> to vector<8x128xf32>
    %621 = arith.mulf %616, %620 : vector<8x128xf32>
    %c0_385 = arith.constant 0 : index
    %c0_386 = arith.constant 0 : index
    %c0_387 = arith.constant 0 : index
    %c0_388 = arith.constant 0 : index
    %c0_389 = arith.constant 0 : index
    %622 = vector.load %arg7[%c0_385, %c0_386, %c0_387, %c0_388, %c0_389] : memref<1x2x2x1x128xf32, #tpu.memory_space<vmem>>, vector<1x1x1x1x128xf32>
    %623 = vector.shape_cast %622 : vector<1x1x1x1x128xf32> to vector<1x128xf32>
    %624 = vector.broadcast %623 : vector<1x128xf32> to vector<8x128xf32>
    %625 = arith.mulf %621, %624 : vector<8x128xf32>
    %c0_390 = arith.constant 0 : index
    %c0_391 = arith.constant 0 : index
    %c0_392 = arith.constant 0 : index
    %c0_393 = arith.constant 0 : index
    %c0_394 = arith.constant 0 : index
    %626 = vector.load %arg8[%c0_390, %c0_391, %c0_392, %c0_393, %c0_394] : memref<1x2x2x1x128xf32, #tpu.memory_space<vmem>>, vector<1x1x1x1x128xf32>
    %627 = vector.shape_cast %626 : vector<1x1x1x1x128xf32> to vector<1x128xf32>
    %628 = vector.broadcast %627 : vector<1x128xf32> to vector<8x128xf32>
    %629 = arith.addf %625, %628 : vector<8x128xf32>
    %630 = arith.addf %629, %587 : vector<8x128xf32>
    %cst_395 = arith.constant 5.000000e-01 : f32
    %631 = vector.broadcast %cst_395 : f32 to vector<8x128xf32>
    %632 = arith.mulf %631, %630 : vector<8x128xf32>
    %633 = math.tanh %632 : vector<8x128xf32>
    %cst_396 = arith.constant 5.000000e-01 : f32
    %634 = vector.broadcast %cst_396 : f32 to vector<8x128xf32>
    %635 = arith.mulf %634, %633 : vector<8x128xf32>
    %cst_397 = arith.constant 5.000000e-01 : f32
    %636 = vector.broadcast %cst_397 : f32 to vector<8x128xf32>
    %637 = arith.addf %635, %636 : vector<8x128xf32>
    %c0_398 = arith.constant 0 : index
    %c0_399 = arith.constant 0 : index
    %c0_400 = arith.constant 0 : index
    %c0_401 = arith.constant 0 : index
    %638 = vector.load %arg5[%c0_398, %c0_399, %c0_400, %c0_401] : memref<1x2x128x128xf32, #tpu.memory_space<vmem>>, vector<1x1x128x128xf32>
    %639 = vector.shape_cast %638 : vector<1x1x128x128xf32> to vector<128x128xf32>
    %cst_402 = arith.constant dense<0.000000e+00> : vector<8x128xf32>
    %640 = tpu.matmul %637, %639, %cst_402 {dimension_numbers = #tpu.dot_dimension_numbers<[1], [0], [0], [1], [0, 0, 1, 1], [], []>} : vector<8x128xf32>, vector<128x128xf32>, vector<8x128xf32> -> vector<8x128xf32>
    %c0_403 = arith.constant 0 : index
    %c0_404 = arith.constant 0 : index
    %c1_405 = arith.constant 1 : index
    %c0_406 = arith.constant 0 : index
    %c0_407 = arith.constant 0 : index
    %641 = vector.load %arg6[%c0_403, %c0_404, %c1_405, %c0_406, %c0_407] : memref<1x2x2x1x128xf32, #tpu.memory_space<vmem>>, vector<1x1x1x1x128xf32>
    %642 = vector.shape_cast %641 : vector<1x1x1x1x128xf32> to vector<1x128xf32>
    %643 = vector.broadcast %642 : vector<1x128xf32> to vector<8x128xf32>
    %644 = arith.addf %640, %643 : vector<8x128xf32>
    %645 = vector.extract_strided_slice %644 {offsets = [0, 100], sizes = [8, 1], strides = [1, 1]} : vector<8x128xf32> to vector<8x1xf32>
    %646 = arith.mulf %644, %644 : vector<8x128xf32>
    %cst_408 = arith.constant dense<0.000000e+00> : vector<8xf32>
    %647 = vector.multi_reduction <add>, %646, %cst_408 [1] : vector<8x128xf32> to vector<8xf32>
    %648 = vector.shape_cast %647 : vector<8xf32> to vector<8x1xf32>
    %cst_409 = arith.constant 0.00999999977 : f32
    %649 = vector.broadcast %cst_409 : f32 to vector<8x1xf32>
    %650 = arith.mulf %645, %649 : vector<8x1xf32>
    %651 = arith.mulf %645, %645 : vector<8x1xf32>
    %652 = arith.subf %648, %651 : vector<8x1xf32>
    %cst_410 = arith.constant 0.00999999977 : f32
    %653 = vector.broadcast %cst_410 : f32 to vector<8x1xf32>
    %654 = arith.mulf %652, %653 : vector<8x1xf32>
    %655 = arith.mulf %650, %650 : vector<8x1xf32>
    %656 = arith.subf %654, %655 : vector<8x1xf32>
    %657 = vector.broadcast %650 : vector<8x1xf32> to vector<8x128xf32>
    %658 = arith.subf %644, %657 : vector<8x128xf32>
    %cst_411 = arith.constant 9.99999974E-6 : f32
    %659 = vector.broadcast %cst_411 : f32 to vector<8x1xf32>
    %660 = arith.addf %656, %659 : vector<8x1xf32>
    %661 = math.rsqrt %660 : vector<8x1xf32>
    %662 = vector.broadcast %661 : vector<8x1xf32> to vector<8x128xf32>
    %663 = arith.mulf %658, %662 : vector<8x128xf32>
    %c0_412 = arith.constant 0 : index
    %c0_413 = arith.constant 0 : index
    %c1_414 = arith.constant 1 : index
    %c0_415 = arith.constant 0 : index
    %c0_416 = arith.constant 0 : index
    %664 = vector.load %arg7[%c0_412, %c0_413, %c1_414, %c0_415, %c0_416] : memref<1x2x2x1x128xf32, #tpu.memory_space<vmem>>, vector<1x1x1x1x128xf32>
    %665 = vector.shape_cast %664 : vector<1x1x1x1x128xf32> to vector<1x128xf32>
    %666 = vector.broadcast %665 : vector<1x128xf32> to vector<8x128xf32>
    %667 = arith.mulf %663, %666 : vector<8x128xf32>
    %c0_417 = arith.constant 0 : index
    %c0_418 = arith.constant 0 : index
    %c1_419 = arith.constant 1 : index
    %c0_420 = arith.constant 0 : index
    %c0_421 = arith.constant 0 : index
    %668 = vector.load %arg8[%c0_417, %c0_418, %c1_419, %c0_420, %c0_421] : memref<1x2x2x1x128xf32, #tpu.memory_space<vmem>>, vector<1x1x1x1x128xf32>
    %669 = vector.shape_cast %668 : vector<1x1x1x1x128xf32> to vector<1x128xf32>
    %670 = vector.broadcast %669 : vector<1x128xf32> to vector<8x128xf32>
    %671 = arith.addf %667, %670 : vector<8x128xf32>
    %672 = arith.addf %671, %637 : vector<8x128xf32>
    %cst_422 = arith.constant 5.000000e-01 : f32
    %673 = vector.broadcast %cst_422 : f32 to vector<8x128xf32>
    %674 = arith.mulf %673, %672 : vector<8x128xf32>
    %675 = math.tanh %674 : vector<8x128xf32>
    %cst_423 = arith.constant 5.000000e-01 : f32
    %676 = vector.broadcast %cst_423 : f32 to vector<8x128xf32>
    %677 = arith.mulf %676, %675 : vector<8x128xf32>
    %cst_424 = arith.constant 5.000000e-01 : f32
    %678 = vector.broadcast %cst_424 : f32 to vector<8x128xf32>
    %679 = arith.addf %677, %678 : vector<8x128xf32>
    %c0_425 = arith.constant 0 : index
    %c0_426 = arith.constant 0 : index
    %c0_427 = arith.constant 0 : index
    %c0_428 = arith.constant 0 : index
    %680 = vector.load %arg9[%c0_425, %c0_426, %c0_427, %c0_428] : memref<1x2x128x128xf32, #tpu.memory_space<vmem>>, vector<1x1x128x128xf32>
    %681 = vector.shape_cast %680 : vector<1x1x128x128xf32> to vector<128x128xf32>
    %cst_429 = arith.constant dense<0.000000e+00> : vector<8x128xf32>
    %682 = tpu.matmul %679, %681, %cst_429 {dimension_numbers = #tpu.dot_dimension_numbers<[1], [0], [0], [1], [0, 0, 1, 1], [], []>} : vector<8x128xf32>, vector<128x128xf32>, vector<8x128xf32> -> vector<8x128xf32>
    %683 = vector.extract_strided_slice %682 {offsets = [0, 0], sizes = [8, 1], strides = [1, 1]} : vector<8x128xf32> to vector<8x1xf32>
    %684 = vector.broadcast %597 : vector<1x1xf32> to vector<8x1xf32>
    %685 = arith.addf %684, %683 : vector<8x1xf32>
    %c0_430 = arith.constant 0 : index
    %c0_431 = arith.constant 0 : index
    %686 = vector.load %arg12[%c0_430, %c0_431] : memref<8x128xf32, #tpu.memory_space<vmem>>, vector<8x128xf32>
    %c0_432 = arith.constant 0 : index
    %c1_433 = arith.constant 1 : index
    %c0_434 = arith.constant 0 : index
    %c0_435 = arith.constant 0 : index
    %c0_436 = arith.constant 0 : index
    %687 = vector.load %arg6[%c0_432, %c1_433, %c0_434, %c0_435, %c0_436] : memref<1x2x2x1x128xf32, #tpu.memory_space<vmem>>, vector<1x1x1x1x128xf32>
    %688 = vector.shape_cast %687 : vector<1x1x1x1x128xf32> to vector<1x128xf32>
    %689 = vector.broadcast %688 : vector<1x128xf32> to vector<8x128xf32>
    %690 = arith.addf %686, %689 : vector<8x128xf32>
    %691 = vector.extract_strided_slice %690 {offsets = [0, 100], sizes = [8, 1], strides = [1, 1]} : vector<8x128xf32> to vector<8x1xf32>
    %692 = arith.mulf %690, %690 : vector<8x128xf32>
    %cst_437 = arith.constant dense<0.000000e+00> : vector<8xf32>
    %693 = vector.multi_reduction <add>, %692, %cst_437 [1] : vector<8x128xf32> to vector<8xf32>
    %694 = vector.shape_cast %693 : vector<8xf32> to vector<8x1xf32>
    %cst_438 = arith.constant 0.00999999977 : f32
    %695 = vector.broadcast %cst_438 : f32 to vector<8x1xf32>
    %696 = arith.mulf %691, %695 : vector<8x1xf32>
    %697 = arith.mulf %691, %691 : vector<8x1xf32>
    %698 = arith.subf %694, %697 : vector<8x1xf32>
    %cst_439 = arith.constant 0.00999999977 : f32
    %699 = vector.broadcast %cst_439 : f32 to vector<8x1xf32>
    %700 = arith.mulf %698, %699 : vector<8x1xf32>
    %701 = arith.mulf %696, %696 : vector<8x1xf32>
    %702 = arith.subf %700, %701 : vector<8x1xf32>
    %703 = vector.broadcast %696 : vector<8x1xf32> to vector<8x128xf32>
    %704 = arith.subf %690, %703 : vector<8x128xf32>
    %cst_440 = arith.constant 9.99999974E-6 : f32
    %705 = vector.broadcast %cst_440 : f32 to vector<8x1xf32>
    %706 = arith.addf %702, %705 : vector<8x1xf32>
    %707 = math.rsqrt %706 : vector<8x1xf32>
    %708 = vector.broadcast %707 : vector<8x1xf32> to vector<8x128xf32>
    %709 = arith.mulf %704, %708 : vector<8x128xf32>
    %c0_441 = arith.constant 0 : index
    %c1_442 = arith.constant 1 : index
    %c0_443 = arith.constant 0 : index
    %c0_444 = arith.constant 0 : index
    %c0_445 = arith.constant 0 : index
    %710 = vector.load %arg7[%c0_441, %c1_442, %c0_443, %c0_444, %c0_445] : memref<1x2x2x1x128xf32, #tpu.memory_space<vmem>>, vector<1x1x1x1x128xf32>
    %711 = vector.shape_cast %710 : vector<1x1x1x1x128xf32> to vector<1x128xf32>
    %712 = vector.broadcast %711 : vector<1x128xf32> to vector<8x128xf32>
    %713 = arith.mulf %709, %712 : vector<8x128xf32>
    %c0_446 = arith.constant 0 : index
    %c1_447 = arith.constant 1 : index
    %c0_448 = arith.constant 0 : index
    %c0_449 = arith.constant 0 : index
    %c0_450 = arith.constant 0 : index
    %714 = vector.load %arg8[%c0_446, %c1_447, %c0_448, %c0_449, %c0_450] : memref<1x2x2x1x128xf32, #tpu.memory_space<vmem>>, vector<1x1x1x1x128xf32>
    %715 = vector.shape_cast %714 : vector<1x1x1x1x128xf32> to vector<1x128xf32>
    %716 = vector.broadcast %715 : vector<1x128xf32> to vector<8x128xf32>
    %717 = arith.addf %713, %716 : vector<8x128xf32>
    %718 = arith.addf %717, %587 : vector<8x128xf32>
    %cst_451 = arith.constant 5.000000e-01 : f32
    %719 = vector.broadcast %cst_451 : f32 to vector<8x128xf32>
    %720 = arith.mulf %719, %718 : vector<8x128xf32>
    %721 = math.tanh %720 : vector<8x128xf32>
    %cst_452 = arith.constant 5.000000e-01 : f32
    %722 = vector.broadcast %cst_452 : f32 to vector<8x128xf32>
    %723 = arith.mulf %722, %721 : vector<8x128xf32>
    %cst_453 = arith.constant 5.000000e-01 : f32
    %724 = vector.broadcast %cst_453 : f32 to vector<8x128xf32>
    %725 = arith.addf %723, %724 : vector<8x128xf32>
    %c0_454 = arith.constant 0 : index
    %c1_455 = arith.constant 1 : index
    %c0_456 = arith.constant 0 : index
    %c0_457 = arith.constant 0 : index
    %726 = vector.load %arg5[%c0_454, %c1_455, %c0_456, %c0_457] : memref<1x2x128x128xf32, #tpu.memory_space<vmem>>, vector<1x1x128x128xf32>
    %727 = vector.shape_cast %726 : vector<1x1x128x128xf32> to vector<128x128xf32>
    %cst_458 = arith.constant dense<0.000000e+00> : vector<8x128xf32>
    %728 = tpu.matmul %725, %727, %cst_458 {dimension_numbers = #tpu.dot_dimension_numbers<[1], [0], [0], [1], [0, 0, 1, 1], [], []>} : vector<8x128xf32>, vector<128x128xf32>, vector<8x128xf32> -> vector<8x128xf32>
    %c0_459 = arith.constant 0 : index
    %c1_460 = arith.constant 1 : index
    %c1_461 = arith.constant 1 : index
    %c0_462 = arith.constant 0 : index
    %c0_463 = arith.constant 0 : index
    %729 = vector.load %arg6[%c0_459, %c1_460, %c1_461, %c0_462, %c0_463] : memref<1x2x2x1x128xf32, #tpu.memory_space<vmem>>, vector<1x1x1x1x128xf32>
    %730 = vector.shape_cast %729 : vector<1x1x1x1x128xf32> to vector<1x128xf32>
    %731 = vector.broadcast %730 : vector<1x128xf32> to vector<8x128xf32>
    %732 = arith.addf %728, %731 : vector<8x128xf32>
    %733 = vector.extract_strided_slice %732 {offsets = [0, 100], sizes = [8, 1], strides = [1, 1]} : vector<8x128xf32> to vector<8x1xf32>
    %734 = arith.mulf %732, %732 : vector<8x128xf32>
    %cst_464 = arith.constant dense<0.000000e+00> : vector<8xf32>
    %735 = vector.multi_reduction <add>, %734, %cst_464 [1] : vector<8x128xf32> to vector<8xf32>
    %736 = vector.shape_cast %735 : vector<8xf32> to vector<8x1xf32>
    %cst_465 = arith.constant 0.00999999977 : f32
    %737 = vector.broadcast %cst_465 : f32 to vector<8x1xf32>
    %738 = arith.mulf %733, %737 : vector<8x1xf32>
    %739 = arith.mulf %733, %733 : vector<8x1xf32>
    %740 = arith.subf %736, %739 : vector<8x1xf32>
    %cst_466 = arith.constant 0.00999999977 : f32
    %741 = vector.broadcast %cst_466 : f32 to vector<8x1xf32>
    %742 = arith.mulf %740, %741 : vector<8x1xf32>
    %743 = arith.mulf %738, %738 : vector<8x1xf32>
    %744 = arith.subf %742, %743 : vector<8x1xf32>
    %745 = vector.broadcast %738 : vector<8x1xf32> to vector<8x128xf32>
    %746 = arith.subf %732, %745 : vector<8x128xf32>
    %cst_467 = arith.constant 9.99999974E-6 : f32
    %747 = vector.broadcast %cst_467 : f32 to vector<8x1xf32>
    %748 = arith.addf %744, %747 : vector<8x1xf32>
    %749 = math.rsqrt %748 : vector<8x1xf32>
    %750 = vector.broadcast %749 : vector<8x1xf32> to vector<8x128xf32>
    %751 = arith.mulf %746, %750 : vector<8x128xf32>
    %c0_468 = arith.constant 0 : index
    %c1_469 = arith.constant 1 : index
    %c1_470 = arith.constant 1 : index
    %c0_471 = arith.constant 0 : index
    %c0_472 = arith.constant 0 : index
    %752 = vector.load %arg7[%c0_468, %c1_469, %c1_470, %c0_471, %c0_472] : memref<1x2x2x1x128xf32, #tpu.memory_space<vmem>>, vector<1x1x1x1x128xf32>
    %753 = vector.shape_cast %752 : vector<1x1x1x1x128xf32> to vector<1x128xf32>
    %754 = vector.broadcast %753 : vector<1x128xf32> to vector<8x128xf32>
    %755 = arith.mulf %751, %754 : vector<8x128xf32>
    %c0_473 = arith.constant 0 : index
    %c1_474 = arith.constant 1 : index
    %c1_475 = arith.constant 1 : index
    %c0_476 = arith.constant 0 : index
    %c0_477 = arith.constant 0 : index
    %756 = vector.load %arg8[%c0_473, %c1_474, %c1_475, %c0_476, %c0_477] : memref<1x2x2x1x128xf32, #tpu.memory_space<vmem>>, vector<1x1x1x1x128xf32>
    %757 = vector.shape_cast %756 : vector<1x1x1x1x128xf32> to vector<1x128xf32>
    %758 = vector.broadcast %757 : vector<1x128xf32> to vector<8x128xf32>
    %759 = arith.addf %755, %758 : vector<8x128xf32>
    %760 = arith.addf %759, %725 : vector<8x128xf32>
    %cst_478 = arith.constant 5.000000e-01 : f32
    %761 = vector.broadcast %cst_478 : f32 to vector<8x128xf32>
    %762 = arith.mulf %761, %760 : vector<8x128xf32>
    %763 = math.tanh %762 : vector<8x128xf32>
    %cst_479 = arith.constant 5.000000e-01 : f32
    %764 = vector.broadcast %cst_479 : f32 to vector<8x128xf32>
    %765 = arith.mulf %764, %763 : vector<8x128xf32>
    %cst_480 = arith.constant 5.000000e-01 : f32
    %766 = vector.broadcast %cst_480 : f32 to vector<8x128xf32>
    %767 = arith.addf %765, %766 : vector<8x128xf32>
    %c0_481 = arith.constant 0 : index
    %c1_482 = arith.constant 1 : index
    %c0_483 = arith.constant 0 : index
    %c0_484 = arith.constant 0 : index
    %768 = vector.load %arg9[%c0_481, %c1_482, %c0_483, %c0_484] : memref<1x2x128x128xf32, #tpu.memory_space<vmem>>, vector<1x1x128x128xf32>
    %769 = vector.shape_cast %768 : vector<1x1x128x128xf32> to vector<128x128xf32>
    %cst_485 = arith.constant dense<0.000000e+00> : vector<8x128xf32>
    %770 = tpu.matmul %767, %769, %cst_485 {dimension_numbers = #tpu.dot_dimension_numbers<[1], [0], [0], [1], [0, 0, 1, 1], [], []>} : vector<8x128xf32>, vector<128x128xf32>, vector<8x128xf32> -> vector<8x128xf32>
    %771 = vector.extract_strided_slice %770 {offsets = [0, 0], sizes = [8, 1], strides = [1, 1]} : vector<8x128xf32> to vector<8x1xf32>
    %772 = arith.addf %685, %771 : vector<8x1xf32>
    %773 = arith.addf %590, %772 : vector<8x1xf32>
    %774 = tpu.iota {dimensions = array<i32: 1>} : vector<1x8xi32>
    %775 = vector.broadcast %arg0 : i32 to vector<1x8xi32>
    %776 = arith.cmpi eq, %774, %775 : vector<1x8xi32>
    %c0_486 = arith.constant 0 : index
    %c0_487 = arith.constant 0 : index
    %777 = vector.load %arg2[%c0_486, %c0_487] : memref<8x8xf32, #tpu.memory_space<vmem>>, vector<8x8xf32>
    %cst_488 = arith.constant 0.000000e+00 : f32
    %778 = vector.shape_cast %776 : vector<1x8xi1> to vector<1x8xi1>
    %779 = vector.broadcast %778 : vector<1x8xi1> to vector<8x8xi1>
    %780 = vector.broadcast %cst_488 : f32 to vector<8x8xf32>
    %781 = arith.select %779, %777, %780 : vector<8x8xi1>, vector<8x8xf32>
    %cst_489 = arith.constant dense<0.000000e+00> : vector<8xf32>
    %782 = vector.multi_reduction <add>, %781, %cst_489 [1] : vector<8x8xf32> to vector<8xf32>
    %783 = vector.shape_cast %782 : vector<8xf32> to vector<8x1xf32>
    %cst_490 = arith.constant 0.0166666675 : f32
    %784 = vector.broadcast %cst_490 : f32 to vector<8x1xf32>
    %785 = arith.mulf %784, %773 : vector<8x1xf32>
    %786 = arith.addf %783, %785 : vector<8x1xf32>
    %c0_491 = arith.constant 0 : index
    %c0_492 = arith.constant 0 : index
    %c0_493 = arith.constant 0 : index
    %787 = vector.load %arg11[%c0_491, %c0_492, %c0_493] : memref<1x8x1xf32, #tpu.memory_space<vmem>>, vector<1x8x1xf32>
    %788 = vector.shape_cast %787 : vector<1x8x1xf32> to vector<8x1xf32>
    %789 = vector.shape_cast %786 : vector<8x1xf32> to vector<1x8x1xf32>
    tpu.vector_store %arg11[%c0_491, %c0_492, %c0_493], %789 {strides = array<i32>} : memref<1x8x1xf32, #tpu.memory_space<vmem>>, vector<1x8x1xf32>,
    return
  }
  func.func @transform_0(%arg0: i32, %arg1: i32) -> (i32, i32) {
    %c0_i32 = arith.constant 0 : i32
    %c0_i32_0 = arith.constant 0 : i32
    return %arg1, %c0_i32 : i32, i32
  }
  func.func @transform_1(%arg0: i32, %arg1: i32) -> (i32, i32, i32) {
    %c0_i32 = arith.constant 0 : i32
    %c0_i32_0 = arith.constant 0 : i32
    %c0_i32_1 = arith.constant 0 : i32
    return %arg0, %c0_i32, %c0_i32_0 : i32, i32, i32
  }
  func.func @transform_2(%arg0: i32, %arg1: i32) -> (i32, i32, i32) {
    %c0_i32 = arith.constant 0 : i32
    %c0_i32_0 = arith.constant 0 : i32
    %c0_i32_1 = arith.constant 0 : i32
    return %arg0, %c0_i32, %c0_i32_0 : i32, i32, i32
  }
  func.func @transform_3(%arg0: i32, %arg1: i32) -> (i32, i32, i32, i32) {
    %c0_i32 = arith.constant 0 : i32
    %c0_i32_0 = arith.constant 0 : i32
    %c0_i32_1 = arith.constant 0 : i32
    %c0_i32_2 = arith.constant 0 : i32
    return %arg0, %c0_i32, %c0_i32_0, %c0_i32_1 : i32, i32, i32, i32
  }
  func.func @transform_4(%arg0: i32, %arg1: i32) -> (i32, i32, i32, i32, i32) {
    %c0_i32 = arith.constant 0 : i32
    %c0_i32_0 = arith.constant 0 : i32
    %c0_i32_1 = arith.constant 0 : i32
    %c0_i32_2 = arith.constant 0 : i32
    %c0_i32_3 = arith.constant 0 : i32
    return %arg0, %c0_i32, %c0_i32_0, %c0_i32_1, %c0_i32_2 : i32, i32, i32, i32, i32
  }
  func.func @transform_5(%arg0: i32, %arg1: i32) -> (i32, i32, i32, i32, i32) {
    %c0_i32 = arith.constant 0 : i32
    %c0_i32_0 = arith.constant 0 : i32
    %c0_i32_1 = arith.constant 0 : i32
    %c0_i32_2 = arith.constant 0 : i32
    %c0_i32_3 = arith.constant 0 : i32
    return %arg0, %c0_i32, %c0_i32_0, %c0_i32_1, %c0_i32_2 : i32, i32, i32, i32, i32
  }
  func.func @transform_6(%arg0: i32, %arg1: i32) -> (i32, i32, i32, i32, i32) {
    %c0_i32 = arith.constant 0 : i32
    %c0_i32_0 = arith.constant 0 : i32
    %c0_i32_1 = arith.constant 0 : i32
    %c0_i32_2 = arith.constant 0 : i32
    %c0_i32_3 = arith.constant 0 : i32
    return %arg0, %c0_i32, %c0_i32_0, %c0_i32_1, %c0_i32_2 : i32, i32, i32, i32, i32
  }
  func.func @transform_7(%arg0: i32, %arg1: i32) -> (i32, i32, i32, i32) {
    %c0_i32 = arith.constant 0 : i32
    %c0_i32_0 = arith.constant 0 : i32
    %c0_i32_1 = arith.constant 0 : i32
    %c0_i32_2 = arith.constant 0 : i32
    return %arg0, %c0_i32, %c0_i32_0, %c0_i32_1 : i32, i32, i32, i32
  }
  func.func @transform_8(%arg0: i32, %arg1: i32) -> (i32, i32, i32) {
    %c0_i32 = arith.constant 0 : i32
    %c0_i32_0 = arith.constant 0 : i32
    %c0_i32_1 = arith.constant 0 : i32
    return %arg0, %c0_i32, %c0_i32_0 : i32, i32, i32
  }
  func.func @transform_9(%arg0: i32, %arg1: i32) -> (i32, i32, i32) {
    %c0_i32 = arith.constant 0 : i32
    %c0_i32_0 = arith.constant 0 : i32
    return %arg0, %arg1, %c0_i32 : i32, i32, i32
  }
}

</mosaic_0001>

<bundles_post_ra>
// kernel: tpu_custom_call.1
= control target key start
LH: loop header
LB: loop body
LE: loop exit
PB: predicated region body
PF: predicated region fallthrough
CT: control target
= control target key end

     0   :  { %s7074_s0 = inlined_call_operand.hbm [shape: f32[8,8], index: 0, kind: input, shape index: {}]   ;;  %s7075_s1 = inlined_call_operand.hbm [shape: f32[3,8,128], index: 1, kind: input, shape index: {}]   ;;  %s7076_s2 = inlined_call_operand.hbm [shape: f32[3,128,256], index: 2, kind: input, shape index: {}]   ;;  %s7077_s3 = inlined_call_operand.hbm [shape: f32[3,2,128,128], index: 3, kind: input, shape index: {}]   ;;  %s7078_s4 = inlined_call_operand.vmem [shape: f32[3,2,2,1,128], index: 4, kind: input, shape index: {}]   ;;  %s7079_s5 = inlined_call_operand.hbm [shape: f32[3,2,2,1,128], index: 5, kind: input, shape index: {}]   ;;  %s7080_s6 = inlined_call_operand.vmem [shape: f32[3,2,2,1,128], index: 6, kind: input, shape index: {}]   ;;  %s7081_s7 = inlined_call_operand.hbm [shape: f32[3,2,128,128], index: 7, kind: input, shape index: {}]   ;;  %s7082_s8 = inlined_call_operand.vmem [shape: f32[3,1,1], index: 8, kind: input, shape index: {}]   ;;  %s7083_s9 = inlined_call_operand.vmem [shape: f32[3,8,1], index: 9, kind: output, shape index: {}]  }
   0x1   :  { %7098 = sst [smem:[#allocation20_spill]] %s7075_s1 }
   0x2   :  { %7099 = sst [smem:[#allocation21_spill]] %s7077_s3 }
   0x3   :  { %7100 = sst [smem:[#allocation22_spill]] %s7080_s6 }
   0x4   :  { %7101 = sst [smem:[#allocation23_spill]] %s7082_s8 }
   0x5   :  { %7102 = sst [smem:[#allocation24_spill]] %s7083_s9 }
   0x6   :  { %14 = vsyncpa [#allocation4], 0 }
   0x7   :  { %15 = vsyncpa [#allocation6], 0 }
   0x8   :  { %17 = vsyncpa [#allocation6 + $0x1], 0 }
   0x9   :  { %18 = vsyncpa [#allocation9], 0 }
   0xa   :  { %20 = vsyncpa [#allocation9 + $0x1], 0 }
   0xb   :  { %21 = vsyncpa [#allocation12], 0 }
   0xc   :  { %23 = vsyncpa [#allocation12 + $0x1], 0  ;;  %s5690_s30 = smov 0   ;;  %s5692_s10 = smov 0  }
   0xd   :  { %s5694_s11 = smov 0   ;;  %s5696_s12 = smov 0  }
   0xe   :  { %s5698_s13 = smov 0   ;;  %s5700_s14 = smov 0  }
   0xf LB: > { %7103 = sst [smem:[#allocation17_spill]] %s5610_s11  ;;  %s41_s15 = sadd.s32 1, %s5618_s13  ;;  %s5622_s14 = sphi %s5700_s14, %s29_s14   ;;  %s5618_s13 = sphi %s5698_s13, %s7133_s13   ;;  %s5614_s12 = sphi %s5696_s12, %s7132_s12   ;;  %s5610_s11 = sphi %s5694_s11, %s7128_s11   ;;  %s5606_s10 = sphi %s5692_s10, %s7131_s10   ;;  %s5602_s30 = sphi %s5690_s30, %s7130_s30  }
  0x10   : > { %s74_s16 = sadd.s32 1, %s5610_s11  ;;  %p43_p0 = scmp.ge.s32.totalorder %s41_s15, 3 }
  0x11   : > { %p81_p1 = scmp.ne.s32.totalorder %s5610_s11, %s5606_s10  ;;  %p82_p2 = scmp.eq.s32.totalorder %s5622_s14, 0 }
  0x12   : > { %s7135_s15 = smov (%p43_p0, %s41_s15), 0  ;;  %p5248_p4 = scmp.lt.s32.totalorder %s5622_s14, 3 }
  0x13   : > { %7104 = sst [smem:[#allocation18_spill]] %s7135_s15  ;;  %p83_p3 = por %p82_p2, %p81_p1 }
  0x14   : > { %s71_s17 = ssub.s32 %s5618_s13, %s7135_s15  ;;  %s7084_s18 = sand.u32 1, %s5622_s14  }
  0x15   : > { %p72_p5 = scmp.eq.s32.totalorder %s71_s17, 0  ;;  %s5732_s19 = sand.u32 1, %s5610_s11  }
  0x16   : > { %s3607_s20 = sshll.u32 %s5618_s13, 7  ;;  %s3606_s22 = sshll.u32 %s5732_s19, 3 }
  0x17   : > { %s5736_s21 = scalar_select %p72_p5, %s5610_s11, %s74_s16  }
  0x18   : > { %s7106_s1 = sld [smem:[#allocation20_spill]]  ;;  %p5744_p6 = pnand %p5248_p4, %p83_p3 }
  0x19   : > { %7105 = sst [smem:[#allocation19_spill]] %s5736_s21  ;;  %s338_s27 = scalar_lea.vmem [#allocation5], %s3606_s22 }
  0x1a   : > { %s7107_s26 = scalar_select %p5744_p6, 1, 0 }
  0x1b   : > { %s345_s28 = sshll.u32 %s338_s27, 4  ;;  %s5752_s29 = scalar_lea.sflag [#allocation6], %s7084_s18  ;;  %s5748_s28 = int_to_ptr.vmem [resolvable:$true] %s345_s28 }
  0x1c   : > { %p5758_p8 = pneg %p5744_p6 }
  0x1e   : > { %s5742_s25 = scalar_lea.hbm %s7106_s1, %s3607_s20  ;;  %s5387_s22 = scalar_lea.hbm %s7106_s1, 384 }
  0x1f   : > { %s5382_s16 = scalar_lea.hbm %s5742_s25, 128  ;;  %p5388_p11 = scmp.lt.u32.totalorder %s5742_s25, %s7106_s1 }
  0x20   : > { %p5383_p7 = scmp.ne.s32.totalorder %s5742_s25, %s5382_s16  ;;  %p5389_p12 = scmp.lt.u32.totalorder %s5387_s22, %s5382_s16 }
  0x21   : > { %s7108_s17 = scalar_select %p5758_p8, 1, 0 }
  0x22   : > { %p5385_p9 = pnand %p5758_p8, %p5383_p7  ;;  %p5390_p13 = por %p5389_p12, %p5388_p11 }
  0x23   : > { %p5391_p0 = scmp.lt.u32.totalorder %s5382_s16, %s5742_s25 }
  0x24   : > { %p5386_p10 = pneg %p5385_p9 }
  0x25   : > { %p5392_p1 = por %p5391_p0, %p5390_p13 }
  0x27   : > { %p5393_p2 = pnand %p5392_p1, %p5386_p10 }
  0x29   : > { %5396 = shalt.err (!%p5393_p2)
}
  0x2a   : > { %s5397_s18 = scalar_lea.vmem %s5748_s28, 128  ;;  %s5624_s20 = smov [#allocation5]  }
  0x2b   : > { %p5398_p3 = scmp.ne.s32.totalorder %s5748_s28, %s5397_s18  ;;  %s5402_s23 = sshll.u32 %s5624_s20, 4  ;;  %s5403_s23 = int_to_ptr.vmem [resolvable:$false] %s5402_s23 }
  0x2c   : > { %s5404_s24 = scalar_lea.vmem %s5403_s23, 256  ;;  %p5405_p7 = scmp.lt.s32.totalorder %s5748_s28, %s5403_s23 }
  0x2d   : > { %p5400_p4 = pnand %p5398_p3, %p5758_p8  ;;  %p5406_p9 = scmp.lt.s32.totalorder %s5404_s24, %s5397_s18 }
  0x2f   : > { %p5401_p5 = pneg %p5400_p4  ;;  %p5407_p11 = por %p5406_p9, %p5405_p7 }
  0x31   : > { %p5408_p12 = pnand %p5407_p11, %p5401_p5 }
  0x33   : > { %5411 = shalt.err (!%p5408_p12)
}
  0x34   : > { %5234 = dma.hbm_to_vmem [thread:$0]  (!%p5744_p6), %s5742_s25, 128, %s5748_s28, %s5752_s29  }
  0x35   : > { %s5784_s22 = sshll.u32 %s5732_s19, 8  ;;  %s5787_s27 = sshll.u32 %s5618_s13, 12 }
  0x36   : > { %s7109_s3 = sld [smem:[#allocation21_spill]]  ;;  %s377_s24 = scalar_lea.vmem [#allocation8], %s5784_s22 }
  0x37   : > { %s384_s1 = sshll.u32 %s377_s24, 4  ;;  %s7110_s25 = sand.u32 1, %s5622_s14   ;;  %s5796_s1 = int_to_ptr.vmem [resolvable:$true] %s384_s1 }
  0x38   : > { %s5800_s28 = scalar_lea.sflag [#allocation9], %s7110_s25 }
  0x3c   : > { %s5793_s23 = scalar_lea.hbm %s7109_s3, %s5787_s27  ;;  %s5417_s20 = scalar_lea.hbm %s7109_s3, 12288 }
  0x3d   : > { %s5412_s16 = scalar_lea.hbm %s5793_s23, 4096  ;;  %p5418_p1 = scmp.lt.u32.totalorder %s5793_s23, %s7109_s3 }
  0x3e   : > { %p5413_p10 = scmp.ne.s32.totalorder %s5793_s23, %s5412_s16  ;;  %p5419_p2 = scmp.lt.u32.totalorder %s5417_s20, %s5412_s16 }
  0x3f   : > { %p5421_p4 = scmp.lt.u32.totalorder %s5412_s16, %s5793_s23 }
  0x40   : > { %p5415_p13 = pnand %p5413_p10, %p5758_p8  ;;  %p5420_p3 = por %p5419_p2, %p5418_p1 }
  0x42   : > { %p5416_p0 = pneg %p5415_p13  ;;  %p5422_p5 = por %p5421_p4, %p5420_p3 }
  0x44   : > { %p5423_p7 = pnand %p5422_p5, %p5416_p0 }
  0x46   : > { %5426 = shalt.err (!%p5423_p7)
}
  0x47   : > { %s5427_s24 = scalar_lea.vmem %s5796_s1, 4096  ;;  %s5625_s15 = smov [#allocation8]  }
  0x48   : > { %p5428_p9 = scmp.ne.s32.totalorder %s5796_s1, %s5427_s24  ;;  %s5432_s25 = sshll.u32 %s5625_s15, 4  ;;  %s5433_s25 = int_to_ptr.vmem [resolvable:$false] %s5432_s25 }
  0x49   : > { %s5434_s11 = scalar_lea.vmem %s5433_s25, 8192  ;;  %p5435_p10 = scmp.lt.s32.totalorder %s5796_s1, %s5433_s25 }
  0x4a   : > { %p5430_p11 = pnand %p5428_p9, %p5758_p8  ;;  %p5436_p13 = scmp.lt.s32.totalorder %s5434_s11, %s5427_s24 }
  0x4c   : > { %p5431_p12 = pneg %p5430_p11  ;;  %p5437_p1 = por %p5436_p13, %p5435_p10 }
  0x4e   : > { %p5438_p2 = pnand %p5437_p1, %p5431_p12 }
  0x50   : > { %5441 = shalt.err (!%p5438_p2)
}
  0x51   : > { %s7088_s21 = smov 128   ;;  %s7089_s16 = smov 8  }
  0x52   : > { %5240 = dma.hbm_to_vmem [thread:$0]  (!%p5744_p6), %s5793_s23, 4096, %s5796_s1, %s5800_s28, %s7088_s21, %s7088_s21, %s7089_s16  }
  0x53   : > { %s7087_s18 = sadd.s32 4294967295, %s5622_s14   ;;  %p87_p0 = scmp.ne.s32.totalorder %s5606_s10, %s5602_s30 }
  0x54   : > { %p5832_p3 = scmp.eq.s32.totalorder %s7087_s18, 0  ;;  %p3603_p4 = scmp.ge.s32.totalorder %s5622_s14, 1 }
  0x55   : > { %p308_p5 = scmp.lt.s32.totalorder %s5622_s14, 4  ;;  %s5628_s1 = smov [#allocation3]  }
  0x56   : > { %s7111_s20 = scalar_select %p5832_p3, 1, 0 }
  0x57   : > { %p5840_p7 = por %p5832_p3, %p87_p0  ;;  %p5844_p9 = pnand %p3603_p4, %p308_p5 }
  0x58   : > { %s323_s30 = sshll.u32 %s5628_s1, 4  ;;  %s5854_s11 = scalar_lea.hbm %s7076_s2, %s5787_s27  ;;  %s324_s30 = int_to_ptr.vmem [resolvable:$true] %s323_s30 }
  0x59   : > { %s7112_s24 = scalar_select %p5840_p7, 1, 0 }
  0x5a   : > { %s7113_s15 = scalar_select %p5844_p9, 1, 0 }
  0x5b   : > { %p5227_p11 = pneg %p5844_p9  ;;  %s356_s18 = scalar_lea.vmem [#allocation7], %s5784_s22 }
  0x5c   : > { %s363_s21 = sshll.u32 %s356_s18, 4  ;;  %s5442_s9 = scalar_lea.hbm %s7074_s0, 128  ;;  %s5863_s21 = int_to_ptr.vmem [resolvable:$true] %s363_s21 }
  0x5d   : > { %p5859_p12 = pnand %p5227_p11, %p5832_p3  ;;  %p5443_p10 = scmp.ne.s32.totalorder %s7074_s0, %s5442_s9 }
  0x5e   : > { %p5449_p0 = scmp.lt.u32.totalorder %s5442_s9, %s7074_s0 }
  0x5f   : > { %p5444_p13 = pneg %p5859_p12 }
  0x61   : > { %p5445_p1 = pnand %p5444_p13, %p5443_p10 }
  0x63   : > { %p5446_p2 = pneg %p5445_p1 }
  0x65   : > { %p5451_p4 = pnand %p5449_p0, %p5446_p2 }
  0x67   : > { %5454 = shalt.err (!%p5451_p4)
}
  0x68   : > { %s5455_s25 = scalar_lea.vmem %s324_s30, 128  ;;  %p5463_p3 = scmp.lt.s32.totalorder %s324_s30, %s324_s30 }
  0x69   : > { %p5456_p5 = scmp.ne.s32.totalorder %s324_s30, %s5455_s25  ;;  %p5464_p9 = scmp.lt.s32.totalorder %s5455_s25, %s5455_s25 }
  0x6b   : > { %p5458_p11 = pnand %p5456_p5, %p5444_p13  ;;  %p5465_p6 = por %p5464_p9, %p5463_p3 }
  0x6d   : > { %p5459_p7 = pneg %p5458_p11 }
  0x6f   : > { %p5466_p8 = pnand %p5465_p6, %p5459_p7 }
  0x71   : > { %5469 = shalt.err (!%p5466_p8)
}
  0x72   : > { %5230 = dma.hbm_to_vmem [thread:$0]  (!%p5859_p12), %s7074_s0, 128, %s324_s30, [#allocation4]  }
  0x73   : > { %s5470_s8 = scalar_lea.hbm %s5854_s11, 4096  ;;  %p7115_p13 = scmp.ne.s32.totalorder %s7108_s17, 0 }
  0x74   : > { %p5471_p10 = scmp.ne.s32.totalorder %s5854_s11, %s5470_s8  ;;  %s5475_s18 = scalar_lea.hbm %s7076_s2, 12288 }
  0x75   : > { %p5476_p6 = scmp.lt.u32.totalorder %s5854_s11, %s7076_s2  ;;  %p5477_p8 = scmp.lt.u32.totalorder %s5475_s18, %s5470_s8 }
  0x76   : > { %p5473_p1 = pnand %p5471_p10, %p7115_p13  ;;  %p5479_p7 = scmp.lt.u32.totalorder %s5470_s8, %s5854_s11 }
  0x77   : > { %p5478_p3 = por %p5477_p8, %p5476_p6 }
  0x78   : > { %p5474_p2 = pneg %p5473_p1 }
  0x79   : > { %p5480_p9 = por %p5479_p7, %p5478_p3 }
  0x7b   : > { %p5481_p0 = pnand %p5480_p9, %p5474_p2 }
  0x7d   : > { %5484 = shalt.err (!%p5481_p0)
}
  0x7e   : > { %s5485_s30 = scalar_lea.vmem %s5863_s21, 4096  ;;  %s5629_s25 = smov [#allocation7]  }
  0x7f   : > { %p5486_p12 = scmp.ne.s32.totalorder %s5863_s21, %s5485_s30  ;;  %s5490_s3 = sshll.u32 %s5629_s25, 4  ;;  %s5491_s3 = int_to_ptr.vmem [resolvable:$false] %s5490_s3 }
  0x80   : > { %s5492_s6 = scalar_lea.vmem %s5491_s3, 8192  ;;  %p5493_p11 = scmp.lt.s32.totalorder %s5863_s21, %s5491_s3 }
  0x81   : > { %p5488_p4 = pnand %p5486_p12, %p7115_p13  ;;  %p5494_p10 = scmp.lt.s32.totalorder %s5492_s6, %s5485_s30 }
  0x83   : > { %p5489_p5 = pneg %p5488_p4  ;;  %p5495_p1 = por %p5494_p10, %p5493_p11 }
  0x85   : > { %p5496_p6 = pnand %p5495_p1, %p5489_p5 }
  0x87   : > { %5499 = shalt.err (!%p5496_p6)
}
  0x88   : > { %s5630_s8 = smov 256   ;;  %s5631_s9 = smov 16  }
  0x89   : > { %p7116_p2 = scmp.ne.s32.totalorder %s7107_s26, 0  ;;  %s3851_s1 = sshll.u32 %s5618_s13, 6 }
  0x8a   : > { %s7117_s18 = sshll.u32 %s5732_s19, 2  ;;  %s5910_s3 = scalar_lea.hbm %s7079_s5, %s3851_s1 }
  0x8b   : > { %5237 = dma.hbm_to_vmem [thread:$0]  (!%p7116_p2), %s5854_s11, 4096, %s5863_s21, %s5752_s29, %s5630_s8, %s5630_s8, %s5631_s9  }
  0x8c   : > { %s405_s23 = scalar_lea.vmem [#allocation10], %s7117_s18  ;;  %s5500_s6 = scalar_lea.hbm %s5910_s3, 64 }
  0x8d   : > { %s412_s16 = sshll.u32 %s405_s23, 4  ;;  %p5501_p8 = scmp.ne.s32.totalorder %s5910_s3, %s5500_s6  ;;  %s5912_s16 = int_to_ptr.vmem [resolvable:$true] %s412_s16 }
  0x8e   : > { %s5505_s11 = scalar_lea.hbm %s7079_s5, 192  ;;  %p5506_p9 = scmp.lt.u32.totalorder %s5910_s3, %s7079_s5 }
  0x8f   : > { %p5503_p3 = pnand %p5501_p8, %p7115_p13  ;;  %p5507_p0 = scmp.lt.u32.totalorder %s5505_s11, %s5500_s6 }
  0x90   : > { %p5509_p4 = scmp.lt.u32.totalorder %s5500_s6, %s5910_s3 }
  0x91   : > { %p5504_p7 = pneg %p5503_p3  ;;  %p5508_p12 = por %p5507_p0, %p5506_p9 }
  0x93   : > { %p5510_p5 = por %p5509_p4, %p5508_p12 }
  0x95   : > { %p5511_p11 = pnand %p5510_p5, %p5504_p7 }
  0x97   : > { %5514 = shalt.err (!%p5511_p11)
}
  0x98   : > { %s5515_s1 = scalar_lea.vmem %s5912_s16, 64  ;;  %s5632_s23 = smov [#allocation10]  }
  0x99   : > { %p5516_p10 = scmp.ne.s32.totalorder %s5912_s16, %s5515_s1  ;;  %s5520_s30 = sshll.u32 %s5632_s23, 4  ;;  %s5521_s30 = int_to_ptr.vmem [resolvable:$false] %s5520_s30 }
  0x9a   : > { %s5522_s25 = scalar_lea.vmem %s5521_s30, 128  ;;  %p5523_p8 = scmp.lt.s32.totalorder %s5912_s16, %s5521_s30 }
  0x9b   : > { %p5518_p1 = pnand %p5516_p10, %p7115_p13  ;;  %p5524_p3 = scmp.lt.s32.totalorder %s5522_s25, %s5515_s1 }
  0x9d   : > { %p5519_p6 = pneg %p5518_p1  ;;  %p5525_p9 = por %p5524_p3, %p5523_p8 }
  0x9f   : > { %p5526_p0 = pnand %p5525_p9, %p5519_p6 }
  0xa1   : > { %5529 = shalt.err (!%p5526_p0)
}
  0xa2   : > { %s5633_s6 = smov 1   ;;  %s5942_s11 = scalar_lea.hbm %s7081_s7, %s5787_s27 }
  0xa3   : > { %5243 = dma.hbm_to_vmem [thread:$0]  (!%p7116_p2), %s5910_s3, 64, %s5912_s16, %s5800_s28, %s5631_s9, %s5631_s9, %s5633_s6  }
  0xa4   : > { %s433_s8 = scalar_lea.vmem [#allocation11], %s5784_s22  ;;  %s430_s1 = scalar_lea.sflag [#allocation12], %s5732_s19 }
  0xa5   : > { %s440_s18 = sshll.u32 %s433_s8, 4  ;;  %s5530_s23 = scalar_lea.hbm %s5942_s11, 4096  ;;  %s5945_s18 = int_to_ptr.vmem [resolvable:$true] %s440_s18 }
  0xa6   : > { %p5531_p7 = scmp.ne.s32.totalorder %s5942_s11, %s5530_s23  ;;  %s5535_s16 = scalar_lea.hbm %s7081_s7, 12288 }
  0xa7   : > { %p5536_p5 = scmp.lt.u32.totalorder %s5942_s11, %s7081_s7  ;;  %p5537_p11 = scmp.lt.u32.totalorder %s5535_s16, %s5530_s23 }
  0xa8   : > { %p5533_p12 = pnand %p5531_p7, %p7115_p13  ;;  %p5539_p1 = scmp.lt.u32.totalorder %s5530_s23, %s5942_s11 }
  0xa9   : > { %p5538_p10 = por %p5537_p11, %p5536_p5 }
  0xaa   : > { %p5534_p4 = pneg %p5533_p12 }
  0xab   : > { %p5540_p6 = por %p5539_p1, %p5538_p10 }
  0xad   : > { %p5541_p8 = pnand %p5540_p6, %p5534_p4 }
  0xaf   : > { %5544 = shalt.err (!%p5541_p8)
}
  0xb0   : > { %s5545_s22 = scalar_lea.vmem %s5945_s18, 4096  ;;  %s5634_s30 = smov [#allocation11]  }
  0xb1   : > { %p5546_p3 = scmp.ne.s32.totalorder %s5945_s18, %s5545_s22  ;;  %s5550_s25 = sshll.u32 %s5634_s30, 4  ;;  %s5551_s25 = int_to_ptr.vmem [resolvable:$false] %s5550_s25 }
  0xb2   : > { %s5552_s6 = scalar_lea.vmem %s5551_s25, 8192  ;;  %p5553_p7 = scmp.lt.s32.totalorder %s5945_s18, %s5551_s25 }
  0xb3   : > { %p5548_p9 = pnand %p5546_p3, %p7115_p13  ;;  %p5554_p12 = scmp.lt.s32.totalorder %s5552_s6, %s5545_s22 }
  0xb5   : > { %p5549_p0 = pneg %p5548_p9  ;;  %p5555_p5 = por %p5554_p12, %p5553_p7 }
  0xb7   : > { %p5556_p11 = pnand %p5555_p5, %p5549_p0 }
  0xb9   : > { %5559 = shalt.err (!%p5556_p11)
}
  0xba   : > { %s7118_s29 = smov 8   ;;  %s7119_s21 = smov 128  }
  0xbb   : > { %5246 = dma.hbm_to_vmem [thread:$0]  (!%p7116_p2), %s5942_s11, 4096, %s5945_s18, %s430_s1, %s7119_s21, %s7119_s21, %s7118_s29  }
  0xbc   : > { %p7120_p13 = scmp.ne.s32.totalorder %s7113_s15, 0 }
  0xbd   : > { %p7121_p4 = scmp.ne.s32.totalorder (!%p7120_p13), %s7111_s20, 0 }
  0xbe   : > { %458 = sbr.rel (%p7120_p13) target bundleno = 6062 (0x17ae), region = 56 }
  0xc5   : > { %5585 = dma.done.wait (%p7121_p4), [#allocation4], 128  }
  0xc6   : > { %5587 = vsyncadd (%p7121_p4), [#allocation4], 4294967168  ;;  %s7122_s17 = sadd.s32 4294967295, %s5622_s14   ;;  %s466_s8 = sand.u32 1, %s5606_s10  }
  0xc7   : > { %s464_s26 = sand.u32 1, %s7122_s17   ;;  %s3622_s23 = sshll.u32 %s466_s8, 3 }
  0xc8   : > { %s465_s19 = scalar_lea.sflag [#allocation6], %s464_s26  ;;  %s5983_s28 = scalar_lea.vmem [#allocation5], %s3622_s23 }
  0xc9   : > { %p7123_p2 = scmp.ne.s32.totalorder %s7112_s24, 0 }
  0xcb   : > { %5589 = dma.done.wait (%p7123_p2), %s465_s19, 4224  }
  0xcc   : > { %5591 = vsyncadd (%p7123_p2), %s465_s19, 4294963072  ;;  %s3623_s15 = sshll.u32 %s466_s8, 8  ;;  %s483_s20 = scalar_lea.sflag [#allocation9], %s464_s26 }
  0xcd   : > { %s5989_s11 = scalar_lea.vmem [#allocation7], %s3623_s15  ;;  %s5991_s18 = scalar_lea.vmem [#allocation8], %s3623_s15 }
  0xce   : > { %5593 = dma.done.wait (%p7123_p2), %s483_s20, 4160  }
  0xcf   : > { %5595 = vsyncadd (%p7123_p2), %s483_s20, 4294963136  ;;  %s3625_s1 = sshll.u32 %s466_s8, 2  ;;  %s501_s16 = scalar_lea.sflag [#allocation12], %s466_s8 }
  0xd0   : > { %s5997_s9 = scalar_lea.vmem [#allocation10], %s3625_s1  ;;  %s5999_s27 = scalar_lea.vmem [#allocation11], %s3623_s15 }
  0xd1   : > { %5597 = dma.done.wait (%p7123_p2), %s501_s16, 4096  }
  0xd2   : > { %5599 = vsyncadd (%p7123_p2), %s501_s16, 4294963200  ;;  %v5635_v0 = vmov 0.0   ;;  %vm5636_vm0 = vmmov 0   ;;  %vm592_vm1 = vcmask 64512   ;;  %v6010_v1 = vld [vmem:[%s5983_s28] sm:$0xff]  ;;  %v591_v2 = vld [vmem:[#allocation3] sm:$0xff] }
  0xd3   : > { %4127 = vmatprep.subr.mxu0 %v5635_v0  ;;  %4129 = vmatprep.mubr.msk.f32.mxu0 %vm5636_vm0, %v5635_v0  ;;  %v672_v3 = vld [vmem:[%s5989_s11 + $0x8] sm:$0xff]  ;;  %v674_v4 = vld [vmem:[%s5989_s11 + $0x18] sm:$0xff]  ;;  %v671_v5 = vld [vmem:[%s5989_s11] sm:$0xff]  ;;  %v5637_v53 = vmov 100   ;;  %p572_p10 = scmp.lt.s32.totalorder %s5614_s12, 2  ;;  %s7124_s21 = sld [smem:[#allocation22_spill]] }
  0xd4   : > { %767 = vmatprep.mubr.f32.mxu1 %v5635_v0  ;;  %4128 = vmatpush3.msra.mxu0 %v6010_v1  ;;  %v673_v6 = vld [vmem:[%s5989_s11 + $0x10] sm:$0xff]  ;;  %v6018_v7 = vpack.c.bf16 %v674_v4, %v672_v3  ;;  %v676_v9 = vld [vmem:[%s5989_s11 + $0x28] sm:$0xff]  ;;  %v678_v10 = vld [vmem:[%s5989_s11 + $0x38] sm:$0xff]  ;;  %s7125_s23 = sld [smem:[#allocation23_spill]]  ;;  %vm3383_vm3 = vcmask 7168  }
  0xd5   : > { %4130 = vmatmul.mubr.msk.f32.vlgmr.msra.gmra.mrb[0].mxu0 %vm592_vm1, %v591_v2  ;;  %v6020_v8 = vpack.c.bf16 %v673_v6, %v671_v5  ;;  %v675_v11 = vld [vmem:[%s5989_s11 + $0x20] sm:$0xff]  ;;  %v6025_v12 = vpack.c.bf16 %v678_v10, %v676_v9  ;;  %v677_v13 = vld [vmem:[%s5989_s11 + $0x30] sm:$0xff]  ;;  %v680_v14 = vld [vmem:[%s5989_s11 + $0x48] sm:$0xff]  ;;  %5309 = vset.pattern.permute.xlu1 %v5637_v53  ;;  %s6105_s24 = scalar_select %p572_p10, %s5614_s12, 2  ;;  %v5638_v5 = vmov 0.0|0.0  }
  0xd6   : > { %v682_v15 = vld [vmem:[%s5989_s11 + $0x58] sm:$0xff]  ;;  %4164 = vmatprep.mubr.msk.f32.mxu0 %vm5636_vm0, %v5635_v0  ;;  %4693 = vmatprep.subr.bf16.mxu1 %v6018_v7  ;;  %v6034_v16 = vpack.c.bf16 %v677_v13, %v675_v11  ;;  %v679_v18 = vld [vmem:[%s5989_s11 + $0x40] sm:$0xff]  ;;  %v681_v19 = vld [vmem:[%s5989_s11 + $0x50] sm:$0xff] }
  0xd7   : > { %4695 = vmatpush1.bf16.msra.mxu1 %v6020_v8  ;;  %v6037_v17 = vpack.c.bf16 %v682_v15, %v680_v14  ;;  %v684_v20 = vld [vmem:[%s5989_s11 + $0x68] sm:$0xff]  ;;  %v686_v21 = vld [vmem:[%s5989_s11 + $0x78] sm:$0xff]  ;;  %v6044_v22 = vpack.c.bf16 %v681_v19, %v679_v18  ;;  %v683_v24 = vld [vmem:[%s5989_s11 + $0x60] sm:$0xff]  ;;  %5310 = vset.pattern.permute.xlu0 %v5637_v53  ;;  %s3627_s3 = sshll.u32 %s6105_s24, 2 }
  0xd8   : > { %4697 = vmatprep.subr.bf16.mxu1 %v6025_v12  ;;  %v6047_v23 = vpack.c.bf16 %v686_v21, %v684_v20  ;;  %v685_v25 = vld [vmem:[%s5989_s11 + $0x70] sm:$0xff]  ;;  %v688_v26 = vld [vmem:[%s5989_s11 + $0x88] sm:$0xff]  ;;  %v690_v27 = vld [vmem:[%s5989_s11 + $0x98] sm:$0xff]  ;;  %s6113_s25 = scalar_lea.vmem %s7078_s4, %s3627_s3  ;;  %4724 = vmatprep.subr.bf16.mxu0 %v5638_v5 }
  0xd9   : > { %v6054_v28 = vpack.c.bf16 %v685_v25, %v683_v24  ;;  %v6057_v29 = vpack.c.bf16 %v690_v27, %v688_v26  ;;  %v687_v30 = vld [vmem:[%s5989_s11 + $0x80] sm:$0xff]  ;;  %v689_v31 = vld [vmem:[%s5989_s11 + $0x90] sm:$0xff]  ;;  %v692_v32 = vld [vmem:[%s5989_s11 + $0xa8] sm:$0xff]  ;;  %s6188_s17 = scalar_lea.vmem %s7124_s21, %s3627_s3 }
  0xda   : > { %v694_v33 = vld [vmem:[%s5989_s11 + $0xb8] sm:$0xff]  ;;  %v6064_v34 = vpack.c.bf16 %v689_v31, %v687_v30  ;;  %v691_v36 = vld [vmem:[%s5989_s11 + $0xa0] sm:$0xff]  ;;  %v693_v37 = vld [vmem:[%s5989_s11 + $0xb0] sm:$0xff]  ;;  %s6442_s19 = scalar_lea.vmem %s7125_s23, %s6105_s24 }
  0xdb   : > { %4699 = vmatpush1.bf16.msra.mxu1 %v6034_v16  ;;  %v6067_v35 = vpack.c.bf16 %v694_v33, %v692_v32  ;;  %v696_v38 = vld [vmem:[%s5989_s11 + $0xc8] sm:$0xff]  ;;  %v698_v39 = vld [vmem:[%s5989_s11 + $0xd8] sm:$0xff]  ;;  %v6074_v40 = vpack.c.bf16 %v693_v37, %v691_v36  ;;  %v695_v42 = vld [vmem:[%s5989_s11 + $0xc0] sm:$0xff] }
  0xdc   : > { %4701 = vmatprep.subr.bf16.mxu1 %v6037_v17  ;;  %v6077_v41 = vpack.c.bf16 %v698_v39, %v696_v38  ;;  %v697_v43 = vld [vmem:[%s5989_s11 + $0xd0] sm:$0xff]  ;;  %v700_v44 = vld [vmem:[%s5989_s11 + $0xe8] sm:$0xff]  ;;  %v702_v45 = vld [vmem:[%s5989_s11 + $0xf8] sm:$0xff] }
  0xdd   : > { %v6084_v46 = vpack.c.bf16 %v697_v43, %v695_v42  ;;  %v6087_v47 = vpack.c.bf16 %v702_v45, %v700_v44  ;;  %v699_v48 = vld [vmem:[%s5989_s11 + $0xe0] sm:$0xff]  ;;  %v701_v49 = vld [vmem:[%s5989_s11 + $0xf0] sm:$0xff]  ;;  %v6116_v54 = vld [vmem:[%s6113_s25] ss:$0 sm:$0xff] }
  0xde   : > { %v6092_v50 = vpack.c.bf16 %v701_v49, %v699_v48  ;;  %v6119_v56 = vld [vmem:[%s6113_s25 + $0x2] ss:$0 sm:$0xff]  ;;  %v827_v2 = vld [vmem:[%s5991_s18] sm:$0xff]  ;;  %v829_v4 = vld [vmem:[%s5991_s18 + $0x10] sm:$0xff] }
  0xdf   : > { %4703 = vmatpush1.bf16.msra.mxu1 %v6044_v22  ;;  %v828_v3 = vld [vmem:[%s5991_s18 + $0x8] sm:$0xff]  ;;  %v830_v9 = vld [vmem:[%s5991_s18 + $0x18] sm:$0xff]  ;;  %v831_v30 = vld [vmem:[%s5991_s18 + $0x20] sm:$0xff] }
  0xe0   : > { %4705 = vmatprep.subr.bf16.mxu1 %v6047_v23  ;;  %v6137_v6 = vpack.c.bf16 %v828_v3, %v827_v2  ;;  %v6142_v10 = vpack.c.bf16 %v830_v9, %v829_v4  ;;  %v832_v31 = vld [vmem:[%s5991_s18 + $0x28] sm:$0xff]  ;;  %v833_v36 = vld [vmem:[%s5991_s18 + $0x30] sm:$0xff]  ;;  %v834_v37 = vld [vmem:[%s5991_s18 + $0x38] sm:$0xff] }
  0xe1   : > { %v6149_v33 = vpack.c.bf16 %v832_v31, %v831_v30  ;;  %v6155_v39 = vpack.c.bf16 %v834_v37, %v833_v36  ;;  %v835_v42 = vld [vmem:[%s5991_s18 + $0x40] sm:$0xff]  ;;  %v836_v43 = vld [vmem:[%s5991_s18 + $0x48] sm:$0xff]  ;;  %v837_v45 = vld [vmem:[%s5991_s18 + $0x50] sm:$0xff] }
  0xe2   : > { %4726 = vmatpush3.bf16.msra.mxu0 %v6137_v6  ;;  %v6161_v44 = vpack.c.bf16 %v836_v43, %v835_v42  ;;  %v838_v48 = vld [vmem:[%s5991_s18 + $0x58] sm:$0xff]  ;;  %v6192_v3 = vld [vmem:[%s5997_s9] ss:$0 sm:$0xff]  ;;  %v6210_v36 = vld [vmem:[%s6188_s17 + $0x2] ss:$0 sm:$0xff] }
  0xe3   : > { %4707 = vmatpush1.bf16.msra.mxu1 %v6054_v28  ;;  %4727 = vmatprep.subr.bf16.mxu0 %v5638_v5  ;;  %v6167_v49 = vpack.c.bf16 %v838_v48, %v837_v45  ;;  %v3651_v45 = vld [vmem:[%s5991_s18 + $0xa0] sm:$0xff]  ;;  %v3652_v48 = vld [vmem:[%s5991_s18 + $0xa8] sm:$0xff] }
  0xe4   : > { %4709 = vmatprep.subr.bf16.mxu1 %v6057_v29 }
  0xe6   : > { %4729 = vmatpush3.bf16.msra.mxu0 %v6142_v10 }
  0xe7   : > { %4711 = vmatpush1.bf16.msra.mxu1 %v6064_v34  ;;  %4730 = vmatprep.subr.bf16.mxu0 %v5638_v5 }
  0xe8   : > { %4713 = vmatprep.subr.bf16.mxu1 %v6067_v35 }
  0xea   : > { %4732 = vmatpush3.bf16.msra.mxu0 %v6149_v33 }
  0xeb   : > { %4715 = vmatpush1.bf16.msra.mxu1 %v6074_v40  ;;  %4733 = vmatprep.subr.bf16.mxu0 %v5638_v5 }
  0xec   : > { %4717 = vmatprep.subr.bf16.mxu1 %v6077_v41 }
  0xee   : > { %4735 = vmatpush3.bf16.msra.mxu0 %v6155_v39 }
  0xef   : > { %4719 = vmatpush1.bf16.msra.mxu1 %v6084_v46  ;;  %4736 = vmatprep.subr.bf16.mxu0 %v5638_v5 }
  0xf0   : > { %4721 = vmatprep.subr.bf16.mxu1 %v6087_v47 }
  0xf2   : > { %4738 = vmatpush3.bf16.msra.mxu0 %v6161_v44 }
  0xf3   : > { %4723 = vmatpush1.bf16.msra.mxu1 %v6092_v50  ;;  %4739 = vmatprep.subr.bf16.mxu0 %v5638_v5 }
  0xf4   : > { %4748 = vmatprep.subr.bf16.mxu1 %v5638_v5 }
  0xf6   : > { %4741 = vmatpush3.bf16.msra.mxu0 %v6167_v49 }
  0xf7   : > { %4742 = vmatprep.subr.bf16.mxu0 %v5638_v5 }
 0x1a8   : > { %v6096_v51 = vpop.f32.mrb[0].mxu0 }
 0x1a9   : > { %v4131_v52 = vpop.f32.mrb[1].mxu0  ;;  %768 = vmatmul.mubr.f32.vlgmr.msra.gmra.mrb[0].mxu1 %v6096_v51 }
 0x1aa   : > { %4199 = vmatprep.mubr.msk.f32.mxu1 %vm5636_vm0, %v5635_v0  ;;  %v839_v52 = vld [vmem:[%s5991_s18 + $0x60] sm:$0xff] }
 0x27c   : > { %v769_v55 = vpop.f32.mrb[0].mxu1 }
 0x27d   : > { %v6122_v57 = vadd.f32 %v6116_v54, %v769_v55  ;;  %v771_v58 = vpop.f32.mrb[1].mxu1  ;;  %v840_v55 = vld [vmem:[%s5991_s18 + $0x68] sm:$0xff] }
 0x27e   : > { %v6125_v59 = vadd.f32 %v6119_v56, %v771_v58  ;;  %v841_v58 = vld [vmem:[%s5991_s18 + $0x70] sm:$0xff] }
 0x27f   : > { %v787_v60 = vmul.f32 0.01, %v6122_v57  ;;  %v784_v61 = vmul.f32 %v6122_v57, %v6122_v57 }
 0x280   : > { %v1069_v62 = vmul.f32 %v6125_v59, %v6125_v59  ;;  %v1072_v63 = vmul.f32 0.01, %v6125_v59 }
 0x281   : > { %794 = vperm.xlu1 %5309, %v787_v60   ;;  %785 = vadd.xlane.f32.xlu0 %v784_v61  ;;  %v790_v14 = vmul.f32 %v787_v60, %v787_v60  ;;  %v6174_v60 = vpack.c.bf16 %v840_v55, %v839_v52  ;;  %v6228_v55 = vpack.c.bf16 %v3652_v48, %v3651_v45 }
 0x282   : > { %v1075_v24 = vmul.f32 %v1072_v63, %v1072_v63 }
 0x283   : > { %4744 = vmatpush3.bf16.msra.mxu0 %v6174_v60 }
 0x284   : > { %4745 = vmatprep.subr.bf16.mxu0 %v5638_v5 }
 0x285   : > { %1070 = vadd.xlane.f32.xlu0 %v1069_v62 }
 0x29b   : > { %1079 = vperm.xlu0 %5310, %v1072_v63  }
 0x300   : > { %v795_v63 = vpop.permute.xlu1 %794 }
 0x301   : > { %v797_v2 = vsub.f32 %v6122_v57, %v795_v63 }
 0x30e   : > { %v786_v11 = vpop.xlane.xlu0 %785 }
 0x30f   : > { %v788_v13 = vsub.f32 %v786_v11, %v784_v61  ;;  %v842_v61 = vld [vmem:[%s5991_s18 + $0x78] sm:$0xff]  ;;  %v6195_v11 = vld [vmem:[%s6188_s17] ss:$0 sm:$0xff] }
 0x311   : > { %v789_v15 = vmul.f32 0.01, %v788_v13 }
 0x312   : > { %v1071_v18 = vpop.xlane.xlu0 %1070 }
 0x313   : > { %v791_v19 = vsub.f32 %v789_v15, %v790_v14  ;;  %v1073_v20 = vsub.f32 %v1071_v18, %v1069_v62  ;;  %v6178_v62 = vpack.c.bf16 %v842_v61, %v841_v58  ;;  %v3653_v58 = vld [vmem:[%s5991_s18 + $0xb0] sm:$0xff]  ;;  %v3654_v61 = vld [vmem:[%s5991_s18 + $0xb8] sm:$0xff] }
 0x315   : > { %v798_v21 = vadd.f32 1e-05, %v791_v19  ;;  %v1074_v25 = vmul.f32 0.01, %v1073_v20  ;;  %4747 = vmatpush3.bf16.msra.mxu0 %v6178_v62 }
 0x316   : > { %4772 = vmatprep.subr.bf16.mxu0 %v5638_v5 }
 0x317   : > { %5317 = vrsqrt.f32 %v798_v21  ;;  %v1076_v26 = vsub.f32 %v1074_v25, %v1075_v24  ;;  %v6202_v24 = vld [vmem:[%s5997_s9 + $0x2] ss:$0 sm:$0xff] }
 0x318   : > { %v3647_v25 = vld [vmem:[%s5991_s18 + $0x80] sm:$0xff] }
 0x319   : > { %v1083_v27 = vadd.f32 1e-05, %v1076_v26  ;;  %v3648_v26 = vld [vmem:[%s5991_s18 + $0x88] sm:$0xff] }
 0x31a   : > { %v1080_v19 = vpop.permute.xlu0 %1079 }
 0x31b   : > { %5319 = vrsqrt.f32 %v1083_v27  ;;  %v1082_v20 = vsub.f32 %v6125_v59, %v1080_v19  ;;  %v3649_v59 = vld [vmem:[%s5991_s18 + $0x90] sm:$0xff]  ;;  %v3659_v19 = vld [vmem:[%s5991_s18 + $0xe0] sm:$0xff] }
 0x321   : > { %v5318_v32 = vpop.eup %5317 }
 0x322   : > { %802 = vperm.xlu1 %5309, %v5318_v32   ;;  %v6207_v32 = vpack.c.bf16 %v3648_v26, %v3647_v25  ;;  %v3662_v25 = vld [vmem:[%s5991_s18 + $0xf8] sm:$0xff] }
 0x325   : > { %v5320_v38 = vpop.eup %5319 }
 0x326   : > { %1087 = vperm.xlu1 %5309, %v5320_v38   ;;  %v3650_v38 = vld [vmem:[%s5991_s18 + $0x98] sm:$0xff] }
 0x327   : > { %v6219_v43 = vpack.c.bf16 %v3650_v38, %v3649_v59  ;;  %v969_v59 = vld [vmem:[%s5999_s27 + $0x18] sm:$0xff] }
 0x3a1   : > { %v803_v4 = vpop.permute.xlu1 %802 }
 0x3a2   : > { %v805_v9 = vmul.f32 %v803_v4, %v797_v2  ;;  %v6234_v2 = vpack.c.bf16 %v3654_v61, %v3653_v58  ;;  %v3655_v4 = vld [vmem:[%s5991_s18 + $0xc0] sm:$0xff] }
 0x3a4   : > { %v813_v13 = vmul.f32 %v6192_v3, %v805_v9  ;;  %v3656_v9 = vld [vmem:[%s5991_s18 + $0xc8] sm:$0xff] }
 0x3a5   : > { %v1088_v57 = vpop.permute.xlu1 %1087 }
 0x3a6   : > { %v821_v14 = vadd.f32 %v6195_v11, %v813_v13  ;;  %v1090_v21 = vmul.f32 %v1088_v57, %v1082_v20  ;;  %v6240_v13 = vpack.c.bf16 %v3656_v9, %v3655_v4  ;;  %v3660_v57 = vld [vmem:[%s5991_s18 + $0xe8] sm:$0xff]  ;;  %v971_v9 = vld [vmem:[%s5999_s27 + $0x28] sm:$0xff] }
 0x3a7   : > { %v6252_v20 = vpack.c.bf16 %v3660_v57, %v3659_v19  ;;  %v970_v4 = vld [vmem:[%s5999_s27 + $0x20] sm:$0xff]  ;;  %v973_v19 = vld [vmem:[%s5999_s27 + $0x38] sm:$0xff] }
 0x3a8   : > { %v822_v15 = vadd.f32 %v821_v14, %v6096_v51  ;;  %v1099_v31 = vmul.f32 %v6202_v24, %v1090_v21  ;;  %v3657_v14 = vld [vmem:[%s5991_s18 + $0xd0] sm:$0xff] }
 0x3a9   : > { %v3661_v21 = vld [vmem:[%s5991_s18 + $0xf0] sm:$0xff] }
 0x3aa   : > { %v823_v18 = vmul.f32 0.5, %v822_v15  ;;  %v1108_v42 = vadd.f32 %v6210_v36, %v1099_v31  ;;  %v3658_v15 = vld [vmem:[%s5991_s18 + $0xd8] sm:$0xff] }
 0x3ac   : > { %5321 = vtanh.f32 %v823_v18  ;;  %v1109_v52 = vadd.f32 %v1108_v42, %v6096_v51  ;;  %v6246_v18 = vpack.c.bf16 %v3658_v15, %v3657_v14  ;;  %v6315_v14 = vpack.c.bf16 %v971_v9, %v970_v4  ;;  %v972_v15 = vld [vmem:[%s5999_s27 + $0x30] sm:$0xff]  ;;  %v6354_v9 = vld [vmem:[%s6188_s17 + $0x1] ss:$0 sm:$0xff] }
 0x3ad   : > { %v6321_v57 = vpack.c.bf16 %v973_v19, %v972_v15 }
 0x3ae   : > { %v1110_v63 = vmul.f32 0.5, %v1109_v52 }
 0x3b0   : > { %5323 = vtanh.f32 %v1110_v63 }
 0x3b6   : > { %v5322_v27 = vpop.eup %5321 }
 0x3b7   : > { %v825_v30 = vmul.f32 0.5, %v5322_v27  ;;  %v6258_v27 = vpack.c.bf16 %v3662_v25, %v3661_v21  ;;  %v974_v21 = vld [vmem:[%s5999_s27 + $0x40] sm:$0xff]  ;;  %v975_v25 = vld [vmem:[%s5999_s27 + $0x48] sm:$0xff] }
 0x3b9   : > { %v6212_v37 = vadd.f32 0.5, %v825_v30 }
 0x3ba   : > { %v5324_v26 = vpop.eup %5323 }
 0x3bb   : > { %4165 = vmatmul.mubr.f32.vlgmr.msra.gmra.mrb[2].mxu0 %v6212_v37  ;;  %v1112_v30 = vmul.f32 0.5, %v5324_v26  ;;  %v6327_v26 = vpack.c.bf16 %v975_v25, %v974_v21 }
 0x3bc   : > { %4774 = vmatpush3.bf16.msra.mxu0 %v6207_v32  ;;  %4234 = vmatprep.mubr.msk.f32.mxu0 %vm5636_vm0, %v5635_v0 }
 0x3bd   : > { %4775 = vmatprep.subr.bf16.mxu0 %v5638_v5  ;;  %v6262_v31 = vadd.f32 0.5, %v1112_v30  ;;  %v976_v30 = vld [vmem:[%s5999_s27 + $0x50] sm:$0xff] }
 0x3c0   : > { %4777 = vmatpush3.bf16.msra.mxu0 %v6219_v43 }
 0x3c1   : > { %4778 = vmatprep.subr.bf16.mxu0 %v5638_v5 }
 0x3c4   : > { %4780 = vmatpush3.bf16.msra.mxu0 %v6228_v55 }
 0x3c5   : > { %4781 = vmatprep.subr.bf16.mxu0 %v5638_v5 }
 0x3c8   : > { %4783 = vmatpush3.bf16.msra.mxu0 %v6234_v2 }
 0x3c9   : > { %4784 = vmatprep.subr.bf16.mxu0 %v5638_v5 }
 0x3cc   : > { %4786 = vmatpush3.bf16.msra.mxu0 %v6240_v13 }
 0x3cd   : > { %4787 = vmatprep.subr.bf16.mxu0 %v5638_v5 }
 0x3d0   : > { %4789 = vmatpush3.bf16.msra.mxu0 %v6246_v18 }
 0x3d1   : > { %4790 = vmatprep.subr.bf16.mxu0 %v5638_v5 }
 0x3d4   : > { %4792 = vmatpush3.bf16.msra.mxu0 %v6252_v20 }
 0x3d5   : > { %4793 = vmatprep.subr.bf16.mxu0 %v5638_v5 }
 0x3d8   : > { %4795 = vmatpush3.bf16.msra.mxu0 %v6258_v27 }
 0x3d9   : > { %4821 = vmatprep.subr.bf16.mxu0 %v6018_v7  ;;  %v6284_v7 = vld [vmem:[%s6113_s25 + $0x1] ss:$0 sm:$0xff] }
 0x3db   : > { %4235 = vmatmul.mubr.f32.vlgmr.msra.gmra.mrb[4].mxu0 %v6262_v31 }
 0x3dc   : > { %4823 = vmatpush1.bf16.msra.mxu0 %v6020_v8  ;;  %1455 = vmatprep.mubr.f32.mxu0 %v5635_v0 }
 0x3dd   : > { %4825 = vmatprep.subr.bf16.mxu0 %v6025_v12 }
 0x3e0   : > { %4827 = vmatpush1.bf16.msra.mxu0 %v6034_v16 }
 0x3e1   : > { %4829 = vmatprep.subr.bf16.mxu0 %v6037_v17 }
 0x3e4   : > { %4831 = vmatpush1.bf16.msra.mxu0 %v6044_v22 }
 0x3e5   : > { %4833 = vmatprep.subr.bf16.mxu0 %v6047_v23  ;;  %v6293_v23 = vld [vmem:[%s6113_s25 + $0x3] ss:$0 sm:$0xff] }
 0x3e8   : > { %4835 = vmatpush1.bf16.msra.mxu0 %v6054_v28 }
 0x3e9   : > { %4837 = vmatprep.subr.bf16.mxu0 %v6057_v29 }
 0x3ec   : > { %4839 = vmatpush1.bf16.msra.mxu0 %v6064_v34 }
 0x3ed   : > { %4841 = vmatprep.subr.bf16.mxu0 %v6067_v35 }
 0x3f0   : > { %4843 = vmatpush1.bf16.msra.mxu0 %v6074_v40 }
 0x3f1   : > { %4845 = vmatprep.subr.bf16.mxu0 %v6077_v41  ;;  %v966_v41 = vld [vmem:[%s5999_s27] sm:$0xff] }
 0x3f4   : > { %4847 = vmatpush1.bf16.msra.mxu0 %v6084_v46  ;;  %v967_v46 = vld [vmem:[%s5999_s27 + $0x8] sm:$0xff] }
 0x3f5   : > { %4849 = vmatprep.subr.bf16.mxu0 %v6087_v47  ;;  %v968_v47 = vld [vmem:[%s5999_s27 + $0x10] sm:$0xff] }
 0x3f6   : > { %v6308_v38 = vpack.c.bf16 %v969_v59, %v968_v47  ;;  %v980_v59 = vld [vmem:[%s5999_s27 + $0x70] sm:$0xff] }
 0x3f8   : > { %4851 = vmatpush1.bf16.msra.mxu0 %v6092_v50  ;;  %v6304_v50 = vpack.c.bf16 %v967_v46, %v966_v41 }
 0x3f9   : > { %4876 = vmatprep.subr.bf16.mxu0 %v5638_v5 }
 0x3fa   : > { %4750 = vmatpush3.bf16.msra.mxu1 %v6304_v50 }
 0x3fb   : > { %4751 = vmatprep.subr.bf16.mxu1 %v5638_v5 }
 0x3fe   : > { %4753 = vmatpush3.bf16.msra.mxu1 %v6308_v38 }
 0x3ff   : > { %4754 = vmatprep.subr.bf16.mxu1 %v5638_v5 }
 0x402   : > { %4756 = vmatpush3.bf16.msra.mxu1 %v6315_v14 }
 0x403   : > { %4757 = vmatprep.subr.bf16.mxu1 %v5638_v5 }
 0x406   : > { %4759 = vmatpush3.bf16.msra.mxu1 %v6321_v57 }
 0x407   : > { %4760 = vmatprep.subr.bf16.mxu1 %v5638_v5 }
 0x40a   : > { %4762 = vmatpush3.bf16.msra.mxu1 %v6327_v26 }
 0x40b   : > { %4763 = vmatprep.subr.bf16.mxu1 %v5638_v5 }
 0x48e   : > { %v917_v8 = vpop.f32.mrb[2].mxu0 }
 0x48f   : > { %v6287_v12 = vadd.f32 %v6284_v7, %v917_v8  ;;  %v4166_v16 = vpop.f32.mrb[3].mxu0  ;;  %v977_v8 = vld [vmem:[%s5999_s27 + $0x58] sm:$0xff] }
 0x490   : > { %v6333_v16 = vpack.c.bf16 %v977_v8, %v976_v30  ;;  %v3669_v30 = vld [vmem:[%s5999_s27 + $0x80] sm:$0xff] }
 0x491   : > { %v924_v17 = vmul.f32 0.01, %v6287_v12  ;;  %v921_v22 = vmul.f32 %v6287_v12, %v6287_v12 }
 0x492   : > { %4765 = vmatpush3.bf16.msra.mxu1 %v6333_v16 }
 0x493   : > { %931 = vperm.xlu0 %5310, %v924_v17   ;;  %922 = vadd.xlane.f32.xlu1 %v921_v22  ;;  %v927_v48 = vmul.f32 %v924_v17, %v924_v17  ;;  %v978_v17 = vld [vmem:[%s5999_s27 + $0x60] sm:$0xff] }
 0x494   : > { %4766 = vmatprep.subr.bf16.mxu1 %v5638_v5 }
 0x4ae   : > { %v1205_v28 = vpop.f32.mrb[4].mxu0 }
 0x4af   : > { %v6296_v29 = vadd.f32 %v6293_v23, %v1205_v28  ;;  %v4236_v34 = vpop.f32.mrb[5].mxu0 }
 0x4b1   : > { %v1212_v35 = vmul.f32 0.01, %v6296_v29  ;;  %v1209_v40 = vmul.f32 %v6296_v29, %v6296_v29 }
 0x4b3   : > { %1219 = vperm.xlu0 %5310, %v1212_v35   ;;  %1210 = vadd.xlane.f32.xlu1 %v1209_v40  ;;  %v1215_v46 = vmul.f32 %v1212_v35, %v1212_v35 }
 0x520   : > { %v923_v42 = vpop.xlane.xlu1 %922 }
 0x521   : > { %v925_v45 = vsub.f32 %v923_v42, %v921_v22  ;;  %v979_v22 = vld [vmem:[%s5999_s27 + $0x68] sm:$0xff]  ;;  %v981_v42 = vld [vmem:[%s5999_s27 + $0x78] sm:$0xff] }
 0x522   : > { %v6338_v41 = vpack.c.bf16 %v979_v22, %v978_v17 }
 0x523   : > { %v926_v52 = vmul.f32 0.01, %v925_v45 }
 0x524   : > { %4768 = vmatpush3.bf16.msra.mxu1 %v6338_v41 }
 0x525   : > { %v928_v58 = vsub.f32 %v926_v52, %v927_v48  ;;  %v6344_v48 = vpack.c.bf16 %v981_v42, %v980_v59  ;;  %4769 = vmatprep.subr.bf16.mxu1 %v5638_v5  ;;  %v3673_v59 = vld [vmem:[%s5999_s27 + $0xa0] sm:$0xff]  ;;  %v3674_v42 = vld [vmem:[%s5999_s27 + $0xa8] sm:$0xff] }
 0x527   : > { %v935_v61 = vadd.f32 1e-05, %v928_v58 }
 0x528   : > { %4771 = vmatpush3.bf16.msra.mxu1 %v6344_v48 }
 0x529   : > { %5325 = vrsqrt.f32 %v935_v61  ;;  %4796 = vmatprep.subr.bf16.mxu1 %v5638_v5  ;;  %v6351_v61 = vld [vmem:[%s5997_s9 + $0x1] ss:$0 sm:$0xff] }
 0x533   : > { %v5326_v63 = vpop.eup %5325 }
 0x534   : > { %939 = vperm.xlu1 %5309, %v5326_v63  }
 0x540   : > { %v1211_v28 = vpop.xlane.xlu1 %1210 }
 0x541   : > { %v1213_v34 = vsub.f32 %v1211_v28, %v1209_v40  ;;  %v932_v40 = vpop.permute.xlu0 %931 }
 0x542   : > { %v934_v58 = vsub.f32 %v6287_v12, %v932_v40  ;;  %v3670_v12 = vld [vmem:[%s5999_s27 + $0x88] sm:$0xff] }
 0x543   : > { %v1214_v47 = vmul.f32 0.01, %v1213_v34  ;;  %v6361_v22 = vpack.c.bf16 %v3670_v12, %v3669_v30  ;;  %v3671_v34 = vld [vmem:[%s5999_s27 + $0x90] sm:$0xff] }
 0x545   : > { %v1216_v45 = vsub.f32 %v1214_v47, %v1215_v46  ;;  %v3672_v46 = vld [vmem:[%s5999_s27 + $0x98] sm:$0xff]  ;;  %v1220_v47 = vpop.permute.xlu0 %1219 }
 0x547   : > { %v1223_v52 = vadd.f32 1e-05, %v1216_v45  ;;  %v1222_v45 = vsub.f32 %v6296_v29, %v1220_v47  ;;  %v3681_v47 = vld [vmem:[%s5999_s27 + $0xe0] sm:$0xff] }
 0x549   : > { %5327 = vrsqrt.f32 %v1223_v52  ;;  %v6375_v52 = vpack.c.bf16 %v3674_v42, %v3673_v59  ;;  %v3683_v42 = vld [vmem:[%s5999_s27 + $0xf0] sm:$0xff] }
 0x553   : > { %v5328_v35 = vpop.eup %5327 }
 0x554   : > { %1227 = vperm.xlu0 %5310, %v5328_v35   ;;  %v6378_v35 = vld [vmem:[%s5997_s9 + $0x3] ss:$0 sm:$0xff] }
 0x5b3   : > { %v940_v63 = vpop.permute.xlu1 %939 }
 0x5b4   : > { %v942_v4 = vmul.f32 %v940_v63, %v934_v58  ;;  %v3675_v58 = vld [vmem:[%s5999_s27 + $0xb0] sm:$0xff]  ;;  %v3676_v63 = vld [vmem:[%s5999_s27 + $0xb8] sm:$0xff] }
 0x5b5   : > { %v6388_v29 = vpack.c.bf16 %v3676_v63, %v3675_v58 }
 0x5b6   : > { %v951_v15 = vmul.f32 %v6351_v61, %v942_v4 }
 0x5b8   : > { %v960_v19 = vadd.f32 %v6354_v9, %v951_v15  ;;  %v6384_v15 = vld [vmem:[%s6188_s17 + $0x3] ss:$0 sm:$0xff] }
 0x5ba   : > { %v961_v21 = vadd.f32 %v960_v19, %v6212_v37  ;;  %v6366_v37 = vpack.c.bf16 %v3672_v46, %v3671_v34 }
 0x5bc   : > { %v962_v25 = vmul.f32 0.5, %v961_v21  ;;  %v3677_v21 = vld [vmem:[%s5999_s27 + $0xc0] sm:$0xff] }
 0x5be   : > { %5329 = vtanh.f32 %v962_v25  ;;  %v3678_v25 = vld [vmem:[%s5999_s27 + $0xc8] sm:$0xff] }
 0x5c8   : > { %v5330_v8 = vpop.eup %5329 }
 0x5c9   : > { %v964_v17 = vmul.f32 0.5, %v5330_v8  ;;  %v6396_v8 = vpack.c.bf16 %v3678_v25, %v3677_v21 }
 0x5cb   : > { %v965_v28 = vadd.f32 0.5, %v964_v17  ;;  %v3679_v17 = vld [vmem:[%s5999_s27 + $0xd0] sm:$0xff] }
 0x5cd   : > { %4200 = vmatmul.mubr.f32.vlgmr.msra.gmra.mrb[2].mxu1 %v965_v28  ;;  %v3680_v28 = vld [vmem:[%s5999_s27 + $0xd8] sm:$0xff] }
 0x5ce   : > { %4798 = vmatpush3.bf16.msra.mxu1 %v6361_v22  ;;  %4269 = vmatprep.mubr.msk.f32.mxu1 %vm5636_vm0, %v5635_v0  ;;  %v6402_v46 = vpack.c.bf16 %v3680_v28, %v3679_v17 }
 0x5cf   : > { %4799 = vmatprep.subr.bf16.mxu1 %v5638_v5 }
 0x5d2   : > { %4801 = vmatpush3.bf16.msra.mxu1 %v6366_v37 }
 0x5d3   : > { %v1228_v40 = vpop.permute.xlu0 %1227  ;;  %4802 = vmatprep.subr.bf16.mxu1 %v5638_v5 }
 0x5d4   : > { %v1230_v4 = vmul.f32 %v1228_v40, %v1222_v45  ;;  %v3684_v45 = vld [vmem:[%s5999_s27 + $0xf8] sm:$0xff] }
 0x5d5   : > { %v6414_v40 = vpack.c.bf16 %v3684_v45, %v3683_v42 }
 0x5d6   : > { %v1239_v19 = vmul.f32 %v6378_v35, %v1230_v4  ;;  %4804 = vmatpush3.bf16.msra.mxu1 %v6375_v52 }
 0x5d7   : > { %4805 = vmatprep.subr.bf16.mxu1 %v5638_v5 }
 0x5d8   : > { %v1248_v30 = vadd.f32 %v6384_v15, %v1239_v19 }
 0x5da   : > { %v1249_v12 = vadd.f32 %v1248_v30, %v6262_v31  ;;  %4807 = vmatpush3.bf16.msra.mxu1 %v6388_v29  ;;  %v3682_v31 = vld [vmem:[%s5999_s27 + $0xe8] sm:$0xff] }
 0x5db   : > { %4808 = vmatprep.subr.bf16.mxu1 %v5638_v5  ;;  %v6408_v59 = vpack.c.bf16 %v3682_v31, %v3681_v47 }
 0x5dc   : > { %v1250_v34 = vmul.f32 0.5, %v1249_v12 }
 0x5de   : > { %5331 = vtanh.f32 %v1250_v34  ;;  %4810 = vmatpush3.bf16.msra.mxu1 %v6396_v8 }
 0x5df   : > { %4811 = vmatprep.subr.bf16.mxu1 %v5638_v5 }
 0x5e2   : > { %4813 = vmatpush3.bf16.msra.mxu1 %v6402_v46 }
 0x5e3   : > { %4814 = vmatprep.subr.bf16.mxu1 %v5638_v5 }
 0x5e6   : > { %4816 = vmatpush3.bf16.msra.mxu1 %v6408_v59 }
 0x5e7   : > { %4817 = vmatprep.subr.bf16.mxu1 %v5638_v5 }
 0x5e8   : > { %v5332_v58 = vpop.eup %5331 }
 0x5e9   : > { %v1252_v63 = vmul.f32 0.5, %v5332_v58 }
 0x5ea   : > { %4819 = vmatpush3.bf16.msra.mxu1 %v6414_v40 }
 0x5eb   : > { %v1253_v4 = vadd.f32 0.5, %v1252_v63  ;;  %4852 = vmatprep.subr.bf16.mxu1 %v5638_v5 }
 0x5ed   : > { %4270 = vmatmul.mubr.f32.vlgmr.msra.gmra.mrb[2].mxu1 %v1253_v4 }
 0x5ee   : > { %4854 = vmatpush3.bf16.msra.mxu1 %v6137_v6  ;;  %4304 = vmatprep.mubr.msk.f32.mxu1 %vm5636_vm0, %v5635_v0  ;;  %v5639_v6 = vmov 0  }
 0x5ef   : > { %4855 = vmatprep.subr.bf16.mxu1 %v5638_v5  ;;  %5311 = vset.pattern.permute.xlu0 %v5639_v6 }
 0x5f2   : > { %4857 = vmatpush3.bf16.msra.mxu1 %v6142_v10  ;;  %v6445_v10 = vld [vmem:[%s6442_s19] ss:$0 sm:$0xff] }
 0x5f3   : > { %4858 = vmatprep.subr.bf16.mxu1 %v5638_v5 }
 0x5f6   : > { %4860 = vmatpush3.bf16.msra.mxu1 %v6149_v33 }
 0x5f7   : > { %4861 = vmatprep.subr.bf16.mxu1 %v5638_v5 }
 0x5fa   : > { %4863 = vmatpush3.bf16.msra.mxu1 %v6155_v39 }
 0x5fb   : > { %4864 = vmatprep.subr.bf16.mxu1 %v5638_v5 }
 0x5fe   : > { %4866 = vmatpush3.bf16.msra.mxu1 %v6161_v44 }
 0x5ff   : > { %4867 = vmatprep.subr.bf16.mxu1 %v5638_v5 }
 0x602   : > { %4869 = vmatpush3.bf16.msra.mxu1 %v6167_v49 }
 0x603   : > { %4870 = vmatprep.subr.bf16.mxu1 %v5638_v5 }
 0x606   : > { %4872 = vmatpush3.bf16.msra.mxu1 %v6174_v60  ;;  %v667_v60 = vrot.slane %v6010_v1, 1 }
 0x607   : > { %4873 = vmatprep.subr.bf16.mxu1 %v5638_v5 }
 0x608   : > { %v669_v19 = vadd.f32 %v667_v60, %v6010_v1 }
 0x60a   : > { %4875 = vmatpush3.bf16.msra.mxu1 %v6178_v62  ;;  %v1342_v62 = vlaneseq  ;;  %v6457_v25 = vmul.f32 0.05, %v669_v19 }
 0x60b   : > { %4900 = vmatprep.subr.bf16.mxu1 %v5638_v5 }
 0x60c   : > { %v6455_v21 = vshrl.u32 %v1342_v62, 7 }
 0x60e   : > { %v1344_v30 = vsub.s32 0, %v6455_v21  ;;  %v1355_v12 = vsub.s32 2, %v6455_v21 }
 0x610   : > { %v1345_v17 = vrot.slane %v6457_v25, %v1344_v30  ;;  %v1356_v28 = vrot.slane %v6010_v1, %v1355_v12 }
 0x612   : > { %v1346_v47 = vadd.f32 %v1345_v17, %v6096_v51 }
 0x6c0   : > { %v1337_v33 = vpop.f32.mrb[2].mxu1 }
 0x6c1   : > { %v6448_v39 = vadd.f32 %v6445_v10, %v1337_v33  ;;  %v4271_v44 = vpop.f32.mrb[3].mxu1 }
 0x6c3   : > { %v1347_v49 = vmul.f32 0.05, %v6448_v39 }
 0x6c5   : > { %1350 = vperm.xlu0 %5311, %v1347_v49  }
 0x6c9   : > { %5312 = vset.pattern.permute.xlu0 %v5637_v53 }
 0x744   : > { %v1351_v34 = vpop.permute.xlu0 %1350 }
 0x745   : > { %v1357_v31 = vmul.f32 %v1356_v28, %v1351_v34 }
 0x747   : > { %v6466_v42 = vadd.f32 %v1357_v31, %v1346_v47 }
 0x749   : > { %1456 = vmatmul.mubr.f32.vlgmr.msra.gmra.mrb[6].mxu0 %v6466_v42 }
 0x74a   : > { %4878 = vmatpush3.bf16.msra.mxu0 %v6304_v50  ;;  %4339 = vmatprep.mubr.msk.f32.mxu0 %vm5636_vm0, %v5635_v0 }
 0x74b   : > { %4879 = vmatprep.subr.bf16.mxu0 %v5638_v5 }
 0x74e   : > { %4881 = vmatpush3.bf16.msra.mxu0 %v6308_v38 }
 0x74f   : > { %4882 = vmatprep.subr.bf16.mxu0 %v5638_v5 }
 0x752   : > { %4884 = vmatpush3.bf16.msra.mxu0 %v6315_v14 }
 0x753   : > { %4885 = vmatprep.subr.bf16.mxu0 %v5638_v5 }
 0x756   : > { %4887 = vmatpush3.bf16.msra.mxu0 %v6321_v57 }
 0x757   : > { %4888 = vmatprep.subr.bf16.mxu0 %v5638_v5 }
 0x75a   : > { %4890 = vmatpush3.bf16.msra.mxu0 %v6327_v26 }
 0x75b   : > { %4891 = vmatprep.subr.bf16.mxu0 %v5638_v5 }
 0x75e   : > { %4893 = vmatpush3.bf16.msra.mxu0 %v6333_v16 }
 0x75f   : > { %4894 = vmatprep.subr.bf16.mxu0 %v5638_v5 }
 0x762   : > { %4896 = vmatpush3.bf16.msra.mxu0 %v6338_v41 }
 0x763   : > { %4897 = vmatprep.subr.bf16.mxu0 %v5638_v5 }
 0x766   : > { %4899 = vmatpush3.bf16.msra.mxu0 %v6344_v48 }
 0x767   : > { %4924 = vmatprep.subr.bf16.mxu0 %v5638_v5 }
 0x81c   : > { %v1457_v1 = vpop.f32.mrb[6].mxu0 }
 0x81d   : > { %v1471_v51 = vadd.f32 %v6116_v54, %v1457_v1  ;;  %v1459_v50 = vpop.f32.mrb[7].mxu0 }
 0x81e   : > { %v1752_v38 = vadd.f32 %v6119_v56, %v1459_v50 }
 0x81f   : > { %v1472_v14 = vmul.f32 %v1471_v51, %v1471_v51  ;;  %v1475_v26 = vmul.f32 0.01, %v1471_v51 }
 0x820   : > { %v1753_v57 = vmul.f32 %v1752_v38, %v1752_v38  ;;  %v1756_v63 = vmul.f32 0.01, %v1752_v38 }
 0x821   : > { %1473 = vadd.xlane.f32.xlu1 %v1472_v14  ;;  %v1478_v48 = vmul.f32 %v1475_v26, %v1475_v26 }
 0x822   : > { %1754 = vadd.xlane.f32.xlu0 %v1753_v57  ;;  %v1759_v54 = vmul.f32 %v1756_v63, %v1756_v63 }
 0x838   : > { %1482 = vperm.xlu0 %5312, %v1475_v26  }
 0x8ae   : > { %v1474_v16 = vpop.xlane.xlu1 %1473 }
 0x8af   : > { %v1476_v41 = vsub.f32 %v1474_v16, %v1472_v14  ;;  %v1755_v45 = vpop.xlane.xlu0 %1754 }
 0x8b0   : > { %v1757_v58 = vsub.f32 %v1755_v45, %v1753_v57 }
 0x8b1   : > { %v1477_v4 = vmul.f32 0.01, %v1476_v41 }
 0x8b2   : > { %v1758_v44 = vmul.f32 0.01, %v1757_v58 }
 0x8b3   : > { %v1479_v33 = vsub.f32 %v1477_v4, %v1478_v48 }
 0x8b4   : > { %v1760_v60 = vsub.f32 %v1758_v44, %v1759_v54 }
 0x8b5   : > { %v1486_v49 = vadd.f32 1e-05, %v1479_v33 }
 0x8b6   : > { %v1767_v56 = vadd.f32 1e-05, %v1760_v60 }
 0x8b7   : > { %5333 = vrsqrt.f32 %v1486_v49  ;;  %v1483_v17 = vpop.permute.xlu0 %1482 }
 0x8b8   : > { %5335 = vrsqrt.f32 %v1767_v56  ;;  %v1485_v28 = vsub.f32 %v1471_v51, %v1483_v17 }
 0x8c1   : > { %v5334_v19 = vpop.eup %5333 }
 0x8c2   : > { %1490 = vperm.xlu1 %5309, %v5334_v19   ;;  %v5336_v12 = vpop.eup %5335 }
 0x8c6   : > { %1763 = vperm.xlu1 %5309, %v1756_v63  }
 0x8ca   : > { %1771 = vperm.xlu1 %5309, %v5336_v12  }
 0x941   : > { %v1491_v34 = vpop.permute.xlu1 %1490 }
 0x942   : > { %v1493_v47 = vmul.f32 %v1491_v34, %v1485_v28 }
 0x944   : > { %v1501_v31 = vmul.f32 %v6192_v3, %v1493_v47 }
 0x945   : > { %v1764_v57 = vpop.permute.xlu1 %1763 }
 0x946   : > { %v1509_v1 = vadd.f32 %v6195_v11, %v1501_v31  ;;  %v1766_v16 = vsub.f32 %v1752_v38, %v1764_v57 }
 0x948   : > { %v1510_v50 = vadd.f32 %v1509_v1, %v6466_v42 }
 0x949   : > { %v1772_v26 = vpop.permute.xlu1 %1771 }
 0x94a   : > { %v1511_v14 = vmul.f32 0.5, %v1510_v50  ;;  %v1774_v41 = vmul.f32 %v1772_v26, %v1766_v16 }
 0x94c   : > { %5337 = vtanh.f32 %v1511_v14  ;;  %v1782_v63 = vmul.f32 %v6202_v24, %v1774_v41 }
 0x94e   : > { %v1790_v3 = vadd.f32 %v6210_v36, %v1782_v63 }
 0x950   : > { %v1791_v11 = vadd.f32 %v1790_v3, %v6466_v42 }
 0x952   : > { %v1792_v24 = vmul.f32 0.5, %v1791_v11 }
 0x954   : > { %5339 = vtanh.f32 %v1792_v24 }
 0x956   : > { %v5338_v45 = vpop.eup %5337 }
 0x957   : > { %v1513_v58 = vmul.f32 0.5, %v5338_v45 }
 0x959   : > { %v6493_v48 = vadd.f32 0.5, %v1513_v58 }
 0x95b   : > { %4305 = vmatmul.mubr.f32.vlgmr.msra.gmra.mrb[4].mxu1 %v6493_v48 }
 0x95c   : > { %4902 = vmatpush3.bf16.msra.mxu1 %v6207_v32  ;;  %4374 = vmatprep.mubr.msk.f32.mxu1 %vm5636_vm0, %v5635_v0 }
 0x95d   : > { %4903 = vmatprep.subr.bf16.mxu1 %v5638_v5 }
 0x95e   : > { %v5340_v32 = vpop.eup %5339 }
 0x95f   : > { %v1794_v36 = vmul.f32 0.5, %v5340_v32 }
 0x960   : > { %4905 = vmatpush3.bf16.msra.mxu1 %v6219_v43 }
 0x961   : > { %4906 = vmatprep.subr.bf16.mxu1 %v5638_v5  ;;  %v1795_v43 = vadd.f32 0.5, %v1794_v36 }
 0x964   : > { %4908 = vmatpush3.bf16.msra.mxu1 %v6228_v55 }
 0x965   : > { %4909 = vmatprep.subr.bf16.mxu1 %v5638_v5 }
 0x968   : > { %4911 = vmatpush3.bf16.msra.mxu1 %v6234_v2 }
 0x969   : > { %4912 = vmatprep.subr.bf16.mxu1 %v5638_v5 }
 0x96c   : > { %4914 = vmatpush3.bf16.msra.mxu1 %v6240_v13 }
 0x96d   : > { %4915 = vmatprep.subr.bf16.mxu1 %v5638_v5 }
 0x970   : > { %4917 = vmatpush3.bf16.msra.mxu1 %v6246_v18 }
 0x971   : > { %4918 = vmatprep.subr.bf16.mxu1 %v5638_v5 }
 0x974   : > { %4920 = vmatpush3.bf16.msra.mxu1 %v6252_v20 }
 0x975   : > { %4921 = vmatprep.subr.bf16.mxu1 %v5638_v5 }
 0x978   : > { %4923 = vmatpush3.bf16.msra.mxu1 %v6258_v27 }
 0x97b   : > { %4375 = vmatmul.mubr.f32.vlgmr.msra.gmra.mrb[6].mxu1 %v1795_v43 }
 0x97c   : > { %2130 = vmatprep.mubr.f32.mxu1 %v5635_v0 }
 0xa2e   : > { %v1604_v55 = vpop.f32.mrb[4].mxu1 }
 0xa2f   : > { %v1605_v2 = vadd.f32 %v6284_v7, %v1604_v55  ;;  %v4306_v13 = vpop.f32.mrb[5].mxu1 }
 0xa30   : > { %v2038_v13 = vld [vmem:[%s5989_s11 + $0x20] sm:$0xff] }
 0xa31   : > { %v1608_v51 = vmul.f32 %v1605_v2, %v1605_v2  ;;  %v1611_v18 = vmul.f32 0.01, %v1605_v2 }
 0xa33   : > { %1609 = vadd.xlane.f32.xlu1 %v1608_v51  ;;  %v1614_v54 = vmul.f32 %v1611_v18, %v1611_v18 }
 0xa44   : > { %1618 = vperm.xlu1 %5309, %v1611_v18   ;;  %v2043_v18 = vld [vmem:[%s5989_s11 + $0x48] sm:$0xff] }
 0xa4e   : > { %v1885_v38 = vpop.f32.mrb[6].mxu1 }
 0xa4f   : > { %v1886_v20 = vadd.f32 %v6293_v23, %v1885_v38  ;;  %v4376_v4 = vpop.f32.mrb[7].mxu1  ;;  %v2045_v38 = vld [vmem:[%s5989_s11 + $0x58] sm:$0xff] }
 0xa50   : > { %v6565_v4 = vpack.c.bf16 %v2045_v38, %v2043_v18 }
 0xa51   : > { %v1892_v33 = vmul.f32 0.01, %v1886_v20  ;;  %v1889_v44 = vmul.f32 %v1886_v20, %v1886_v20 }
 0xa53   : > { %1899 = vperm.xlu1 %5309, %v1892_v33   ;;  %1890 = vadd.xlane.f32.xlu0 %v1889_v44  ;;  %v1895_v28 = vmul.f32 %v1892_v33, %v1892_v33  ;;  %v2042_v33 = vld [vmem:[%s5989_s11 + $0x40] sm:$0xff] }
 0xac0   : > { %v1610_v27 = vpop.xlane.xlu1 %1609 }
 0xac1   : > { %v1612_v49 = vsub.f32 %v1610_v27, %v1608_v51  ;;  %v2040_v51 = vld [vmem:[%s5989_s11 + $0x30] sm:$0xff]  ;;  %v2047_v27 = vld [vmem:[%s5989_s11 + $0x68] sm:$0xff] }
 0xac3   : > { %v1613_v60 = vmul.f32 0.01, %v1612_v49  ;;  %v2049_v49 = vld [vmem:[%s5989_s11 + $0x78] sm:$0xff] }
 0xac4   : > { %v1619_v1 = vpop.permute.xlu1 %1618 }
 0xac5   : > { %v1615_v56 = vsub.f32 %v1613_v60, %v1614_v54  ;;  %v1621_v50 = vsub.f32 %v1605_v2, %v1619_v1  ;;  %v6575_v60 = vpack.c.bf16 %v2049_v49, %v2047_v27  ;;  %v2191_v27 = vld [vmem:[%s5991_s18 + $0x8] sm:$0xff]  ;;  %v2192_v49 = vld [vmem:[%s5991_s18 + $0x10] sm:$0xff] }
 0xac7   : > { %v1622_v19 = vadd.f32 1e-05, %v1615_v56  ;;  %v2046_v56 = vld [vmem:[%s5989_s11 + $0x60] sm:$0xff] }
 0xac9   : > { %5341 = vrsqrt.f32 %v1622_v19  ;;  %v2048_v19 = vld [vmem:[%s5989_s11 + $0x70] sm:$0xff] }
 0xad2   : > { %v1900_v11 = vpop.permute.xlu1 %1899 }
 0xad3   : > { %v5342_v7 = vpop.eup %5341  ;;  %v1902_v24 = vsub.f32 %v1886_v20, %v1900_v11  ;;  %v6562_v20 = vpack.c.bf16 %v2040_v51, %v2038_v13 }
 0xad4   : > { %1626 = vperm.xlu0 %5312, %v5342_v7   ;;  %v2051_v7 = vld [vmem:[%s5989_s11 + $0x88] sm:$0xff] }
 0xae0   : > { %v1891_v12 = vpop.xlane.xlu0 %1890 }
 0xae1   : > { %v1893_v17 = vsub.f32 %v1891_v12, %v1889_v44  ;;  %v2044_v44 = vld [vmem:[%s5989_s11 + $0x50] sm:$0xff]  ;;  %v2053_v12 = vld [vmem:[%s5989_s11 + $0x98] sm:$0xff] }
 0xae2   : > { %v6572_v54 = vpack.c.bf16 %v2044_v44, %v2042_v33  ;;  %v2190_v44 = vld [vmem:[%s5991_s18] sm:$0xff] }
 0xae3   : > { %v1894_v34 = vmul.f32 0.01, %v1893_v17  ;;  %v6582_v17 = vpack.c.bf16 %v2048_v19, %v2046_v56  ;;  %v6663_v56 = vpack.c.bf16 %v2191_v27, %v2190_v44  ;;  %v2193_v19 = vld [vmem:[%s5991_s18 + $0x18] sm:$0xff]  ;;  %v2202_v44 = vld [vmem:[%s5991_s18 + $0x60] sm:$0xff]  ;;  %v2203_v27 = vld [vmem:[%s5991_s18 + $0x68] sm:$0xff] }
 0xae5   : > { %v1896_v47 = vsub.f32 %v1894_v34, %v1895_v28  ;;  %v6585_v28 = vpack.c.bf16 %v2053_v12, %v2051_v7  ;;  %v2050_v34 = vld [vmem:[%s5989_s11 + $0x80] sm:$0xff]  ;;  %v6667_v7 = vpack.c.bf16 %v2193_v19, %v2192_v49  ;;  %v6699_v49 = vpack.c.bf16 %v2203_v27, %v2202_v44  ;;  %v2204_v19 = vld [vmem:[%s5991_s18 + $0x70] sm:$0xff]  ;;  %v3758_v27 = vld [vmem:[%s5991_s18 + $0x98] sm:$0xff] }
 0xae7   : > { %v1903_v23 = vadd.f32 1e-05, %v1896_v47  ;;  %v2052_v47 = vld [vmem:[%s5989_s11 + $0x90] sm:$0xff] }
 0xae8   : > { %v6592_v1 = vpack.c.bf16 %v2052_v47, %v2050_v34 }
 0xae9   : > { %5343 = vrsqrt.f32 %v1903_v23  ;;  %v2055_v23 = vld [vmem:[%s5989_s11 + $0xa8] sm:$0xff] }
 0xaf3   : > { %v5344_v31 = vpop.eup %5343 }
 0xaf4   : > { %1907 = vperm.xlu1 %5309, %v5344_v31   ;;  %v2057_v31 = vld [vmem:[%s5989_s11 + $0xb8] sm:$0xff] }
 0xaf8   : > { %5313 = vset.pattern.permute.xlu1 %v5639_v6 }
 0xb53   : > { %v1627_v14 = vpop.permute.xlu0 %1626 }
 0xb54   : > { %v1629_v57 = vmul.f32 %v1627_v14, %v1621_v50  ;;  %v6595_v50 = vpack.c.bf16 %v2057_v31, %v2055_v23  ;;  %v2054_v14 = vld [vmem:[%s5989_s11 + $0xa0] sm:$0xff] }
 0xb56   : > { %v1637_v26 = vmul.f32 %v6351_v61, %v1629_v57  ;;  %v2056_v57 = vld [vmem:[%s5989_s11 + $0xb0] sm:$0xff] }
 0xb58   : > { %v1645_v16 = vadd.f32 %v6354_v9, %v1637_v26  ;;  %v2059_v26 = vld [vmem:[%s5989_s11 + $0xc8] sm:$0xff] }
 0xb5a   : > { %v1646_v41 = vadd.f32 %v1645_v16, %v6493_v48  ;;  %v2061_v16 = vld [vmem:[%s5989_s11 + $0xd8] sm:$0xff] }
 0xb5c   : > { %v1647_v45 = vmul.f32 0.5, %v1646_v41  ;;  %v6602_v41 = vpack.c.bf16 %v2056_v57, %v2054_v14 }
 0xb5e   : > { %5345 = vtanh.f32 %v1647_v45  ;;  %v6605_v45 = vpack.c.bf16 %v2061_v16, %v2059_v26 }
 0xb68   : > { %v5346_v58 = vpop.eup %5345 }
 0xb69   : > { %v1649_v63 = vmul.f32 0.5, %v5346_v58  ;;  %v2058_v58 = vld [vmem:[%s5989_s11 + $0xc0] sm:$0xff] }
 0xb6b   : > { %v1650_v3 = vadd.f32 0.5, %v1649_v63  ;;  %v2060_v63 = vld [vmem:[%s5989_s11 + $0xd0] sm:$0xff] }
 0xb6d   : > { %4340 = vmatmul.mubr.f32.vlgmr.msra.gmra.mrb[8].mxu0 %v1650_v3  ;;  %v6610_v3 = vpack.c.bf16 %v2060_v63, %v2058_v58 }
 0xb6e   : > { %4926 = vmatpush3.bf16.msra.mxu0 %v6361_v22  ;;  %4409 = vmatprep.mubr.msk.f32.mxu0 %vm5636_vm0, %v5635_v0 }
 0xb6f   : > { %4927 = vmatprep.subr.bf16.mxu0 %v5638_v5 }
 0xb72   : > { %4929 = vmatpush3.bf16.msra.mxu0 %v6366_v37 }
 0xb73   : > { %v1908_v61 = vpop.permute.xlu1 %1907  ;;  %4930 = vmatprep.subr.bf16.mxu0 %v5638_v5 }
 0xb74   : > { %v1910_v9 = vmul.f32 %v1908_v61, %v1902_v24 }
 0xb76   : > { %v1918_v48 = vmul.f32 %v6378_v35, %v1910_v9  ;;  %4932 = vmatpush3.bf16.msra.mxu0 %v6375_v52 }
 0xb77   : > { %4933 = vmatprep.subr.bf16.mxu0 %v5638_v5 }
 0xb78   : > { %v1926_v22 = vadd.f32 %v6384_v15, %v1918_v48  ;;  %v2035_v15 = vld [vmem:[%s5989_s11 + $0x8] sm:$0xff] }
 0xb79   : > { %v2063_v48 = vld [vmem:[%s5989_s11 + $0xe8] sm:$0xff] }
 0xb7a   : > { %v1927_v32 = vadd.f32 %v1926_v22, %v1795_v43  ;;  %4935 = vmatpush3.bf16.msra.mxu0 %v6388_v29  ;;  %v2037_v29 = vld [vmem:[%s5989_s11 + $0x18] sm:$0xff]  ;;  %v2039_v43 = vld [vmem:[%s5989_s11 + $0x28] sm:$0xff] }
 0xb7b   : > { %4936 = vmatprep.subr.bf16.mxu0 %v5638_v5  ;;  %v2065_v22 = vld [vmem:[%s5989_s11 + $0xf8] sm:$0xff] }
 0xb7c   : > { %v1928_v36 = vmul.f32 0.5, %v1927_v32 }
 0xb7e   : > { %5347 = vtanh.f32 %v1928_v36  ;;  %4938 = vmatpush3.bf16.msra.mxu0 %v6396_v8  ;;  %v2034_v8 = vld [vmem:[%s5989_s11] sm:$0xff]  ;;  %v6621_v36 = vpack.c.bf16 %v2065_v22, %v2063_v48  ;;  %v2195_v48 = vld [vmem:[%s5991_s18 + $0x28] sm:$0xff] }
 0xb7f   : > { %4939 = vmatprep.subr.bf16.mxu0 %v5638_v5 }
 0xb82   : > { %4941 = vmatpush3.bf16.msra.mxu0 %v6402_v46  ;;  %v6547_v46 = vpack.c.bf16 %v2037_v29, %v2035_v15 }
 0xb83   : > { %4942 = vmatprep.subr.bf16.mxu0 %v5638_v5 }
 0xb84   : > { %4949 = vmatprep.subr.bf16.mxu1 %v6547_v46 }
 0xb86   : > { %4944 = vmatpush3.bf16.msra.mxu0 %v6408_v59  ;;  %v2036_v59 = vld [vmem:[%s5989_s11 + $0x10] sm:$0xff] }
 0xb87   : > { %4945 = vmatprep.subr.bf16.mxu0 %v5638_v5  ;;  %v6552_v55 = vpack.c.bf16 %v2036_v59, %v2034_v8 }
 0xb88   : > { %v5348_v37 = vpop.eup %5347 }
 0xb89   : > { %v1930_v52 = vmul.f32 0.5, %v5348_v37  ;;  %4951 = vmatpush1.bf16.msra.mxu1 %v6552_v55  ;;  %v2062_v37 = vld [vmem:[%s5989_s11 + $0xe0] sm:$0xff] }
 0xb8a   : > { %4947 = vmatpush3.bf16.msra.mxu0 %v6414_v40  ;;  %v2041_v40 = vld [vmem:[%s5989_s11 + $0x38] sm:$0xff] }
 0xb8b   : > { %v1931_v35 = vadd.f32 0.5, %v1930_v52  ;;  %4980 = vmatprep.subr.bf16.mxu0 %v5638_v5  ;;  %v6554_v2 = vpack.c.bf16 %v2041_v40, %v2039_v43  ;;  %v2064_v52 = vld [vmem:[%s5989_s11 + $0xf0] sm:$0xff]  ;;  %v6644_v43 = vld [vmem:[%s6113_s25] ss:$0 sm:$0xff]  ;;  %v6647_v40 = vld [vmem:[%s6113_s25 + $0x2] ss:$0 sm:$0xff] }
 0xb8c   : > { %s7126_s11 = sld [smem:[#allocation24_spill]] }
 0xb8d   : > { %4410 = vmatmul.mubr.f32.vlgmr.msra.gmra.mrb[8].mxu0 %v1931_v35  ;;  %4953 = vmatprep.subr.bf16.mxu1 %v6554_v2  ;;  %v6625_v35 = vpack.c.bf16 %v2064_v52, %v2062_v37  ;;  %v2196_v37 = vld [vmem:[%s5991_s18 + $0x30] sm:$0xff]  ;;  %v2197_v52 = vld [vmem:[%s5991_s18 + $0x38] sm:$0xff] }
 0xb8e   : > { %4444 = vmatprep.mubr.msk.f32.mxu0 %vm5636_vm0, %v5635_v0  ;;  %4955 = vmatpush1.bf16.msra.mxu1 %v6562_v20 }
 0xb8f   : > { %4957 = vmatprep.subr.bf16.mxu1 %v6565_v4  ;;  %4982 = vmatpush3.bf16.msra.mxu0 %v6663_v56 }
 0xb90   : > { %4983 = vmatprep.subr.bf16.mxu0 %v5638_v5 }
 0xb92   : > { %4959 = vmatpush1.bf16.msra.mxu1 %v6572_v54 }
 0xb93   : > { %4961 = vmatprep.subr.bf16.mxu1 %v6575_v60  ;;  %4985 = vmatpush3.bf16.msra.mxu0 %v6667_v7 }
 0xb94   : > { %4986 = vmatprep.subr.bf16.mxu0 %v5638_v5 }
 0xb96   : > { %4963 = vmatpush1.bf16.msra.mxu1 %v6582_v17 }
 0xb97   : > { %4965 = vmatprep.subr.bf16.mxu1 %v6585_v28 }
 0xb9a   : > { %4967 = vmatpush1.bf16.msra.mxu1 %v6592_v1 }
 0xb9b   : > { %4969 = vmatprep.subr.bf16.mxu1 %v6595_v50 }
 0xb9e   : > { %4971 = vmatpush1.bf16.msra.mxu1 %v6602_v41 }
 0xb9f   : > { %4973 = vmatprep.subr.bf16.mxu1 %v6605_v45 }
 0xba2   : > { %4975 = vmatpush1.bf16.msra.mxu1 %v6610_v3 }
 0xba3   : > { %4977 = vmatprep.subr.bf16.mxu1 %v6621_v36 }
 0xba6   : > { %4979 = vmatpush1.bf16.msra.mxu1 %v6625_v35 }
 0xba7   : > { %5004 = vmatprep.subr.bf16.mxu1 %v5638_v5 }
 0xc60   : > { %v2014_v11 = vpop.f32.mrb[8].mxu0 }
 0xc61   : > { %v6615_v24 = vadd.f32 %v6445_v10, %v2014_v11  ;;  %v4411_v61 = vpop.f32.mrb[9].mxu0  ;;  %v5381_v10 = vld [vmem:[%s5983_s28] sm:$0xff] }
 0xc62   : > { %v6634_v15 = vrot.slane %v5381_v10, %v1344_v30  ;;  %v6681_v10 = vpack.c.bf16 %v2197_v52, %v2196_v37  ;;  %v3755_v37 = vld [vmem:[%s5991_s18 + $0x80] sm:$0xff]  ;;  %v3756_v52 = vld [vmem:[%s5991_s18 + $0x88] sm:$0xff] }
 0xc63   : > { %v2019_v9 = vsub.f32 %v6615_v24, %v6448_v39 }
 0xc65   : > { %v2020_v32 = vmul.f32 0.05, %v2019_v9  ;;  %v2194_v9 = vld [vmem:[%s5991_s18 + $0x20] sm:$0xff] }
 0xc67   : > { %2023 = vperm.xlu1 %5313, %v2020_v32   ;;  %v6675_v32 = vpack.c.bf16 %v2195_v48, %v2194_v9 }
 0xc69   : > { %4988 = vmatpush3.bf16.msra.mxu0 %v6675_v32 }
 0xc6a   : > { %4989 = vmatprep.subr.bf16.mxu0 %v5638_v5 }
 0xc6b   : > { %5314 = vset.pattern.permute.xlu1 %v5637_v53 }
 0xc6d   : > { %4991 = vmatpush3.bf16.msra.mxu0 %v6681_v10 }
 0xc6e   : > { %4992 = vmatprep.subr.bf16.mxu0 %v5638_v5 }
 0xce6   : > { %v2024_v29 = vpop.permute.xlu1 %2023 }
 0xce7   : > { %v2030_v8 = vmul.f32 %v6634_v15, %v2024_v29  ;;  %v2198_v29 = vld [vmem:[%s5991_s18 + $0x40] sm:$0xff] }
 0xce9   : > { %v6638_v59 = vadd.f32 %v2030_v8, %v6466_v42  ;;  %v2199_v8 = vld [vmem:[%s5991_s18 + $0x48] sm:$0xff] }
 0xceb   : > { %2131 = vmatmul.mubr.f32.vlgmr.msra.gmra.mrb[8].mxu1 %v6638_v59 }
 0xcec   : > { %4479 = vmatprep.mubr.msk.f32.mxu1 %vm5636_vm0, %v5635_v0 }
 0xdbe   : > { %v2132_v30 = vpop.f32.mrb[8].mxu1 }
 0xdbf   : > { %v6650_v13 = vadd.f32 %v6644_v43, %v2132_v30  ;;  %v2134_v51 = vpop.f32.mrb[9].mxu1 }
 0xdc0   : > { %v6653_v42 = vadd.f32 %v6647_v40, %v2134_v51  ;;  %v6687_v51 = vpack.c.bf16 %v2199_v8, %v2198_v29 }
 0xdc1   : > { %v2147_v18 = vmul.f32 %v6650_v13, %v6650_v13  ;;  %v2150_v33 = vmul.f32 0.01, %v6650_v13 }
 0xdc2   : > { %v2428_v38 = vmul.f32 %v6653_v42, %v6653_v42  ;;  %v2431_v31 = vmul.f32 0.01, %v6653_v42  ;;  %4994 = vmatpush3.bf16.msra.mxu0 %v6687_v51 }
 0xdc3   : > { %2148 = vadd.xlane.f32.xlu1 %v2147_v18  ;;  %v2153_v14 = vmul.f32 %v2150_v33, %v2150_v33  ;;  %4995 = vmatprep.subr.bf16.mxu0 %v5638_v5 }
 0xdc4   : > { %2429 = vadd.xlane.f32.xlu0 %v2428_v38  ;;  %v2434_v63 = vmul.f32 %v2431_v31, %v2431_v31 }
 0xdda   : > { %2157 = vperm.xlu0 %5312, %v2150_v33  }
 0xe50   : > { %v2149_v12 = vpop.xlane.xlu1 %2148 }
 0xe51   : > { %v2151_v34 = vsub.f32 %v2149_v12, %v2147_v18  ;;  %v2430_v47 = vpop.xlane.xlu0 %2429  ;;  %v2200_v18 = vld [vmem:[%s5991_s18 + $0x50] sm:$0xff]  ;;  %v2205_v12 = vld [vmem:[%s5991_s18 + $0x78] sm:$0xff] }
 0xe52   : > { %v2432_v23 = vsub.f32 %v2430_v47, %v2428_v38  ;;  %v2201_v38 = vld [vmem:[%s5991_s18 + $0x58] sm:$0xff] }
 0xe53   : > { %v2152_v57 = vmul.f32 0.01, %v2151_v34  ;;  %v6693_v33 = vpack.c.bf16 %v2201_v38, %v2200_v18  ;;  %v6705_v34 = vpack.c.bf16 %v2205_v12, %v2204_v19  ;;  %v6726_v18 = vpack.c.bf16 %v3756_v52, %v3755_v37  ;;  %v6729_v38 = vld [vmem:[%s6188_s17 + $0x2] ss:$0 sm:$0xff]  ;;  %v3766_v37 = vld [vmem:[%s5991_s18 + $0xd8] sm:$0xff] }
 0xe54   : > { %v2433_v16 = vmul.f32 0.01, %v2432_v23 }
 0xe55   : > { %v2154_v26 = vsub.f32 %v2152_v57, %v2153_v14  ;;  %4997 = vmatpush3.bf16.msra.mxu0 %v6693_v33 }
 0xe56   : > { %v2435_v11 = vsub.f32 %v2433_v16, %v2434_v63  ;;  %4998 = vmatprep.subr.bf16.mxu0 %v5638_v5 }
 0xe57   : > { %v2161_v58 = vadd.f32 1e-05, %v2154_v26  ;;  %v6714_v26 = vld [vmem:[%s6188_s17] ss:$0 sm:$0xff] }
 0xe58   : > { %v2442_v61 = vadd.f32 1e-05, %v2435_v11 }
 0xe59   : > { %5349 = vrsqrt.f32 %v2161_v58  ;;  %5000 = vmatpush3.bf16.msra.mxu0 %v6699_v49  ;;  %v2158_v47 = vpop.permute.xlu0 %2157 }
 0xe5a   : > { %5351 = vrsqrt.f32 %v2442_v61  ;;  %5001 = vmatprep.subr.bf16.mxu0 %v5638_v5  ;;  %v2160_v23 = vsub.f32 %v6650_v13, %v2158_v47  ;;  %v3759_v47 = vld [vmem:[%s5991_s18 + $0xa0] sm:$0xff] }
 0xe5d   : > { %5003 = vmatpush3.bf16.msra.mxu0 %v6705_v34 }
 0xe5e   : > { %5028 = vmatprep.subr.bf16.mxu0 %v5638_v5 }
 0xe63   : > { %v5350_v22 = vpop.eup %5349 }
 0xe64   : > { %2165 = vperm.xlu1 %5314, %v5350_v22   ;;  %v5352_v30 = vpop.eup %5351  ;;  %v6721_v22 = vld [vmem:[%s5997_s9 + $0x2] ss:$0 sm:$0xff] }
 0xe68   : > { %2438 = vperm.xlu1 %5314, %v2431_v31   ;;  %v6711_v31 = vld [vmem:[%s5997_s9] ss:$0 sm:$0xff] }
 0xe6c   : > { %2446 = vperm.xlu1 %5314, %v5352_v30  }
 0xee3   : > { %v2166_v14 = vpop.permute.xlu1 %2165 }
 0xee4   : > { %v2168_v57 = vmul.f32 %v2166_v14, %v2160_v23  ;;  %v3760_v23 = vld [vmem:[%s5991_s18 + $0xa8] sm:$0xff] }
 0xee6   : > { %v2176_v16 = vmul.f32 %v6711_v31, %v2168_v57  ;;  %v6747_v57 = vpack.c.bf16 %v3760_v23, %v3759_v47 }
 0xee7   : > { %v2439_v61 = vpop.permute.xlu1 %2438 }
 0xee8   : > { %v2184_v58 = vadd.f32 %v6714_v26, %v2176_v16  ;;  %v2441_v9 = vsub.f32 %v6653_v42, %v2439_v61  ;;  %v3757_v42 = vld [vmem:[%s5991_s18 + $0x90] sm:$0xff]  ;;  %v3763_v61 = vld [vmem:[%s5991_s18 + $0xc0] sm:$0xff] }
 0xee9   : > { %v6738_v12 = vpack.c.bf16 %v3758_v27, %v3757_v42  ;;  %v3761_v16 = vld [vmem:[%s5991_s18 + $0xb0] sm:$0xff]  ;;  %v3770_v27 = vld [vmem:[%s5991_s18 + $0xf8] sm:$0xff] }
 0xeea   : > { %v2185_v63 = vadd.f32 %v2184_v58, %v6638_v59  ;;  %v3762_v58 = vld [vmem:[%s5991_s18 + $0xb8] sm:$0xff]  ;;  %v3769_v42 = vld [vmem:[%s5991_s18 + $0xf0] sm:$0xff] }
 0xeeb   : > { %v2447_v13 = vpop.permute.xlu1 %2446  ;;  %v6777_v47 = vpack.c.bf16 %v3770_v27, %v3769_v42  ;;  %v2331_v42 = vld [vmem:[%s5999_s27 + $0x28] sm:$0xff] }
 0xeec   : > { %v2186_v11 = vmul.f32 0.5, %v2185_v63  ;;  %v2449_v48 = vmul.f32 %v2447_v13, %v2441_v9  ;;  %v3764_v13 = vld [vmem:[%s5991_s18 + $0xc8] sm:$0xff] }
 0xeed   : > { %v6759_v9 = vpack.c.bf16 %v3764_v13, %v3763_v61 }
 0xeee   : > { %5353 = vtanh.f32 %v2186_v11  ;;  %v2457_v30 = vmul.f32 %v6721_v22, %v2449_v48  ;;  %v6753_v11 = vpack.c.bf16 %v3762_v58, %v3761_v16  ;;  %v3765_v48 = vld [vmem:[%s5991_s18 + $0xd0] sm:$0xff]  ;;  %v2329_v16 = vld [vmem:[%s5999_s27 + $0x18] sm:$0xff] }
 0xeef   : > { %v6765_v52 = vpack.c.bf16 %v3766_v37, %v3765_v48 }
 0xef0   : > { %v2465_v19 = vadd.f32 %v6729_v38, %v2457_v30 }
 0xef2   : > { %v2466_v14 = vadd.f32 %v2465_v19, %v6638_v59 }
 0xef4   : > { %v2467_v63 = vmul.f32 0.5, %v2466_v14 }
 0xef6   : > { %5355 = vtanh.f32 %v2467_v63 }
 0xef8   : > { %v5354_v29 = vpop.eup %5353 }
 0xef9   : > { %v2188_v8 = vmul.f32 0.5, %v5354_v29  ;;  %v3767_v29 = vld [vmem:[%s5991_s18 + $0xe0] sm:$0xff] }
 0xefb   : > { %v6731_v44 = vadd.f32 0.5, %v2188_v8  ;;  %v3768_v8 = vld [vmem:[%s5991_s18 + $0xe8] sm:$0xff] }
 0xefc   : > { %v6771_v30 = vpack.c.bf16 %v3768_v8, %v3767_v29  ;;  %v2330_v8 = vld [vmem:[%s5999_s27 + $0x20] sm:$0xff] }
 0xefd   : > { %4445 = vmatmul.mubr.f32.vlgmr.msra.gmra.mrb[10].mxu0 %v6731_v44  ;;  %v6835_v27 = vpack.c.bf16 %v2331_v42, %v2330_v8 }
 0xefe   : > { %5030 = vmatpush3.bf16.msra.mxu0 %v6726_v18  ;;  %4514 = vmatprep.mubr.msk.f32.mxu0 %vm5636_vm0, %v5635_v0 }
 0xeff   : > { %5031 = vmatprep.subr.bf16.mxu0 %v5638_v5 }
 0xf00   : > { %v5356_v19 = vpop.eup %5355 }
 0xf01   : > { %v2469_v23 = vmul.f32 0.5, %v5356_v19  ;;  %v2332_v19 = vld [vmem:[%s5999_s27 + $0x30] sm:$0xff] }
 0xf02   : > { %5033 = vmatpush3.bf16.msra.mxu0 %v6738_v12 }
 0xf03   : > { %5034 = vmatprep.subr.bf16.mxu0 %v5638_v5  ;;  %v6781_v14 = vadd.f32 0.5, %v2469_v23  ;;  %v2333_v23 = vld [vmem:[%s5999_s27 + $0x38] sm:$0xff] }
 0xf06   : > { %5036 = vmatpush3.bf16.msra.mxu0 %v6747_v57 }
 0xf07   : > { %5037 = vmatprep.subr.bf16.mxu0 %v5638_v5 }
 0xf0a   : > { %5039 = vmatpush3.bf16.msra.mxu0 %v6753_v11 }
 0xf0b   : > { %5040 = vmatprep.subr.bf16.mxu0 %v5638_v5 }
 0xf0e   : > { %5042 = vmatpush3.bf16.msra.mxu0 %v6759_v9 }
 0xf0f   : > { %5043 = vmatprep.subr.bf16.mxu0 %v5638_v5 }
 0xf12   : > { %5045 = vmatpush3.bf16.msra.mxu0 %v6765_v52 }
 0xf13   : > { %5046 = vmatprep.subr.bf16.mxu0 %v5638_v5 }
 0xf16   : > { %5048 = vmatpush3.bf16.msra.mxu0 %v6771_v30 }
 0xf17   : > { %5049 = vmatprep.subr.bf16.mxu0 %v5638_v5 }
 0xf1a   : > { %5051 = vmatpush3.bf16.msra.mxu0 %v6777_v47 }
 0xf1b   : > { %5077 = vmatprep.subr.bf16.mxu0 %v6547_v46  ;;  %v6803_v46 = vld [vmem:[%s6113_s25 + $0x1] ss:$0 sm:$0xff] }
 0xf1d   : > { %4515 = vmatmul.mubr.f32.vlgmr.msra.gmra.mrb[12].mxu0 %v6781_v14 }
 0xf1e   : > { %5079 = vmatpush1.bf16.msra.mxu0 %v6552_v55  ;;  %2805 = vmatprep.mubr.f32.mxu0 %v5635_v0 }
 0xf1f   : > { %5081 = vmatprep.subr.bf16.mxu0 %v6554_v2 }
 0xf22   : > { %5083 = vmatpush1.bf16.msra.mxu0 %v6562_v20 }
 0xf23   : > { %5085 = vmatprep.subr.bf16.mxu0 %v6565_v4 }
 0xf26   : > { %5087 = vmatpush1.bf16.msra.mxu0 %v6572_v54 }
 0xf27   : > { %5089 = vmatprep.subr.bf16.mxu0 %v6575_v60  ;;  %v6812_v60 = vld [vmem:[%s6113_s25 + $0x3] ss:$0 sm:$0xff] }
 0xf2a   : > { %5091 = vmatpush1.bf16.msra.mxu0 %v6582_v17 }
 0xf2b   : > { %5093 = vmatprep.subr.bf16.mxu0 %v6585_v28 }
 0xf2e   : > { %5095 = vmatpush1.bf16.msra.mxu0 %v6592_v1 }
 0xf2f   : > { %5097 = vmatprep.subr.bf16.mxu0 %v6595_v50 }
 0xf32   : > { %5099 = vmatpush1.bf16.msra.mxu0 %v6602_v41 }
 0xf33   : > { %5101 = vmatprep.subr.bf16.mxu0 %v6605_v45  ;;  %v2326_v45 = vld [vmem:[%s5999_s27] sm:$0xff] }
 0xf36   : > { %5103 = vmatpush1.bf16.msra.mxu0 %v6610_v3  ;;  %v2327_v3 = vld [vmem:[%s5999_s27 + $0x8] sm:$0xff] }
 0xf37   : > { %5105 = vmatprep.subr.bf16.mxu0 %v6621_v36  ;;  %v2328_v36 = vld [vmem:[%s5999_s27 + $0x10] sm:$0xff] }
 0xf38   : > { %v6828_v58 = vpack.c.bf16 %v2329_v16, %v2328_v36  ;;  %v2339_v36 = vld [vmem:[%s5999_s27 + $0x68] sm:$0xff] }
 0xf3a   : > { %5107 = vmatpush1.bf16.msra.mxu0 %v6625_v35  ;;  %v6824_v35 = vpack.c.bf16 %v2327_v3, %v2326_v45  ;;  %v2338_v3 = vld [vmem:[%s5999_s27 + $0x60] sm:$0xff] }
 0xf3b   : > { %5132 = vmatprep.subr.bf16.mxu0 %v5638_v5 }
 0xf3c   : > { %5006 = vmatpush3.bf16.msra.mxu1 %v6824_v35 }
 0xf3d   : > { %5007 = vmatprep.subr.bf16.mxu1 %v5638_v5 }
 0xf40   : > { %5009 = vmatpush3.bf16.msra.mxu1 %v6828_v58 }
 0xf41   : > { %5010 = vmatprep.subr.bf16.mxu1 %v5638_v5 }
 0xf44   : > { %5012 = vmatpush3.bf16.msra.mxu1 %v6835_v27 }
 0xf45   : > { %5013 = vmatprep.subr.bf16.mxu1 %v5638_v5 }
 0xfd0   : > { %v2279_v55 = vpop.f32.mrb[10].mxu0 }
 0xfd1   : > { %v6806_v2 = vadd.f32 %v6803_v46, %v2279_v55  ;;  %v4446_v20 = vpop.f32.mrb[11].mxu0  ;;  %v6841_v55 = vpack.c.bf16 %v2333_v23, %v2332_v19  ;;  %v6871_v23 = vld [vmem:[%s5997_s9 + $0x1] ss:$0 sm:$0xff] }
 0xfd2   : > { %v2334_v20 = vld [vmem:[%s5999_s27 + $0x40] sm:$0xff] }
 0xfd3   : > { %v2283_v4 = vmul.f32 %v6806_v2, %v6806_v2  ;;  %v2286_v54 = vmul.f32 0.01, %v6806_v2  ;;  %5015 = vmatpush3.bf16.msra.mxu1 %v6841_v55 }
 0xfd4   : > { %5016 = vmatprep.subr.bf16.mxu1 %v5638_v5 }
 0xfd5   : > { %2284 = vadd.xlane.f32.xlu0 %v2283_v4  ;;  %v2289_v61 = vmul.f32 %v2286_v54, %v2286_v54 }
 0xfeb   : > { %2293 = vperm.xlu0 %5312, %v2286_v54  }
 0xff0   : > { %v2560_v17 = vpop.f32.mrb[12].mxu0 }
 0xff1   : > { %v6815_v28 = vadd.f32 %v6812_v60, %v2560_v17  ;;  %v4516_v1 = vpop.f32.mrb[13].mxu0  ;;  %v2336_v17 = vld [vmem:[%s5999_s27 + $0x50] sm:$0xff] }
 0xff2   : > { %v2337_v1 = vld [vmem:[%s5999_s27 + $0x58] sm:$0xff] }
 0xff3   : > { %v2567_v50 = vmul.f32 0.01, %v6815_v28  ;;  %v2564_v41 = vmul.f32 %v6815_v28, %v6815_v28  ;;  %v6853_v45 = vpack.c.bf16 %v2337_v1, %v2336_v17  ;;  %v6874_v17 = vld [vmem:[%s6188_s17 + $0x1] ss:$0 sm:$0xff] }
 0xff5   : > { %2574 = vperm.xlu0 %5312, %v2567_v50   ;;  %2565 = vadd.xlane.f32.xlu1 %v2564_v41 }
 0xff9   : > { %5315 = vset.pattern.permute.xlu0 %v5639_v6 }
0x1062   : > { %v2285_v6 = vpop.xlane.xlu0 %2284 }
0x1063   : > { %v2287_v63 = vsub.f32 %v2285_v6, %v2283_v4  ;;  %v2335_v4 = vld [vmem:[%s5999_s27 + $0x48] sm:$0xff] }
0x1064   : > { %v6847_v54 = vpack.c.bf16 %v2335_v4, %v2334_v20 }
0x1065   : > { %v2288_v13 = vmul.f32 0.01, %v2287_v63  ;;  %v6858_v63 = vpack.c.bf16 %v2339_v36, %v2338_v3 }
0x1066   : > { %5018 = vmatpush3.bf16.msra.mxu1 %v6847_v54 }
0x1067   : > { %v2290_v48 = vsub.f32 %v2288_v13, %v2289_v61  ;;  %5019 = vmatprep.subr.bf16.mxu1 %v5638_v5  ;;  %v2570_v61 = vmul.f32 %v2567_v50, %v2567_v50 }
0x1069   : > { %v2297_v37 = vadd.f32 1e-05, %v2290_v48  ;;  %v2340_v48 = vld [vmem:[%s5999_s27 + $0x70] sm:$0xff] }
0x106a   : > { %5021 = vmatpush3.bf16.msra.mxu1 %v6853_v45 }
0x106b   : > { %5357 = vrsqrt.f32 %v2297_v37  ;;  %5022 = vmatprep.subr.bf16.mxu1 %v5638_v5  ;;  %v2341_v37 = vld [vmem:[%s5999_s27 + $0x78] sm:$0xff] }
0x106c   : > { %v6864_v8 = vpack.c.bf16 %v2341_v37, %v2340_v48 }
0x106e   : > { %5024 = vmatpush3.bf16.msra.mxu1 %v6858_v63 }
0x106f   : > { %5025 = vmatprep.subr.bf16.mxu1 %v5638_v5 }
0x1072   : > { %5027 = vmatpush3.bf16.msra.mxu1 %v6864_v8 }
0x1073   : > { %5052 = vmatprep.subr.bf16.mxu1 %v5638_v5 }
0x1075   : > { %v5358_v29 = vpop.eup %5357 }
0x1076   : > { %2301 = vperm.xlu1 %5314, %v5358_v29  }
0x1082   : > { %v2566_v16 = vpop.xlane.xlu1 %2565 }
0x1083   : > { %v2568_v6 = vsub.f32 %v2566_v16, %v2564_v41  ;;  %v2294_v41 = vpop.permute.xlu0 %2293 }
0x1084   : > { %v2296_v19 = vsub.f32 %v6806_v2, %v2294_v41  ;;  %v3778_v2 = vld [vmem:[%s5999_s27 + $0x88] sm:$0xff]  ;;  %v3781_v41 = vld [vmem:[%s5999_s27 + $0xa0] sm:$0xff] }
0x1085   : > { %v2569_v13 = vmul.f32 0.01, %v2568_v6  ;;  %v3777_v6 = vld [vmem:[%s5999_s27 + $0x80] sm:$0xff] }
0x1086   : > { %v6881_v48 = vpack.c.bf16 %v3778_v2, %v3777_v6  ;;  %v6904_v2 = vld [vmem:[%s6188_s17 + $0x3] ss:$0 sm:$0xff] }
0x1087   : > { %v2571_v29 = vsub.f32 %v2569_v13, %v2570_v61 }
0x1089   : > { %v2578_v42 = vadd.f32 1e-05, %v2571_v29  ;;  %v3779_v29 = vld [vmem:[%s5999_s27 + $0x90] sm:$0xff] }
0x108b   : > { %5359 = vrsqrt.f32 %v2578_v42  ;;  %v3780_v42 = vld [vmem:[%s5999_s27 + $0x98] sm:$0xff] }
0x1095   : > { %v5360_v50 = vpop.eup %5359 }
0x1096   : > { %2582 = vperm.xlu1 %5314, %v5360_v50   ;;  %v2575_v50 = vpop.permute.xlu0 %2574 }
0x10f5   : > { %v2302_v20 = vpop.permute.xlu1 %2301 }
0x10f6   : > { %v2304_v4 = vmul.f32 %v2302_v20, %v2296_v19  ;;  %v3782_v19 = vld [vmem:[%s5999_s27 + $0xa8] sm:$0xff]  ;;  %v2577_v20 = vsub.f32 %v6815_v28, %v2575_v50 }
0x10f8   : > { %v2312_v1 = vmul.f32 %v6871_v23, %v2304_v4  ;;  %v6895_v4 = vpack.c.bf16 %v3782_v19, %v3781_v41  ;;  %v3787_v41 = vld [vmem:[%s5999_s27 + $0xd0] sm:$0xff]  ;;  %v3788_v19 = vld [vmem:[%s5999_s27 + $0xd8] sm:$0xff] }
0x10fa   : > { %v2320_v3 = vadd.f32 %v6874_v17, %v2312_v1  ;;  %v6898_v1 = vld [vmem:[%s5997_s9 + $0x3] ss:$0 sm:$0xff] }
0x10fc   : > { %v2321_v36 = vadd.f32 %v2320_v3, %v6731_v44  ;;  %v6886_v44 = vpack.c.bf16 %v3780_v42, %v3779_v29 }
0x10fe   : > { %v2322_v16 = vmul.f32 0.5, %v2321_v36  ;;  %v3783_v36 = vld [vmem:[%s5999_s27 + $0xb0] sm:$0xff] }
0x1100   : > { %5361 = vtanh.f32 %v2322_v16  ;;  %v3784_v16 = vld [vmem:[%s5999_s27 + $0xb8] sm:$0xff] }
0x1101   : > { %v6908_v28 = vpack.c.bf16 %v3784_v16, %v3783_v36  ;;  %v3789_v36 = vld [vmem:[%s5999_s27 + $0xe0] sm:$0xff] }
0x110a   : > { %v5362_v61 = vpop.eup %5361 }
0x110b   : > { %v2324_v13 = vmul.f32 0.5, %v5362_v61 }
0x110d   : > { %v2325_v37 = vadd.f32 0.5, %v2324_v13  ;;  %v3785_v13 = vld [vmem:[%s5999_s27 + $0xc0] sm:$0xff] }
0x110f   : > { %4480 = vmatmul.mubr.f32.vlgmr.msra.gmra.mrb[10].mxu1 %v2325_v37  ;;  %v3786_v37 = vld [vmem:[%s5999_s27 + $0xc8] sm:$0xff] }
0x1110   : > { %5054 = vmatpush3.bf16.msra.mxu1 %v6881_v48  ;;  %4549 = vmatprep.mubr.msk.f32.mxu1 %vm5636_vm0, %v5635_v0  ;;  %v6916_v50 = vpack.c.bf16 %v3786_v37, %v3785_v13 }
0x1111   : > { %5055 = vmatprep.subr.bf16.mxu1 %v5638_v5 }
0x1114   : > { %5057 = vmatpush3.bf16.msra.mxu1 %v6886_v44 }
0x1115   : > { %v2583_v3 = vpop.permute.xlu1 %2582  ;;  %5058 = vmatprep.subr.bf16.mxu1 %v5638_v5 }
0x1116   : > { %v2585_v6 = vmul.f32 %v2583_v3, %v2577_v20  ;;  %v6922_v3 = vpack.c.bf16 %v3788_v19, %v3787_v41 }
0x1118   : > { %v2593_v61 = vmul.f32 %v6898_v1, %v2585_v6  ;;  %5060 = vmatpush3.bf16.msra.mxu1 %v6895_v4  ;;  %v3791_v6 = vld [vmem:[%s5999_s27 + $0xf0] sm:$0xff] }
0x1119   : > { %5061 = vmatprep.subr.bf16.mxu1 %v5638_v5 }
0x111a   : > { %v2601_v29 = vadd.f32 %v6904_v2, %v2593_v61  ;;  %v3792_v61 = vld [vmem:[%s5999_s27 + $0xf8] sm:$0xff] }
0x111b   : > { %v6934_v13 = vpack.c.bf16 %v3792_v61, %v3791_v6 }
0x111c   : > { %v2602_v42 = vadd.f32 %v2601_v29, %v6781_v14  ;;  %5063 = vmatpush3.bf16.msra.mxu1 %v6908_v28  ;;  %v3790_v14 = vld [vmem:[%s5999_s27 + $0xe8] sm:$0xff] }
0x111d   : > { %5064 = vmatprep.subr.bf16.mxu1 %v5638_v5  ;;  %v6928_v16 = vpack.c.bf16 %v3790_v14, %v3789_v36 }
0x111e   : > { %v2603_v20 = vmul.f32 0.5, %v2602_v42 }
0x1120   : > { %5363 = vtanh.f32 %v2603_v20  ;;  %5066 = vmatpush3.bf16.msra.mxu1 %v6916_v50 }
0x1121   : > { %5067 = vmatprep.subr.bf16.mxu1 %v5638_v5 }
0x1124   : > { %5069 = vmatpush3.bf16.msra.mxu1 %v6922_v3 }
0x1125   : > { %5070 = vmatprep.subr.bf16.mxu1 %v5638_v5 }
0x1128   : > { %5072 = vmatpush3.bf16.msra.mxu1 %v6928_v16 }
0x1129   : > { %5073 = vmatprep.subr.bf16.mxu1 %v5638_v5 }
0x112a   : > { %v5364_v37 = vpop.eup %5363 }
0x112b   : > { %v2605_v29 = vmul.f32 0.5, %v5364_v37 }
0x112c   : > { %5075 = vmatpush3.bf16.msra.mxu1 %v6934_v13 }
0x112d   : > { %v2606_v42 = vadd.f32 0.5, %v2605_v29  ;;  %5108 = vmatprep.subr.bf16.mxu1 %v5638_v5 }
0x112f   : > { %4550 = vmatmul.mubr.f32.vlgmr.msra.gmra.mrb[10].mxu1 %v2606_v42 }
0x1130   : > { %5110 = vmatpush3.bf16.msra.mxu1 %v6663_v56  ;;  %4584 = vmatprep.mubr.msk.f32.mxu1 %vm5636_vm0, %v5635_v0  ;;  %v6958_v56 = vld [vmem:[%s6442_s19] ss:$0 sm:$0xff] }
0x1131   : > { %5111 = vmatprep.subr.bf16.mxu1 %v5638_v5 }
0x1134   : > { %5113 = vmatpush3.bf16.msra.mxu1 %v6667_v7  ;;  %v2032_v7 = vmul.f32 2.0, %v6615_v24 }
0x1135   : > { %5114 = vmatprep.subr.bf16.mxu1 %v5638_v5 }
0x1138   : > { %5116 = vmatpush3.bf16.msra.mxu1 %v6675_v32 }
0x1139   : > { %5117 = vmatprep.subr.bf16.mxu1 %v5638_v5 }
0x113c   : > { %5119 = vmatpush3.bf16.msra.mxu1 %v6681_v10 }
0x113d   : > { %5120 = vmatprep.subr.bf16.mxu1 %v5638_v5 }
0x1140   : > { %5122 = vmatpush3.bf16.msra.mxu1 %v6687_v51 }
0x1141   : > { %5123 = vmatprep.subr.bf16.mxu1 %v5638_v5 }
0x1144   : > { %5125 = vmatpush3.bf16.msra.mxu1 %v6693_v33  ;;  %v2033_v33 = vadd.f32 %v6448_v39, %v2032_v7 }
0x1145   : > { %5126 = vmatprep.subr.bf16.mxu1 %v5638_v5 }
0x1148   : > { %5128 = vmatpush3.bf16.msra.mxu1 %v6699_v49 }
0x1149   : > { %5129 = vmatprep.subr.bf16.mxu1 %v5638_v5 }
0x114c   : > { %5131 = vmatpush3.bf16.msra.mxu1 %v6705_v34  ;;  %v2704_v34 = vsub.s32 1, %v6455_v21 }
0x114d   : > { %5156 = vmatprep.subr.bf16.mxu1 %v5638_v5 }
0x114e   : > { %v2705_v36 = vrot.slane %v6457_v25, %v2704_v34 }
0x1202   : > { %v2689_v32 = vpop.f32.mrb[10].mxu1 }
0x1203   : > { %v5206_v10 = vadd.f32 %v6958_v56, %v2689_v32  ;;  %v4551_v51 = vpop.f32.mrb[11].mxu1 }
0x1205   : > { %v2694_v41 = vmul.f32 0.05, %v5206_v10  ;;  %v2707_v19 = vmul.f32 2.0, %v5206_v10 }
0x1207   : > { %2697 = vperm.xlu0 %5315, %v2694_v41   ;;  %v6963_v49 = vadd.f32 %v2707_v19, %v2033_v33 }
0x120b   : > { %5316 = vset.pattern.permute.xlu0 %v5637_v53 }
0x1286   : > { %v2698_v20 = vpop.permute.xlu0 %2697 }
0x1287   : > { %v2700_v24 = vmul.f32 %v2698_v20, %v6634_v15 }
0x1289   : > { %v2701_v14 = vadd.f32 %v2700_v24, %v6638_v59 }
0x128b   : > { %v6970_v6 = vadd.f32 %v2705_v36, %v2701_v14 }
0x128d   : > { %2806 = vmatmul.mubr.f32.vlgmr.msra.gmra.mrb[14].mxu0 %v6970_v6 }
0x128e   : > { %5134 = vmatpush3.bf16.msra.mxu0 %v6824_v35  ;;  %4619 = vmatprep.mubr.msk.f32.mxu0 %vm5636_vm0, %v5635_v0 }
0x128f   : > { %5135 = vmatprep.subr.bf16.mxu0 %v5638_v5 }
0x1292   : > { %5137 = vmatpush3.bf16.msra.mxu0 %v6828_v58 }
0x1293   : > { %5138 = vmatprep.subr.bf16.mxu0 %v5638_v5 }
0x1296   : > { %5140 = vmatpush3.bf16.msra.mxu0 %v6835_v27 }
0x1297   : > { %5141 = vmatprep.subr.bf16.mxu0 %v5638_v5 }
0x129a   : > { %5143 = vmatpush3.bf16.msra.mxu0 %v6841_v55 }
0x129b   : > { %5144 = vmatprep.subr.bf16.mxu0 %v5638_v5 }
0x129e   : > { %5146 = vmatpush3.bf16.msra.mxu0 %v6847_v54 }
0x129f   : > { %5147 = vmatprep.subr.bf16.mxu0 %v5638_v5 }
0x12a2   : > { %5149 = vmatpush3.bf16.msra.mxu0 %v6853_v45 }
0x12a3   : > { %5150 = vmatprep.subr.bf16.mxu0 %v5638_v5 }
0x12a6   : > { %5152 = vmatpush3.bf16.msra.mxu0 %v6858_v63 }
0x12a7   : > { %5153 = vmatprep.subr.bf16.mxu0 %v5638_v5 }
0x12aa   : > { %5155 = vmatpush3.bf16.msra.mxu0 %v6864_v8 }
0x12ab   : > { %5180 = vmatprep.subr.bf16.mxu0 %v5638_v5 }
0x1360   : > { %v2807_v53 = vpop.f32.mrb[14].mxu0 }
0x1361   : > { %v2821_v39 = vadd.f32 %v6644_v43, %v2807_v53  ;;  %v2809_v21 = vpop.f32.mrb[15].mxu0 }
0x1362   : > { %v3102_v25 = vadd.f32 %v6647_v40, %v2809_v21 }
0x1363   : > { %v2822_v15 = vmul.f32 %v2821_v39, %v2821_v39  ;;  %v2825_v35 = vmul.f32 0.01, %v2821_v39 }
0x1364   : > { %v3103_v59 = vmul.f32 %v3102_v25, %v3102_v25  ;;  %v3106_v45 = vmul.f32 0.01, %v3102_v25 }
0x1365   : > { %2823 = vadd.xlane.f32.xlu1 %v2822_v15  ;;  %v2828_v63 = vmul.f32 %v2825_v35, %v2825_v35 }
0x1366   : > { %3104 = vadd.xlane.f32.xlu0 %v3103_v59  ;;  %v3109_v43 = vmul.f32 %v3106_v45, %v3106_v45 }
0x137c   : > { %2832 = vperm.xlu0 %5316, %v2825_v35  }
0x13f2   : > { %v2824_v58 = vpop.xlane.xlu1 %2823 }
0x13f3   : > { %v2826_v27 = vsub.f32 %v2824_v58, %v2822_v15  ;;  %v3105_v55 = vpop.xlane.xlu0 %3104 }
0x13f4   : > { %v3107_v54 = vsub.f32 %v3105_v55, %v3103_v59 }
0x13f5   : > { %v2827_v8 = vmul.f32 0.01, %v2826_v27 }
0x13f6   : > { %v3108_v37 = vmul.f32 0.01, %v3107_v54 }
0x13f7   : > { %v2829_v61 = vsub.f32 %v2827_v8, %v2828_v63 }
0x13f8   : > { %v3110_v42 = vsub.f32 %v3108_v37, %v3109_v43 }
0x13f9   : > { %v2836_v29 = vadd.f32 1e-05, %v2829_v61 }
0x13fa   : > { %v3117_v40 = vadd.f32 1e-05, %v3110_v42 }
0x13fb   : > { %5365 = vrsqrt.f32 %v2836_v29  ;;  %v2833_v10 = vpop.permute.xlu0 %2832 }
0x13fc   : > { %5367 = vrsqrt.f32 %v3117_v40  ;;  %v2835_v51 = vsub.f32 %v2821_v39, %v2833_v10  ;;  %v3372_v10 = vstv %s5614_s12  ;;  %s3629_s12 = sshll.u32 %s6105_s24, 3 }
0x13fd   : > { %s589_s20 = scalar_lea.vmem %s7126_s11, %s3629_s12 }
0x1405   : > { %v5366_v7 = vpop.eup %5365 }
0x1406   : > { %2840 = vperm.xlu1 %5314, %v5366_v7   ;;  %v5368_v32 = vpop.eup %5367 }
0x140a   : > { %3113 = vperm.xlu1 %5314, %v3106_v45  }
0x140e   : > { %3121 = vperm.xlu1 %5314, %v5368_v32   ;;  %v3371_v32 = vand.u32 127, %v1342_v62 }
0x1410   : > { %vm3373_vm2 = vcmp.eq.s32.totalorder %v3371_v32, %v3372_v10 }
0x1485   : > { %v2841_v33 = vpop.permute.xlu1 %2840 }
0x1486   : > { %v2843_v41 = vmul.f32 %v2841_v33, %v2835_v51  ;;  %v3374_v51 = vld [vmem:[#allocation3] sm:$0xff] }
0x1487   : > { %v3377_v33 = vsel %vm3373_vm2, %v3374_v51, 0.0 }
0x1488   : > { %v2851_v19 = vmul.f32 %v6711_v31, %v2843_v41  ;;  %v3378_v41 = vsel %vm592_vm1, %v3377_v33, 0.0 }
0x1489   : > { %v3114_v24 = vpop.permute.xlu1 %3113 }
0x148a   : > { %v2859_v34 = vadd.f32 %v6714_v26, %v2851_v19  ;;  %v3116_v53 = vsub.f32 %v3102_v25, %v3114_v24 }
0x148c   : > { %v2860_v20 = vadd.f32 %v2859_v34, %v6970_v6 }
0x148d   : > { %v3122_v14 = vpop.permute.xlu1 %3121 }
0x148e   : > { %v2861_v36 = vmul.f32 0.5, %v2860_v20  ;;  %v3124_v21 = vmul.f32 %v3122_v14, %v3116_v53 }
0x1490   : > { %5369 = vtanh.f32 %v2861_v36  ;;  %v3132_v35 = vmul.f32 %v6721_v22, %v3124_v21 }
0x1492   : > { %v3140_v31 = vadd.f32 %v6729_v38, %v3132_v35 }
0x1494   : > { %v3141_v26 = vadd.f32 %v3140_v31, %v6970_v6 }
0x1496   : > { %v3142_v22 = vmul.f32 0.5, %v3141_v26 }
0x1498   : > { %5371 = vtanh.f32 %v3142_v22 }
0x149a   : > { %v5370_v15 = vpop.eup %5369 }
0x149b   : > { %v2863_v59 = vmul.f32 0.5, %v5370_v15 }
0x149d   : > { %v6997_v58 = vadd.f32 0.5, %v2863_v59 }
0x149f   : > { %4585 = vmatmul.mubr.f32.vlgmr.msra.gmra.mrb[12].mxu1 %v6997_v58 }
0x14a0   : > { %5158 = vmatpush3.bf16.msra.mxu1 %v6726_v18  ;;  %4654 = vmatprep.mubr.msk.f32.mxu1 %vm5636_vm0, %v5635_v0 }
0x14a1   : > { %5159 = vmatprep.subr.bf16.mxu1 %v5638_v5 }
0x14a2   : > { %v5372_v18 = vpop.eup %5371 }
0x14a3   : > { %v3144_v38 = vmul.f32 0.5, %v5372_v18 }
0x14a4   : > { %5161 = vmatpush3.bf16.msra.mxu1 %v6738_v12 }
0x14a5   : > { %5162 = vmatprep.subr.bf16.mxu1 %v5638_v5  ;;  %v7019_v12 = vadd.f32 0.5, %v3144_v38 }
0x14a8   : > { %5164 = vmatpush3.bf16.msra.mxu1 %v6747_v57 }
0x14a9   : > { %5165 = vmatprep.subr.bf16.mxu1 %v5638_v5 }
0x14ac   : > { %5167 = vmatpush3.bf16.msra.mxu1 %v6753_v11 }
0x14ad   : > { %5168 = vmatprep.subr.bf16.mxu1 %v5638_v5 }
0x14b0   : > { %5170 = vmatpush3.bf16.msra.mxu1 %v6759_v9 }
0x14b1   : > { %5171 = vmatprep.subr.bf16.mxu1 %v5638_v5 }
0x14b4   : > { %5173 = vmatpush3.bf16.msra.mxu1 %v6765_v52 }
0x14b5   : > { %5174 = vmatprep.subr.bf16.mxu1 %v5638_v5 }
0x14b8   : > { %5176 = vmatpush3.bf16.msra.mxu1 %v6771_v30 }
0x14b9   : > { %5177 = vmatprep.subr.bf16.mxu1 %v5638_v5 }
0x14bc   : > { %5179 = vmatpush3.bf16.msra.mxu1 %v6777_v47 }
0x14bf   : > { %4655 = vmatmul.mubr.f32.vlgmr.msra.gmra.mrb[14].mxu1 %v7019_v12 }
0x1572   : > { %v2954_v57 = vpop.f32.mrb[12].mxu1 }
0x1573   : > { %v2955_v11 = vadd.f32 %v6803_v46, %v2954_v57  ;;  %v4586_v9 = vpop.f32.mrb[13].mxu1 }
0x1575   : > { %v2958_v6 = vmul.f32 %v2955_v11, %v2955_v11  ;;  %v2961_v52 = vmul.f32 0.01, %v2955_v11 }
0x1577   : > { %2959 = vadd.xlane.f32.xlu1 %v2958_v6  ;;  %v2964_v45 = vmul.f32 %v2961_v52, %v2961_v52 }
0x1588   : > { %2968 = vperm.xlu1 %5314, %v2961_v52  }
0x1592   : > { %v3235_v39 = vpop.f32.mrb[14].mxu1 }
0x1593   : > { %v3236_v30 = vadd.f32 %v6812_v60, %v3235_v39  ;;  %v4656_v25 = vpop.f32.mrb[15].mxu1 }
0x1595   : > { %v3242_v27 = vmul.f32 0.01, %v3236_v30  ;;  %v3239_v55 = vmul.f32 %v3236_v30, %v3236_v30 }
0x1597   : > { %3249 = vperm.xlu1 %5314, %v3242_v27   ;;  %3240 = vadd.xlane.f32.xlu0 %v3239_v55  ;;  %v3245_v43 = vmul.f32 %v3242_v27, %v3242_v27 }
0x1604   : > { %v2960_v47 = vpop.xlane.xlu1 %2959 }
0x1605   : > { %v2962_v54 = vsub.f32 %v2960_v47, %v2958_v6 }
0x1607   : > { %v2963_v63 = vmul.f32 0.01, %v2962_v54 }
0x1608   : > { %v2969_v19 = vpop.permute.xlu1 %2968 }
0x1609   : > { %v2965_v8 = vsub.f32 %v2963_v63, %v2964_v45  ;;  %v2971_v34 = vsub.f32 %v2955_v11, %v2969_v19 }
0x160b   : > { %v2972_v46 = vadd.f32 1e-05, %v2965_v8 }
0x160d   : > { %5373 = vrsqrt.f32 %v2972_v46 }
0x1616   : > { %v3250_v35 = vpop.permute.xlu1 %3249 }
0x1617   : > { %v5374_v61 = vpop.eup %5373  ;;  %v3252_v31 = vsub.f32 %v3236_v30, %v3250_v35 }
0x1618   : > { %2976 = vperm.xlu0 %5316, %v5374_v61  }
0x1624   : > { %v3241_v37 = vpop.xlane.xlu0 %3240 }
0x1625   : > { %v3243_v29 = vsub.f32 %v3241_v37, %v3239_v55 }
0x1627   : > { %v3244_v42 = vmul.f32 0.01, %v3243_v29 }
0x1629   : > { %v3246_v60 = vsub.f32 %v3244_v42, %v3245_v43 }
0x162b   : > { %v3253_v40 = vadd.f32 1e-05, %v3246_v60 }
0x162d   : > { %5375 = vrsqrt.f32 %v3253_v40 }
0x1637   : > { %v5376_v7 = vpop.eup %5375 }
0x1638   : > { %3257 = vperm.xlu1 %5314, %v5376_v7  }
0x165c   : > { %3379 = vadd.xlane.f32.xlu1 %v3378_v41 }
0x1697   : > { %v2977_v20 = vpop.permute.xlu0 %2976 }
0x1698   : > { %v2979_v36 = vmul.f32 %v2977_v20, %v2971_v34 }
0x169a   : > { %v2987_v24 = vmul.f32 %v6871_v23, %v2979_v36 }
0x169c   : > { %v2995_v14 = vadd.f32 %v6874_v17, %v2987_v24 }
0x169e   : > { %v2996_v53 = vadd.f32 %v2995_v14, %v6997_v58 }
0x16a0   : > { %v2997_v21 = vmul.f32 0.5, %v2996_v53 }
0x16a2   : > { %5377 = vtanh.f32 %v2997_v21 }
0x16ac   : > { %v5378_v62 = vpop.eup %5377 }
0x16ad   : > { %v2999_v15 = vmul.f32 0.5, %v5378_v62 }
0x16af   : > { %v3000_v59 = vadd.f32 0.5, %v2999_v15 }
0x16b1   : > { %4620 = vmatmul.mubr.f32.vlgmr.msra.gmra.mrb[16].mxu0 %v3000_v59 }
0x16b2   : > { %5182 = vmatpush3.bf16.msra.mxu0 %v6881_v48  ;;  %4689 = vmatprep.mubr.msk.f32.mxu0 %vm5636_vm0, %v5635_v0 }
0x16b3   : > { %5183 = vmatprep.subr.bf16.mxu0 %v5638_v5 }
0x16b6   : > { %5185 = vmatpush3.bf16.msra.mxu0 %v6886_v44 }
0x16b7   : > { %v3258_v23 = vpop.permute.xlu1 %3257  ;;  %5186 = vmatprep.subr.bf16.mxu0 %v5638_v5 }
0x16b8   : > { %v3260_v17 = vmul.f32 %v3258_v23, %v3252_v31 }
0x16ba   : > { %v3268_v58 = vmul.f32 %v6898_v1, %v3260_v17  ;;  %5188 = vmatpush3.bf16.msra.mxu0 %v6895_v4 }
0x16bb   : > { %5189 = vmatprep.subr.bf16.mxu0 %v5638_v5 }
0x16bc   : > { %v3276_v48 = vadd.f32 %v6904_v2, %v3268_v58 }
0x16be   : > { %v3277_v0 = vadd.f32 %v3276_v48, %v7019_v12  ;;  %5191 = vmatpush3.bf16.msra.mxu0 %v6908_v28 }
0x16bf   : > { %5192 = vmatprep.subr.bf16.mxu0 %v5638_v5 }
0x16c0   : > { %v3278_v26 = vmul.f32 0.5, %v3277_v0 }
0x16c2   : > { %5379 = vtanh.f32 %v3278_v26  ;;  %5194 = vmatpush3.bf16.msra.mxu0 %v6916_v50 }
0x16c3   : > { %5195 = vmatprep.subr.bf16.mxu0 %v5638_v5 }
0x16c6   : > { %5197 = vmatpush3.bf16.msra.mxu0 %v6922_v3 }
0x16c7   : > { %5198 = vmatprep.subr.bf16.mxu0 %v5638_v5 }
0x16ca   : > { %5200 = vmatpush3.bf16.msra.mxu0 %v6928_v16 }
0x16cb   : > { %5201 = vmatprep.subr.bf16.mxu0 %v5638_v5 }
0x16cc   : > { %v5380_v44 = vpop.eup %5379 }
0x16cd   : > { %v3280_v4 = vmul.f32 0.5, %v5380_v44 }
0x16ce   : > { %5203 = vmatpush3.bf16.msra.mxu0 %v6934_v13 }
0x16cf   : > { %v3281_v1 = vadd.f32 0.5, %v3280_v4 }
0x16d1   : > { %4690 = vmatmul.mubr.f32.vlgmr.msra.gmra.mrb[18].mxu0 %v3281_v1 }
0x16e9   : > { %v3380_v12 = vpop.xlane.xlu1 %3379 }
0x1784   : > { %v3083_v2 = vpop.f32.mrb[16].mxu0 }
0x1785   : > { %v4621_v28 = vpop.f32.mrb[17].mxu0  ;;  %v3093_v50 = vadd.f32 %v6958_v56, %v3083_v2 }
0x17a4   : > { %v3364_v22 = vpop.f32.mrb[18].mxu0 }
0x17a5   : > { %v3368_v18 = vadd.f32 %v3364_v22, %v3093_v50  ;;  %v4691_v3 = vpop.f32.mrb[19].mxu0 }
0x17a7   : > { %v3369_v38 = vadd.f32 %v3368_v18, %v6963_v49 }
0x17a9   : > { %v3381_v16 = vmul.f32 0.016666668, %v3369_v38 }
0x17ab   : > { %v3382_v5 = vadd.f32 %v3381_v16, %v3380_v12 }
0x17ad   : > { %3384 = vst.msk [vmem:[%s589_s20] sm:$0xff] %vm3383_vm3, %v3382_v5 }
0x17ae PF: > { %s29_s14 = sadd.s32 1, %s5622_s14   ;;  %s7127_s18 = sld [smem:[#allocation17_spill]] }
0x17af   : > { %p26_p1 = scmp.ge.s32.totalorder %s29_s14, 5   ;;  %s7128_s11 = sld [smem:[#allocation19_spill]] }
0x17b0   : > { %s7129_s1 = sld [smem:[#allocation18_spill]]  ;;  %s7130_s30 = smov %s5606_s10 }
0x17b1   : > { %s7132_s12 = smov %s5618_s13  ;;  %28 = sbr.rel (!%p26_p1) target bundleno = 15 (0xf), region = 170 }
0x17b4   : > { %s7131_s10 = smov %s7127_s18 }
0x17b6   : > { %s7133_s13 = smov %s7129_s1 }
0x17b8   :  { %3410 = vsyncpa [#allocation4], 1 }
0x17b9   :  { %3412 = vsyncpa [#allocation4 + $0x1], 1 }
0x17ba   :  { %3413 = vsyncpa [#allocation6], 1 }
0x17bb   :  { %3415 = vsyncpa [#allocation6 + $0x1], 1 }
0x17bc   :  { %3416 = vsyncpa [#allocation9], 1 }
0x17bd   :  { %3418 = vsyncpa [#allocation9 + $0x1], 1 }
0x17be   :  { %3419 = vsyncpa [#allocation12], 1 }
0x17bf   :  { %3421 = vsyncpa [#allocation12 + $0x1], 1 }

</bundles_post_ra>
